<compile_context>
chip_gen: v7x
topology: tpu7x:2x2x1
jax: 0.10.0
libtpu: 0.0.40
codegen_flags: <defaults>
</compile_context>

<pallas_src>
import functools

import jax
import jax.numpy as jnp
from jax.experimental import pallas as pl
from jax.experimental.pallas import tpu as pltpu


# ---------------------------------------------------------------------------
# Fused forward kernel
# ---------------------------------------------------------------------------
def _fused_forward_kernel(*refs, seq, n_nodes, num_gcn_layers, lstm_layers,
                          hidden):
    S, N, H = seq, n_nodes, hidden
    f32 = jnp.float32

    it = iter(refs)
    nf_ref = next(it)                         # (S*N, D)   f32
    adj_ref = next(it)                        # (S*N, N)   f32
    gcn_refs = [(next(it), next(it)) for _ in range(num_gcn_layers)]
    lstm_refs = [(next(it), next(it), next(it)) for _ in range(lstm_layers)]
    h0_ref = next(it)                         # (L, N, H)
    c0_ref = next(it)                         # (L, N, H)
    fc1_w_ref = next(it)                      # (N*H, 1024) bf16
    fc1_b_ref = next(it)                      # (1, 1024)   f32
    fc2_w_ref = next(it)                      # (1024, 256) bf16
    fc2_b_ref = next(it)                      # (1, 256)    f32
    fc3_w_ref = next(it)                      # (256, O)    f32
    fc3_b_ref = next(it)                      # (1, O)      f32
    out_ref = next(it)                        # (S, O)      f32

    # ---------------- SpatialGCN: all timesteps batched on the sublane axis
    nf2d = nf_ref[...]                        # (S*N, D)
    adj2d = adj_ref[...]                      # (S*N, N)
    adj_blk = [adj2d[s * N:(s + 1) * N, :] for s in range(S)]   # S x (N, N)

    lh = nf2d                                 # Last_Hidden starts as NodesFeature
    for layer, (w1_ref, w2_ref) in enumerate(gcn_refs):
        # Own / X terms: one MXU call each over all S timesteps.
        own = jnp.dot(nf2d, w1_ref[...], preferred_element_type=f32)
        xp = jnp.dot(lh, w2_ref[...], preferred_element_type=f32)
        # Per-timestep Adj @ X (tiny NxN @ NxG), statically unrolled.
        agg = jnp.concatenate(
            [jnp.dot(adj_blk[s], xp[s * N:(s + 1) * N, :],
                     preferred_element_type=f32) for s in range(S)],
            axis=0)
        h = own + agg
        if layer == 0:                        # ReLU only after GCN layer 0
            h = jnp.maximum(h, 0.0)
        lh = h                                # (S*N, G_layer)

    # ---------------- LSTM: hoisted input projection + unrolled recurrence
    x2d = lh                                  # (S*N, I0)
    h_seq = None
    for layer, (wih_ref, whh_ref, b_ref) in enumerate(lstm_refs):
        # Batched per-gate input projections (off the serial critical path).
        gx = [jnp.dot(x2d, wih_ref[g], preferred_element_type=f32) + b_ref[g]
              for g in range(4)]              # gate order i, f, g, o
        whh = [whh_ref[g] for g in range(4)]  # each (H, H), read once
        h = h0_ref[layer]                     # (N, H) carried as a value
        c = c0_ref[layer]
        h_seq = []
        for t in range(S):                    # statically unrolled recurrence
            rows = slice(t * N, (t + 1) * N)
            gh = [jnp.dot(h, whh[g], preferred_element_type=f32)
                  for g in range(4)]
            i_g = jax.nn.sigmoid(gx[0][rows] + gh[0])
            f_g = jax.nn.sigmoid(gx[1][rows] + gh[1])
            g_g = jnp.tanh(gx[2][rows] + gh[2])
            o_g = jax.nn.sigmoid(gx[3][rows] + gh[3])
            c = f_g * c + i_g * g_g
            h = o_g * jnp.tanh(c)
            h_seq.append(h)                   # (N, H)
        if layer + 1 < lstm_layers:
            x2d = jnp.concatenate(h_seq, axis=0)

    # ---------------- FC head (fully fused, weights VMEM resident) ---------
    # fc1 decomposed over the node axis so the (S, N, H) LSTM output never
    # needs a sublane->lane reshape to (S, N*H):
    #   fc1(out)[s] = sum_b  h_seq[s][b] @ fc1_w[b*H:(b+1)*H]  + fc1_b
    n_fc1 = fc1_b_ref.shape[-1]
    a1 = jnp.broadcast_to(fc1_b_ref[...], (S, n_fc1))
    for b in range(N):
        hb = jnp.concatenate([h_seq[t][b:b + 1, :] for t in range(S)], axis=0)
        a1 = a1 + jnp.dot(hb.astype(fc1_w_ref.dtype),
                          fc1_w_ref[pl.ds(b * H, H), :],
                          preferred_element_type=f32)
    a2 = jnp.dot(a1.astype(fc2_w_ref.dtype), fc2_w_ref[...],
                 preferred_element_type=f32) + fc2_b_ref[...]
    a3 = jnp.dot(a2.astype(fc3_w_ref.dtype), fc3_w_ref[...],
                 preferred_element_type=f32) + fc3_b_ref[...]
    out_ref[...] = a3.astype(out_ref.dtype)


# ---------------------------------------------------------------------------
# Wrapper: one pallas_call for the entire forward pass
# ---------------------------------------------------------------------------
def _forward_impl(params, nodes_features, adjacencies, state_key, *,
                  seq, n_nodes, hidden_lstm, lstm_layers, out_dims):
    S, N = seq, n_nodes
    # h0/c0 drawn fresh each forward, as in the PyTorch module (torch.randn).
    kh, kc = jax.random.split(state_key)
    h0 = jax.random.normal(kh, (lstm_layers, N, hidden_lstm), jnp.float32)
    c0 = jax.random.normal(kc, (lstm_layers, N, hidden_lstm), jnp.float32)

    # Row-major collapses (free in XLA): time-major rows = s*N + node.
    nf2d = nodes_features.reshape(S * N, -1)
    adj2d = adjacencies.reshape(S * N, N)

    flat = [nf2d, adj2d]
    for w1, w2 in params["gcn"]:
        flat += [w1, w2]
    for w_ih, w_hh, b in params["lstm"]:
        flat += [w_ih, w_hh, b]
    flat += [h0, c0,
             params["fc1_w"], params["fc1_b"],
             params["fc2_w"], params["fc2_b"],
             params["fc3_w"], params["fc3_b"]]

    kernel = functools.partial(
        _fused_forward_kernel, seq=S, n_nodes=N,
        num_gcn_layers=len(params["gcn"]), lstm_layers=lstm_layers,
        hidden=hidden_lstm)

    vmem_spec = pl.BlockSpec(memory_space=pltpu.MemorySpace.VMEM)
    return pl.pallas_call(
        kernel,
        out_shape=jax.ShapeDtypeStruct((S, out_dims), jnp.float32),
        in_specs=[vmem_spec] * len(flat),
        out_specs=vmem_spec,
    )(*flat)


# ---------------------------------------------------------------------------
# Pure-JAX reference (same math, layer-by-layer) for a correctness check.
# ---------------------------------------------------------------------------
def _reference_forward(params, nodes_features, adjacencies, state_key,
                       seq, n_nodes, hidden_lstm, lstm_layers):
    S, N = seq, n_nodes
    kh, kc = jax.random.split(state_key)
    h0 = jax.random.normal(kh, (lstm_layers, N, hidden_lstm), jnp.float32)
    c0 = jax.random.normal(kc, (lstm_layers, N, hidden_lstm), jnp.float32)

    nf = nodes_features
    lh = nf
    for layer, (w1, w2) in enumerate(params["gcn"]):
        own = jnp.einsum("snd,dg->sng", nf, w1)
        xp = jnp.einsum("sni,ig->sng", lh, w2)
        agg = jnp.einsum("snm,smg->sng", adjacencies, xp)
        h = own + agg
        if layer == 0:
            h = jax.nn.relu(h)
        lh = h
    x = lh                                     # (S, N, G)

    for layer, (w_ih, w_hh, b) in enumerate(params["lstm"]):
        h = h0[layer]
        c = c0[layer]
        outs = []
        for t in range(S):
            gx = [x[t] @ w_ih[g] + b[g] for g in range(4)]
            gh = [h @ w_hh[g] for g in range(4)]
            i_g = jax.nn.sigmoid(gx[0] + gh[0])
            f_g = jax.nn.sigmoid(gx[1] + gh[1])
            g_g = jnp.tanh(gx[2] + gh[2])
            o_g = jax.nn.sigmoid(gx[3] + gh[3])
            c = f_g * c + i_g * g_g
            h = o_g * jnp.tanh(c)
            outs.append(h)
        x = jnp.stack(outs, axis=0)            # (S, N, H)

    lstm2d = x.reshape(S, -1)
    a1 = lstm2d @ params["fc1_w"].astype(jnp.float32) + params["fc1_b"]
    a2 = a1 @ params["fc2_w"].astype(jnp.float32) + params["fc2_b"]
    return a2 @ params["fc3_w"] + params["fc3_b"]


# ---------------------------------------------------------------------------
# Parameter init (mirrors the PyTorch init distributions)
# ---------------------------------------------------------------------------
def _uniform(key, shape, bound, dtype=jnp.float32):
    return jax.random.uniform(key, shape, dtype, -bound, bound)


class LstmGcnNetPallas:
    def __init__(self, seq_num, input_dims, output_dims, hidden_dims_lstm,
                 hidden_dims_gcn, batch_size, layers_lstm, key,
                 fc_matmul_dtype=jnp.bfloat16):
        self.seq_num = seq_num
        self.input_dims = input_dims
        self.output_dims = output_dims
        self.H_lstm = hidden_dims_lstm
        self.hidden_dims_gcn = hidden_dims_gcn
        self.batch_size = batch_size
        self.layers = layers_lstm
        self.num_gcn_layers = hidden_dims_gcn[0]

        keys = jax.random.split(key, self.num_gcn_layers + layers_lstm + 3)
        kit = iter(keys)

        # SpatialGCN / Aggregator weights (use_bias=False as constructed).
        # PyTorch kaiming_uniform_ default: bound = sqrt(6 / fan_in) with
        # fan_in = tensor.size(1) (= out_dim for these (in, out) weights).
        gcn_params = []
        in_dim = input_dims
        for layer in range(self.num_gcn_layers):
            out_dim = hidden_dims_gcn[layer + 1]
            k1, k2 = jax.random.split(next(kit))
            bound = (6.0 / out_dim) ** 0.5
            w1 = _uniform(k1, (input_dims, out_dim), bound)   # NF @ W1
            w2 = _uniform(k2, (in_dim, out_dim), bound)       # LastHidden @ W2
            gcn_params.append((w1, w2))
            in_dim = out_dim

        # nn.LSTM weights, per-gate stacked (gate order i, f, g, o) so the
        # kernel never slices 32-lane sub-blocks out of a fused gate vector.
        H = hidden_dims_lstm
        bnd = 1.0 / H ** 0.5
        lstm_params = []
        lstm_in = hidden_dims_gcn[-1]
        for layer in range(layers_lstm):
            k_wih, k_whh, k_bih, k_bhh = jax.random.split(next(kit), 4)
            w_ih = _uniform(k_wih, (4, lstm_in, H), bnd)
            w_hh = _uniform(k_whh, (4, H, H), bnd)
            b = (_uniform(k_bih, (4, 1, H), bnd)
                 + _uniform(k_bhh, (4, 1, H), bnd))           # b_ih + b_hh
            lstm_params.append((w_ih, w_hh, b))
            lstm_in = H

        # Fully-connected head; fc1/fc2 weights stored bf16 (MXU-friendly,
        # halves the only meaningful weight bytes), biases + fc3 stay f32.
        def linear_init(k, fan_in, fan_out, w_dtype=jnp.float32):
            kw, kb = jax.random.split(k)
            bound = 1.0 / fan_in ** 0.5
            w = _uniform(kw, (fan_in, fan_out), bound).astype(w_dtype)
            b = _uniform(kb, (1, fan_out), bound)
            return w, b

        fc1_w, fc1_b = linear_init(next(kit), batch_size * H, 1024,
                                   fc_matmul_dtype)
        fc2_w, fc2_b = linear_init(next(kit), 1024, 256, fc_matmul_dtype)
        fc3_w, fc3_b = linear_init(next(kit), 256, output_dims)

        self.params = {
            "gcn": gcn_params,
            "lstm": lstm_params,
            "fc1_w": fc1_w, "fc1_b": fc1_b,
            "fc2_w": fc2_w, "fc2_b": fc2_b,
            "fc3_w": fc3_w, "fc3_b": fc3_b,
        }

        self._forward = jax.jit(functools.partial(
            _forward_impl, seq=seq_num, n_nodes=batch_size,
            hidden_lstm=hidden_dims_lstm, lstm_layers=layers_lstm,
            out_dims=output_dims))

    def __call__(self, nodes_features, adjacencies, state_key):
        # view()/fc1 in the PyTorch module force num_nodes == batch_size.
        assert nodes_features.shape[1] == self.batch_size
        return self._forward(self.params, nodes_features, adjacencies,
                             state_key)


if __name__ == "__main__":
    seq_num = 8
    batch_size = 4            # == number of graph nodes (required by view/fc1)
    input_dims = 16
    hidden_dims_gcn = [2, 32, 32]   # [num_layers, h1, h2]
    hidden_dims_lstm = 32
    output_dims = 8
    layers_lstm = 1

    key = jax.random.PRNGKey(0)
    k_nf, k_adj, k_par, k_state = jax.random.split(key, 4)

    nodes_features = jax.random.normal(
        k_nf, (seq_num, batch_size, input_dims), jnp.float32)
    adjacencies = jax.random.uniform(
        k_adj, (seq_num, batch_size, batch_size), jnp.float32)

    model = LstmGcnNetPallas(seq_num, input_dims, output_dims,
                             hidden_dims_lstm, hidden_dims_gcn,
                             batch_size, layers_lstm, k_par)

    out = model(nodes_features, adjacencies, k_state)
    out = jax.block_until_ready(out)

    ref = _reference_forward(model.params, nodes_features, adjacencies,
                             k_state, seq_num, batch_size, hidden_dims_lstm,
                             layers_lstm)

    assert out.shape == (seq_num, output_dims), out.shape
    assert bool(jnp.all(jnp.isfinite(out)))
    assert bool(jnp.allclose(out, ref, rtol=5e-2, atol=5e-2)), \
        float(jnp.max(jnp.abs(out - ref)))
    print("KERNEL_OK")
</pallas_src>

<mosaic_0001>
module attributes {stable_mosaic.version = 11 : i64} {
  func.func @_fused_forward_kernel(%arg0: memref<32x16xf32, #tpu.memory_space<vmem>>, %arg1: memref<32x4xf32, #tpu.memory_space<vmem>>, %arg2: memref<16x32xf32, #tpu.memory_space<vmem>>, %arg3: memref<16x32xf32, #tpu.memory_space<vmem>>, %arg4: memref<16x32xf32, #tpu.memory_space<vmem>>, %arg5: memref<32x32xf32, #tpu.memory_space<vmem>>, %arg6: memref<4x32x32xf32, #tpu.memory_space<vmem>>, %arg7: memref<4x32x32xf32, #tpu.memory_space<vmem>>, %arg8: memref<4x1x32xf32, #tpu.memory_space<vmem>>, %arg9: memref<1x4x32xf32, #tpu.memory_space<vmem>>, %arg10: memref<1x4x32xf32, #tpu.memory_space<vmem>>, %arg11: memref<128x1024xbf16, #tpu.memory_space<vmem>>, %arg12: memref<1x1024xf32, #tpu.memory_space<vmem>>, %arg13: memref<1024x256xbf16, #tpu.memory_space<vmem>>, %arg14: memref<1x256xf32, #tpu.memory_space<vmem>>, %arg15: memref<256x8xf32, #tpu.memory_space<vmem>>, %arg16: memref<1x8xf32, #tpu.memory_space<vmem>>, %arg17: memref<8x8xf32, #tpu.memory_space<vmem>>) attributes {dimension_semantics = [], scalar_prefetch = 0 : i64, scratch_operands = 0 : i64, tpu.core_type = #tpu.core_type<tc>} {
    %c0 = arith.constant 0 : index
    %c0_0 = arith.constant 0 : index
    %0 = vector.load %arg0[%c0, %c0_0] : memref<32x16xf32, #tpu.memory_space<vmem>>, vector<32x16xf32>
    %c0_1 = arith.constant 0 : index
    %c0_2 = arith.constant 0 : index
    %1 = vector.load %arg1[%c0_1, %c0_2] : memref<32x4xf32, #tpu.memory_space<vmem>>, vector<32x4xf32>
    %2 = vector.extract_strided_slice %1 {offsets = [0, 0], sizes = [4, 4], strides = [1, 1]} : vector<32x4xf32> to vector<4x4xf32>
    %3 = vector.extract_strided_slice %1 {offsets = [4, 0], sizes = [4, 4], strides = [1, 1]} : vector<32x4xf32> to vector<4x4xf32>
    %4 = vector.extract_strided_slice %1 {offsets = [8, 0], sizes = [4, 4], strides = [1, 1]} : vector<32x4xf32> to vector<4x4xf32>
    %5 = vector.extract_strided_slice %1 {offsets = [12, 0], sizes = [4, 4], strides = [1, 1]} : vector<32x4xf32> to vector<4x4xf32>
    %6 = vector.extract_strided_slice %1 {offsets = [16, 0], sizes = [4, 4], strides = [1, 1]} : vector<32x4xf32> to vector<4x4xf32>
    %7 = vector.extract_strided_slice %1 {offsets = [20, 0], sizes = [4, 4], strides = [1, 1]} : vector<32x4xf32> to vector<4x4xf32>
    %8 = vector.extract_strided_slice %1 {offsets = [24, 0], sizes = [4, 4], strides = [1, 1]} : vector<32x4xf32> to vector<4x4xf32>
    %9 = vector.extract_strided_slice %1 {offsets = [28, 0], sizes = [4, 4], strides = [1, 1]} : vector<32x4xf32> to vector<4x4xf32>
    %c0_3 = arith.constant 0 : index
    %c0_4 = arith.constant 0 : index
    %10 = vector.load %arg2[%c0_3, %c0_4] : memref<16x32xf32, #tpu.memory_space<vmem>>, vector<16x32xf32>
    %cst = arith.constant dense<0.000000e+00> : vector<32x32xf32>
    %11 = tpu.matmul %0, %10, %cst {dimension_numbers = #tpu.dot_dimension_numbers<[1], [0], [0], [1], [0, 0, 1, 1], [], []>} : vector<32x16xf32>, vector<16x32xf32>, vector<32x32xf32> -> vector<32x32xf32>
    %c0_5 = arith.constant 0 : index
    %c0_6 = arith.constant 0 : index
    %12 = vector.load %arg3[%c0_5, %c0_6] : memref<16x32xf32, #tpu.memory_space<vmem>>, vector<16x32xf32>
    %cst_7 = arith.constant dense<0.000000e+00> : vector<32x32xf32>
    %13 = tpu.matmul %0, %12, %cst_7 {dimension_numbers = #tpu.dot_dimension_numbers<[1], [0], [0], [1], [0, 0, 1, 1], [], []>} : vector<32x16xf32>, vector<16x32xf32>, vector<32x32xf32> -> vector<32x32xf32>
    %14 = vector.extract_strided_slice %13 {offsets = [0, 0], sizes = [4, 32], strides = [1, 1]} : vector<32x32xf32> to vector<4x32xf32>
    %cst_8 = arith.constant dense<0.000000e+00> : vector<4x32xf32>
    %15 = tpu.matmul %2, %14, %cst_8 {dimension_numbers = #tpu.dot_dimension_numbers<[1], [0], [0], [1], [0, 0, 1, 1], [], []>} : vector<4x4xf32>, vector<4x32xf32>, vector<4x32xf32> -> vector<4x32xf32>
    %16 = vector.extract_strided_slice %13 {offsets = [4, 0], sizes = [4, 32], strides = [1, 1]} : vector<32x32xf32> to vector<4x32xf32>
    %cst_9 = arith.constant dense<0.000000e+00> : vector<4x32xf32>
    %17 = tpu.matmul %3, %16, %cst_9 {dimension_numbers = #tpu.dot_dimension_numbers<[1], [0], [0], [1], [0, 0, 1, 1], [], []>} : vector<4x4xf32>, vector<4x32xf32>, vector<4x32xf32> -> vector<4x32xf32>
    %18 = vector.extract_strided_slice %13 {offsets = [8, 0], sizes = [4, 32], strides = [1, 1]} : vector<32x32xf32> to vector<4x32xf32>
    %cst_10 = arith.constant dense<0.000000e+00> : vector<4x32xf32>
    %19 = tpu.matmul %4, %18, %cst_10 {dimension_numbers = #tpu.dot_dimension_numbers<[1], [0], [0], [1], [0, 0, 1, 1], [], []>} : vector<4x4xf32>, vector<4x32xf32>, vector<4x32xf32> -> vector<4x32xf32>
    %20 = vector.extract_strided_slice %13 {offsets = [12, 0], sizes = [4, 32], strides = [1, 1]} : vector<32x32xf32> to vector<4x32xf32>
    %cst_11 = arith.constant dense<0.000000e+00> : vector<4x32xf32>
    %21 = tpu.matmul %5, %20, %cst_11 {dimension_numbers = #tpu.dot_dimension_numbers<[1], [0], [0], [1], [0, 0, 1, 1], [], []>} : vector<4x4xf32>, vector<4x32xf32>, vector<4x32xf32> -> vector<4x32xf32>
    %22 = vector.extract_strided_slice %13 {offsets = [16, 0], sizes = [4, 32], strides = [1, 1]} : vector<32x32xf32> to vector<4x32xf32>
    %cst_12 = arith.constant dense<0.000000e+00> : vector<4x32xf32>
    %23 = tpu.matmul %6, %22, %cst_12 {dimension_numbers = #tpu.dot_dimension_numbers<[1], [0], [0], [1], [0, 0, 1, 1], [], []>} : vector<4x4xf32>, vector<4x32xf32>, vector<4x32xf32> -> vector<4x32xf32>
    %24 = vector.extract_strided_slice %13 {offsets = [20, 0], sizes = [4, 32], strides = [1, 1]} : vector<32x32xf32> to vector<4x32xf32>
    %cst_13 = arith.constant dense<0.000000e+00> : vector<4x32xf32>
    %25 = tpu.matmul %7, %24, %cst_13 {dimension_numbers = #tpu.dot_dimension_numbers<[1], [0], [0], [1], [0, 0, 1, 1], [], []>} : vector<4x4xf32>, vector<4x32xf32>, vector<4x32xf32> -> vector<4x32xf32>
    %26 = vector.extract_strided_slice %13 {offsets = [24, 0], sizes = [4, 32], strides = [1, 1]} : vector<32x32xf32> to vector<4x32xf32>
    %cst_14 = arith.constant dense<0.000000e+00> : vector<4x32xf32>
    %27 = tpu.matmul %8, %26, %cst_14 {dimension_numbers = #tpu.dot_dimension_numbers<[1], [0], [0], [1], [0, 0, 1, 1], [], []>} : vector<4x4xf32>, vector<4x32xf32>, vector<4x32xf32> -> vector<4x32xf32>
    %28 = vector.extract_strided_slice %13 {offsets = [28, 0], sizes = [4, 32], strides = [1, 1]} : vector<32x32xf32> to vector<4x32xf32>
    %cst_15 = arith.constant dense<0.000000e+00> : vector<4x32xf32>
    %29 = tpu.matmul %9, %28, %cst_15 {dimension_numbers = #tpu.dot_dimension_numbers<[1], [0], [0], [1], [0, 0, 1, 1], [], []>} : vector<4x4xf32>, vector<4x32xf32>, vector<4x32xf32> -> vector<4x32xf32>
    %30 = tpu.concatenate %15, %17, %19, %21, %23, %25, %27, %29 in 0 : vector<4x32xf32>, vector<4x32xf32>, vector<4x32xf32>, vector<4x32xf32>, vector<4x32xf32>, vector<4x32xf32>, vector<4x32xf32>, vector<4x32xf32> -> vector<32x32xf32>
    %31 = arith.addf %11, %30 : vector<32x32xf32>
    %cst_16 = arith.constant 0.000000e+00 : f32
    %32 = vector.broadcast %cst_16 : f32 to vector<32x32xf32>
    %33 = arith.maximumf %31, %32 : vector<32x32xf32>
    %c0_17 = arith.constant 0 : index
    %c0_18 = arith.constant 0 : index
    %34 = vector.load %arg4[%c0_17, %c0_18] : memref<16x32xf32, #tpu.memory_space<vmem>>, vector<16x32xf32>
    %cst_19 = arith.constant dense<0.000000e+00> : vector<32x32xf32>
    %35 = tpu.matmul %0, %34, %cst_19 {dimension_numbers = #tpu.dot_dimension_numbers<[1], [0], [0], [1], [0, 0, 1, 1], [], []>} : vector<32x16xf32>, vector<16x32xf32>, vector<32x32xf32> -> vector<32x32xf32>
    %c0_20 = arith.constant 0 : index
    %c0_21 = arith.constant 0 : index
    %36 = vector.load %arg5[%c0_20, %c0_21] : memref<32x32xf32, #tpu.memory_space<vmem>>, vector<32x32xf32>
    %cst_22 = arith.constant dense<0.000000e+00> : vector<32x32xf32>
    %37 = tpu.matmul %33, %36, %cst_22 {dimension_numbers = #tpu.dot_dimension_numbers<[1], [0], [0], [1], [0, 0, 1, 1], [], []>} : vector<32x32xf32>, vector<32x32xf32>, vector<32x32xf32> -> vector<32x32xf32>
    %38 = vector.extract_strided_slice %37 {offsets = [0, 0], sizes = [4, 32], strides = [1, 1]} : vector<32x32xf32> to vector<4x32xf32>
    %cst_23 = arith.constant dense<0.000000e+00> : vector<4x32xf32>
    %39 = tpu.matmul %2, %38, %cst_23 {dimension_numbers = #tpu.dot_dimension_numbers<[1], [0], [0], [1], [0, 0, 1, 1], [], []>} : vector<4x4xf32>, vector<4x32xf32>, vector<4x32xf32> -> vector<4x32xf32>
    %40 = vector.extract_strided_slice %37 {offsets = [4, 0], sizes = [4, 32], strides = [1, 1]} : vector<32x32xf32> to vector<4x32xf32>
    %cst_24 = arith.constant dense<0.000000e+00> : vector<4x32xf32>
    %41 = tpu.matmul %3, %40, %cst_24 {dimension_numbers = #tpu.dot_dimension_numbers<[1], [0], [0], [1], [0, 0, 1, 1], [], []>} : vector<4x4xf32>, vector<4x32xf32>, vector<4x32xf32> -> vector<4x32xf32>
    %42 = vector.extract_strided_slice %37 {offsets = [8, 0], sizes = [4, 32], strides = [1, 1]} : vector<32x32xf32> to vector<4x32xf32>
    %cst_25 = arith.constant dense<0.000000e+00> : vector<4x32xf32>
    %43 = tpu.matmul %4, %42, %cst_25 {dimension_numbers = #tpu.dot_dimension_numbers<[1], [0], [0], [1], [0, 0, 1, 1], [], []>} : vector<4x4xf32>, vector<4x32xf32>, vector<4x32xf32> -> vector<4x32xf32>
    %44 = vector.extract_strided_slice %37 {offsets = [12, 0], sizes = [4, 32], strides = [1, 1]} : vector<32x32xf32> to vector<4x32xf32>
    %cst_26 = arith.constant dense<0.000000e+00> : vector<4x32xf32>
    %45 = tpu.matmul %5, %44, %cst_26 {dimension_numbers = #tpu.dot_dimension_numbers<[1], [0], [0], [1], [0, 0, 1, 1], [], []>} : vector<4x4xf32>, vector<4x32xf32>, vector<4x32xf32> -> vector<4x32xf32>
    %46 = vector.extract_strided_slice %37 {offsets = [16, 0], sizes = [4, 32], strides = [1, 1]} : vector<32x32xf32> to vector<4x32xf32>
    %cst_27 = arith.constant dense<0.000000e+00> : vector<4x32xf32>
    %47 = tpu.matmul %6, %46, %cst_27 {dimension_numbers = #tpu.dot_dimension_numbers<[1], [0], [0], [1], [0, 0, 1, 1], [], []>} : vector<4x4xf32>, vector<4x32xf32>, vector<4x32xf32> -> vector<4x32xf32>
    %48 = vector.extract_strided_slice %37 {offsets = [20, 0], sizes = [4, 32], strides = [1, 1]} : vector<32x32xf32> to vector<4x32xf32>
    %cst_28 = arith.constant dense<0.000000e+00> : vector<4x32xf32>
    %49 = tpu.matmul %7, %48, %cst_28 {dimension_numbers = #tpu.dot_dimension_numbers<[1], [0], [0], [1], [0, 0, 1, 1], [], []>} : vector<4x4xf32>, vector<4x32xf32>, vector<4x32xf32> -> vector<4x32xf32>
    %50 = vector.extract_strided_slice %37 {offsets = [24, 0], sizes = [4, 32], strides = [1, 1]} : vector<32x32xf32> to vector<4x32xf32>
    %cst_29 = arith.constant dense<0.000000e+00> : vector<4x32xf32>
    %51 = tpu.matmul %8, %50, %cst_29 {dimension_numbers = #tpu.dot_dimension_numbers<[1], [0], [0], [1], [0, 0, 1, 1], [], []>} : vector<4x4xf32>, vector<4x32xf32>, vector<4x32xf32> -> vector<4x32xf32>
    %52 = vector.extract_strided_slice %37 {offsets = [28, 0], sizes = [4, 32], strides = [1, 1]} : vector<32x32xf32> to vector<4x32xf32>
    %cst_30 = arith.constant dense<0.000000e+00> : vector<4x32xf32>
    %53 = tpu.matmul %9, %52, %cst_30 {dimension_numbers = #tpu.dot_dimension_numbers<[1], [0], [0], [1], [0, 0, 1, 1], [], []>} : vector<4x4xf32>, vector<4x32xf32>, vector<4x32xf32> -> vector<4x32xf32>
    %54 = tpu.concatenate %39, %41, %43, %45, %47, %49, %51, %53 in 0 : vector<4x32xf32>, vector<4x32xf32>, vector<4x32xf32>, vector<4x32xf32>, vector<4x32xf32>, vector<4x32xf32>, vector<4x32xf32>, vector<4x32xf32> -> vector<32x32xf32>
    %55 = arith.addf %35, %54 : vector<32x32xf32>
    %c0_31 = arith.constant 0 : index
    %c0_32 = arith.constant 0 : index
    %c0_33 = arith.constant 0 : index
    %56 = vector.load %arg6[%c0_31, %c0_32, %c0_33] : memref<4x32x32xf32, #tpu.memory_space<vmem>>, vector<1x32x32xf32>
    %57 = vector.shape_cast %56 : vector<1x32x32xf32> to vector<32x32xf32>
    %cst_34 = arith.constant dense<0.000000e+00> : vector<32x32xf32>
    %58 = tpu.matmul %55, %57, %cst_34 {dimension_numbers = #tpu.dot_dimension_numbers<[1], [0], [0], [1], [0, 0, 1, 1], [], []>} : vector<32x32xf32>, vector<32x32xf32>, vector<32x32xf32> -> vector<32x32xf32>
    %c0_35 = arith.constant 0 : index
    %c0_36 = arith.constant 0 : index
    %c0_37 = arith.constant 0 : index
    %59 = vector.load %arg8[%c0_35, %c0_36, %c0_37] : memref<4x1x32xf32, #tpu.memory_space<vmem>>, vector<1x1x32xf32>
    %60 = vector.shape_cast %59 : vector<1x1x32xf32> to vector<1x32xf32>
    %61 = vector.broadcast %60 : vector<1x32xf32> to vector<32x32xf32>
    %62 = arith.addf %58, %61 : vector<32x32xf32>
    %c1 = arith.constant 1 : index
    %c0_38 = arith.constant 0 : index
    %c0_39 = arith.constant 0 : index
    %63 = vector.load %arg6[%c1, %c0_38, %c0_39] : memref<4x32x32xf32, #tpu.memory_space<vmem>>, vector<1x32x32xf32>
    %64 = vector.shape_cast %63 : vector<1x32x32xf32> to vector<32x32xf32>
    %cst_40 = arith.constant dense<0.000000e+00> : vector<32x32xf32>
    %65 = tpu.matmul %55, %64, %cst_40 {dimension_numbers = #tpu.dot_dimension_numbers<[1], [0], [0], [1], [0, 0, 1, 1], [], []>} : vector<32x32xf32>, vector<32x32xf32>, vector<32x32xf32> -> vector<32x32xf32>
    %c1_41 = arith.constant 1 : index
    %c0_42 = arith.constant 0 : index
    %c0_43 = arith.constant 0 : index
    %66 = vector.load %arg8[%c1_41, %c0_42, %c0_43] : memref<4x1x32xf32, #tpu.memory_space<vmem>>, vector<1x1x32xf32>
    %67 = vector.shape_cast %66 : vector<1x1x32xf32> to vector<1x32xf32>
    %68 = vector.broadcast %67 : vector<1x32xf32> to vector<32x32xf32>
    %69 = arith.addf %65, %68 : vector<32x32xf32>
    %c2 = arith.constant 2 : index
    %c0_44 = arith.constant 0 : index
    %c0_45 = arith.constant 0 : index
    %70 = vector.load %arg6[%c2, %c0_44, %c0_45] : memref<4x32x32xf32, #tpu.memory_space<vmem>>, vector<1x32x32xf32>
    %71 = vector.shape_cast %70 : vector<1x32x32xf32> to vector<32x32xf32>
    %cst_46 = arith.constant dense<0.000000e+00> : vector<32x32xf32>
    %72 = tpu.matmul %55, %71, %cst_46 {dimension_numbers = #tpu.dot_dimension_numbers<[1], [0], [0], [1], [0, 0, 1, 1], [], []>} : vector<32x32xf32>, vector<32x32xf32>, vector<32x32xf32> -> vector<32x32xf32>
    %c2_47 = arith.constant 2 : index
    %c0_48 = arith.constant 0 : index
    %c0_49 = arith.constant 0 : index
    %73 = vector.load %arg8[%c2_47, %c0_48, %c0_49] : memref<4x1x32xf32, #tpu.memory_space<vmem>>, vector<1x1x32xf32>
    %74 = vector.shape_cast %73 : vector<1x1x32xf32> to vector<1x32xf32>
    %75 = vector.broadcast %74 : vector<1x32xf32> to vector<32x32xf32>
    %76 = arith.addf %72, %75 : vector<32x32xf32>
    %c3 = arith.constant 3 : index
    %c0_50 = arith.constant 0 : index
    %c0_51 = arith.constant 0 : index
    %77 = vector.load %arg6[%c3, %c0_50, %c0_51] : memref<4x32x32xf32, #tpu.memory_space<vmem>>, vector<1x32x32xf32>
    %78 = vector.shape_cast %77 : vector<1x32x32xf32> to vector<32x32xf32>
    %cst_52 = arith.constant dense<0.000000e+00> : vector<32x32xf32>
    %79 = tpu.matmul %55, %78, %cst_52 {dimension_numbers = #tpu.dot_dimension_numbers<[1], [0], [0], [1], [0, 0, 1, 1], [], []>} : vector<32x32xf32>, vector<32x32xf32>, vector<32x32xf32> -> vector<32x32xf32>
    %c3_53 = arith.constant 3 : index
    %c0_54 = arith.constant 0 : index
    %c0_55 = arith.constant 0 : index
    %80 = vector.load %arg8[%c3_53, %c0_54, %c0_55] : memref<4x1x32xf32, #tpu.memory_space<vmem>>, vector<1x1x32xf32>
    %81 = vector.shape_cast %80 : vector<1x1x32xf32> to vector<1x32xf32>
    %82 = vector.broadcast %81 : vector<1x32xf32> to vector<32x32xf32>
    %83 = arith.addf %79, %82 : vector<32x32xf32>
    %c0_56 = arith.constant 0 : index
    %c0_57 = arith.constant 0 : index
    %c0_58 = arith.constant 0 : index
    %84 = vector.load %arg7[%c0_56, %c0_57, %c0_58] : memref<4x32x32xf32, #tpu.memory_space<vmem>>, vector<1x32x32xf32>
    %85 = vector.shape_cast %84 : vector<1x32x32xf32> to vector<32x32xf32>
    %c1_59 = arith.constant 1 : index
    %c0_60 = arith.constant 0 : index
    %c0_61 = arith.constant 0 : index
    %86 = vector.load %arg7[%c1_59, %c0_60, %c0_61] : memref<4x32x32xf32, #tpu.memory_space<vmem>>, vector<1x32x32xf32>
    %87 = vector.shape_cast %86 : vector<1x32x32xf32> to vector<32x32xf32>
    %c2_62 = arith.constant 2 : index
    %c0_63 = arith.constant 0 : index
    %c0_64 = arith.constant 0 : index
    %88 = vector.load %arg7[%c2_62, %c0_63, %c0_64] : memref<4x32x32xf32, #tpu.memory_space<vmem>>, vector<1x32x32xf32>
    %89 = vector.shape_cast %88 : vector<1x32x32xf32> to vector<32x32xf32>
    %c3_65 = arith.constant 3 : index
    %c0_66 = arith.constant 0 : index
    %c0_67 = arith.constant 0 : index
    %90 = vector.load %arg7[%c3_65, %c0_66, %c0_67] : memref<4x32x32xf32, #tpu.memory_space<vmem>>, vector<1x32x32xf32>
    %91 = vector.shape_cast %90 : vector<1x32x32xf32> to vector<32x32xf32>
    %c0_68 = arith.constant 0 : index
    %c0_69 = arith.constant 0 : index
    %c0_70 = arith.constant 0 : index
    %92 = vector.load %arg9[%c0_68, %c0_69, %c0_70] : memref<1x4x32xf32, #tpu.memory_space<vmem>>, vector<1x4x32xf32>
    %93 = vector.shape_cast %92 : vector<1x4x32xf32> to vector<4x32xf32>
    %c0_71 = arith.constant 0 : index
    %c0_72 = arith.constant 0 : index
    %c0_73 = arith.constant 0 : index
    %94 = vector.load %arg10[%c0_71, %c0_72, %c0_73] : memref<1x4x32xf32, #tpu.memory_space<vmem>>, vector<1x4x32xf32>
    %95 = vector.shape_cast %94 : vector<1x4x32xf32> to vector<4x32xf32>
    %cst_74 = arith.constant dense<0.000000e+00> : vector<4x32xf32>
    %96 = tpu.matmul %93, %85, %cst_74 {dimension_numbers = #tpu.dot_dimension_numbers<[1], [0], [0], [1], [0, 0, 1, 1], [], []>} : vector<4x32xf32>, vector<32x32xf32>, vector<4x32xf32> -> vector<4x32xf32>
    %cst_75 = arith.constant dense<0.000000e+00> : vector<4x32xf32>
    %97 = tpu.matmul %93, %87, %cst_75 {dimension_numbers = #tpu.dot_dimension_numbers<[1], [0], [0], [1], [0, 0, 1, 1], [], []>} : vector<4x32xf32>, vector<32x32xf32>, vector<4x32xf32> -> vector<4x32xf32>
    %cst_76 = arith.constant dense<0.000000e+00> : vector<4x32xf32>
    %98 = tpu.matmul %93, %89, %cst_76 {dimension_numbers = #tpu.dot_dimension_numbers<[1], [0], [0], [1], [0, 0, 1, 1], [], []>} : vector<4x32xf32>, vector<32x32xf32>, vector<4x32xf32> -> vector<4x32xf32>
    %cst_77 = arith.constant dense<0.000000e+00> : vector<4x32xf32>
    %99 = tpu.matmul %93, %91, %cst_77 {dimension_numbers = #tpu.dot_dimension_numbers<[1], [0], [0], [1], [0, 0, 1, 1], [], []>} : vector<4x32xf32>, vector<32x32xf32>, vector<4x32xf32> -> vector<4x32xf32>
    %100 = vector.extract_strided_slice %62 {offsets = [0, 0], sizes = [4, 32], strides = [1, 1]} : vector<32x32xf32> to vector<4x32xf32>
    %101 = arith.addf %100, %96 : vector<4x32xf32>
    %102 = arith.negf %101 : vector<4x32xf32>
    %103 = math.exp %102 : vector<4x32xf32>
    %cst_78 = arith.constant 1.000000e+00 : f32
    %104 = vector.broadcast %cst_78 : f32 to vector<4x32xf32>
    %105 = arith.addf %104, %103 : vector<4x32xf32>
    %106 = arith.divf %104, %105 : vector<4x32xf32>
    %107 = vector.extract_strided_slice %69 {offsets = [0, 0], sizes = [4, 32], strides = [1, 1]} : vector<32x32xf32> to vector<4x32xf32>
    %108 = arith.addf %107, %97 : vector<4x32xf32>
    %109 = arith.negf %108 : vector<4x32xf32>
    %110 = math.exp %109 : vector<4x32xf32>
    %cst_79 = arith.constant 1.000000e+00 : f32
    %111 = vector.broadcast %cst_79 : f32 to vector<4x32xf32>
    %112 = arith.addf %111, %110 : vector<4x32xf32>
    %113 = arith.divf %111, %112 : vector<4x32xf32>
    %114 = vector.extract_strided_slice %76 {offsets = [0, 0], sizes = [4, 32], strides = [1, 1]} : vector<32x32xf32> to vector<4x32xf32>
    %115 = arith.addf %114, %98 : vector<4x32xf32>
    %116 = math.tanh %115 : vector<4x32xf32>
    %117 = vector.extract_strided_slice %83 {offsets = [0, 0], sizes = [4, 32], strides = [1, 1]} : vector<32x32xf32> to vector<4x32xf32>
    %118 = arith.addf %117, %99 : vector<4x32xf32>
    %119 = arith.negf %118 : vector<4x32xf32>
    %120 = math.exp %119 : vector<4x32xf32>
    %cst_80 = arith.constant 1.000000e+00 : f32
    %121 = vector.broadcast %cst_80 : f32 to vector<4x32xf32>
    %122 = arith.addf %121, %120 : vector<4x32xf32>
    %123 = arith.divf %121, %122 : vector<4x32xf32>
    %124 = arith.mulf %113, %95 : vector<4x32xf32>
    %125 = arith.mulf %106, %116 : vector<4x32xf32>
    %126 = arith.addf %124, %125 : vector<4x32xf32>
    %127 = math.tanh %126 : vector<4x32xf32>
    %128 = arith.mulf %123, %127 : vector<4x32xf32>
    %cst_81 = arith.constant dense<0.000000e+00> : vector<4x32xf32>
    %129 = tpu.matmul %128, %85, %cst_81 {dimension_numbers = #tpu.dot_dimension_numbers<[1], [0], [0], [1], [0, 0, 1, 1], [], []>} : vector<4x32xf32>, vector<32x32xf32>, vector<4x32xf32> -> vector<4x32xf32>
    %cst_82 = arith.constant dense<0.000000e+00> : vector<4x32xf32>
    %130 = tpu.matmul %128, %87, %cst_82 {dimension_numbers = #tpu.dot_dimension_numbers<[1], [0], [0], [1], [0, 0, 1, 1], [], []>} : vector<4x32xf32>, vector<32x32xf32>, vector<4x32xf32> -> vector<4x32xf32>
    %cst_83 = arith.constant dense<0.000000e+00> : vector<4x32xf32>
    %131 = tpu.matmul %128, %89, %cst_83 {dimension_numbers = #tpu.dot_dimension_numbers<[1], [0], [0], [1], [0, 0, 1, 1], [], []>} : vector<4x32xf32>, vector<32x32xf32>, vector<4x32xf32> -> vector<4x32xf32>
    %cst_84 = arith.constant dense<0.000000e+00> : vector<4x32xf32>
    %132 = tpu.matmul %128, %91, %cst_84 {dimension_numbers = #tpu.dot_dimension_numbers<[1], [0], [0], [1], [0, 0, 1, 1], [], []>} : vector<4x32xf32>, vector<32x32xf32>, vector<4x32xf32> -> vector<4x32xf32>
    %133 = vector.extract_strided_slice %62 {offsets = [4, 0], sizes = [4, 32], strides = [1, 1]} : vector<32x32xf32> to vector<4x32xf32>
    %134 = arith.addf %133, %129 : vector<4x32xf32>
    %135 = arith.negf %134 : vector<4x32xf32>
    %136 = math.exp %135 : vector<4x32xf32>
    %cst_85 = arith.constant 1.000000e+00 : f32
    %137 = vector.broadcast %cst_85 : f32 to vector<4x32xf32>
    %138 = arith.addf %137, %136 : vector<4x32xf32>
    %139 = arith.divf %137, %138 : vector<4x32xf32>
    %140 = vector.extract_strided_slice %69 {offsets = [4, 0], sizes = [4, 32], strides = [1, 1]} : vector<32x32xf32> to vector<4x32xf32>
    %141 = arith.addf %140, %130 : vector<4x32xf32>
    %142 = arith.negf %141 : vector<4x32xf32>
    %143 = math.exp %142 : vector<4x32xf32>
    %cst_86 = arith.constant 1.000000e+00 : f32
    %144 = vector.broadcast %cst_86 : f32 to vector<4x32xf32>
    %145 = arith.addf %144, %143 : vector<4x32xf32>
    %146 = arith.divf %144, %145 : vector<4x32xf32>
    %147 = vector.extract_strided_slice %76 {offsets = [4, 0], sizes = [4, 32], strides = [1, 1]} : vector<32x32xf32> to vector<4x32xf32>
    %148 = arith.addf %147, %131 : vector<4x32xf32>
    %149 = math.tanh %148 : vector<4x32xf32>
    %150 = vector.extract_strided_slice %83 {offsets = [4, 0], sizes = [4, 32], strides = [1, 1]} : vector<32x32xf32> to vector<4x32xf32>
    %151 = arith.addf %150, %132 : vector<4x32xf32>
    %152 = arith.negf %151 : vector<4x32xf32>
    %153 = math.exp %152 : vector<4x32xf32>
    %cst_87 = arith.constant 1.000000e+00 : f32
    %154 = vector.broadcast %cst_87 : f32 to vector<4x32xf32>
    %155 = arith.addf %154, %153 : vector<4x32xf32>
    %156 = arith.divf %154, %155 : vector<4x32xf32>
    %157 = arith.mulf %146, %126 : vector<4x32xf32>
    %158 = arith.mulf %139, %149 : vector<4x32xf32>
    %159 = arith.addf %157, %158 : vector<4x32xf32>
    %160 = math.tanh %159 : vector<4x32xf32>
    %161 = arith.mulf %156, %160 : vector<4x32xf32>
    %cst_88 = arith.constant dense<0.000000e+00> : vector<4x32xf32>
    %162 = tpu.matmul %161, %85, %cst_88 {dimension_numbers = #tpu.dot_dimension_numbers<[1], [0], [0], [1], [0, 0, 1, 1], [], []>} : vector<4x32xf32>, vector<32x32xf32>, vector<4x32xf32> -> vector<4x32xf32>
    %cst_89 = arith.constant dense<0.000000e+00> : vector<4x32xf32>
    %163 = tpu.matmul %161, %87, %cst_89 {dimension_numbers = #tpu.dot_dimension_numbers<[1], [0], [0], [1], [0, 0, 1, 1], [], []>} : vector<4x32xf32>, vector<32x32xf32>, vector<4x32xf32> -> vector<4x32xf32>
    %cst_90 = arith.constant dense<0.000000e+00> : vector<4x32xf32>
    %164 = tpu.matmul %161, %89, %cst_90 {dimension_numbers = #tpu.dot_dimension_numbers<[1], [0], [0], [1], [0, 0, 1, 1], [], []>} : vector<4x32xf32>, vector<32x32xf32>, vector<4x32xf32> -> vector<4x32xf32>
    %cst_91 = arith.constant dense<0.000000e+00> : vector<4x32xf32>
    %165 = tpu.matmul %161, %91, %cst_91 {dimension_numbers = #tpu.dot_dimension_numbers<[1], [0], [0], [1], [0, 0, 1, 1], [], []>} : vector<4x32xf32>, vector<32x32xf32>, vector<4x32xf32> -> vector<4x32xf32>
    %166 = vector.extract_strided_slice %62 {offsets = [8, 0], sizes = [4, 32], strides = [1, 1]} : vector<32x32xf32> to vector<4x32xf32>
    %167 = arith.addf %166, %162 : vector<4x32xf32>
    %168 = arith.negf %167 : vector<4x32xf32>
    %169 = math.exp %168 : vector<4x32xf32>
    %cst_92 = arith.constant 1.000000e+00 : f32
    %170 = vector.broadcast %cst_92 : f32 to vector<4x32xf32>
    %171 = arith.addf %170, %169 : vector<4x32xf32>
    %172 = arith.divf %170, %171 : vector<4x32xf32>
    %173 = vector.extract_strided_slice %69 {offsets = [8, 0], sizes = [4, 32], strides = [1, 1]} : vector<32x32xf32> to vector<4x32xf32>
    %174 = arith.addf %173, %163 : vector<4x32xf32>
    %175 = arith.negf %174 : vector<4x32xf32>
    %176 = math.exp %175 : vector<4x32xf32>
    %cst_93 = arith.constant 1.000000e+00 : f32
    %177 = vector.broadcast %cst_93 : f32 to vector<4x32xf32>
    %178 = arith.addf %177, %176 : vector<4x32xf32>
    %179 = arith.divf %177, %178 : vector<4x32xf32>
    %180 = vector.extract_strided_slice %76 {offsets = [8, 0], sizes = [4, 32], strides = [1, 1]} : vector<32x32xf32> to vector<4x32xf32>
    %181 = arith.addf %180, %164 : vector<4x32xf32>
    %182 = math.tanh %181 : vector<4x32xf32>
    %183 = vector.extract_strided_slice %83 {offsets = [8, 0], sizes = [4, 32], strides = [1, 1]} : vector<32x32xf32> to vector<4x32xf32>
    %184 = arith.addf %183, %165 : vector<4x32xf32>
    %185 = arith.negf %184 : vector<4x32xf32>
    %186 = math.exp %185 : vector<4x32xf32>
    %cst_94 = arith.constant 1.000000e+00 : f32
    %187 = vector.broadcast %cst_94 : f32 to vector<4x32xf32>
    %188 = arith.addf %187, %186 : vector<4x32xf32>
    %189 = arith.divf %187, %188 : vector<4x32xf32>
    %190 = arith.mulf %179, %159 : vector<4x32xf32>
    %191 = arith.mulf %172, %182 : vector<4x32xf32>
    %192 = arith.addf %190, %191 : vector<4x32xf32>
    %193 = math.tanh %192 : vector<4x32xf32>
    %194 = arith.mulf %189, %193 : vector<4x32xf32>
    %cst_95 = arith.constant dense<0.000000e+00> : vector<4x32xf32>
    %195 = tpu.matmul %194, %85, %cst_95 {dimension_numbers = #tpu.dot_dimension_numbers<[1], [0], [0], [1], [0, 0, 1, 1], [], []>} : vector<4x32xf32>, vector<32x32xf32>, vector<4x32xf32> -> vector<4x32xf32>
    %cst_96 = arith.constant dense<0.000000e+00> : vector<4x32xf32>
    %196 = tpu.matmul %194, %87, %cst_96 {dimension_numbers = #tpu.dot_dimension_numbers<[1], [0], [0], [1], [0, 0, 1, 1], [], []>} : vector<4x32xf32>, vector<32x32xf32>, vector<4x32xf32> -> vector<4x32xf32>
    %cst_97 = arith.constant dense<0.000000e+00> : vector<4x32xf32>
    %197 = tpu.matmul %194, %89, %cst_97 {dimension_numbers = #tpu.dot_dimension_numbers<[1], [0], [0], [1], [0, 0, 1, 1], [], []>} : vector<4x32xf32>, vector<32x32xf32>, vector<4x32xf32> -> vector<4x32xf32>
    %cst_98 = arith.constant dense<0.000000e+00> : vector<4x32xf32>
    %198 = tpu.matmul %194, %91, %cst_98 {dimension_numbers = #tpu.dot_dimension_numbers<[1], [0], [0], [1], [0, 0, 1, 1], [], []>} : vector<4x32xf32>, vector<32x32xf32>, vector<4x32xf32> -> vector<4x32xf32>
    %199 = vector.extract_strided_slice %62 {offsets = [12, 0], sizes = [4, 32], strides = [1, 1]} : vector<32x32xf32> to vector<4x32xf32>
    %200 = arith.addf %199, %195 : vector<4x32xf32>
    %201 = arith.negf %200 : vector<4x32xf32>
    %202 = math.exp %201 : vector<4x32xf32>
    %cst_99 = arith.constant 1.000000e+00 : f32
    %203 = vector.broadcast %cst_99 : f32 to vector<4x32xf32>
    %204 = arith.addf %203, %202 : vector<4x32xf32>
    %205 = arith.divf %203, %204 : vector<4x32xf32>
    %206 = vector.extract_strided_slice %69 {offsets = [12, 0], sizes = [4, 32], strides = [1, 1]} : vector<32x32xf32> to vector<4x32xf32>
    %207 = arith.addf %206, %196 : vector<4x32xf32>
    %208 = arith.negf %207 : vector<4x32xf32>
    %209 = math.exp %208 : vector<4x32xf32>
    %cst_100 = arith.constant 1.000000e+00 : f32
    %210 = vector.broadcast %cst_100 : f32 to vector<4x32xf32>
    %211 = arith.addf %210, %209 : vector<4x32xf32>
    %212 = arith.divf %210, %211 : vector<4x32xf32>
    %213 = vector.extract_strided_slice %76 {offsets = [12, 0], sizes = [4, 32], strides = [1, 1]} : vector<32x32xf32> to vector<4x32xf32>
    %214 = arith.addf %213, %197 : vector<4x32xf32>
    %215 = math.tanh %214 : vector<4x32xf32>
    %216 = vector.extract_strided_slice %83 {offsets = [12, 0], sizes = [4, 32], strides = [1, 1]} : vector<32x32xf32> to vector<4x32xf32>
    %217 = arith.addf %216, %198 : vector<4x32xf32>
    %218 = arith.negf %217 : vector<4x32xf32>
    %219 = math.exp %218 : vector<4x32xf32>
    %cst_101 = arith.constant 1.000000e+00 : f32
    %220 = vector.broadcast %cst_101 : f32 to vector<4x32xf32>
    %221 = arith.addf %220, %219 : vector<4x32xf32>
    %222 = arith.divf %220, %221 : vector<4x32xf32>
    %223 = arith.mulf %212, %192 : vector<4x32xf32>
    %224 = arith.mulf %205, %215 : vector<4x32xf32>
    %225 = arith.addf %223, %224 : vector<4x32xf32>
    %226 = math.tanh %225 : vector<4x32xf32>
    %227 = arith.mulf %222, %226 : vector<4x32xf32>
    %cst_102 = arith.constant dense<0.000000e+00> : vector<4x32xf32>
    %228 = tpu.matmul %227, %85, %cst_102 {dimension_numbers = #tpu.dot_dimension_numbers<[1], [0], [0], [1], [0, 0, 1, 1], [], []>} : vector<4x32xf32>, vector<32x32xf32>, vector<4x32xf32> -> vector<4x32xf32>
    %cst_103 = arith.constant dense<0.000000e+00> : vector<4x32xf32>
    %229 = tpu.matmul %227, %87, %cst_103 {dimension_numbers = #tpu.dot_dimension_numbers<[1], [0], [0], [1], [0, 0, 1, 1], [], []>} : vector<4x32xf32>, vector<32x32xf32>, vector<4x32xf32> -> vector<4x32xf32>
    %cst_104 = arith.constant dense<0.000000e+00> : vector<4x32xf32>
    %230 = tpu.matmul %227, %89, %cst_104 {dimension_numbers = #tpu.dot_dimension_numbers<[1], [0], [0], [1], [0, 0, 1, 1], [], []>} : vector<4x32xf32>, vector<32x32xf32>, vector<4x32xf32> -> vector<4x32xf32>
    %cst_105 = arith.constant dense<0.000000e+00> : vector<4x32xf32>
    %231 = tpu.matmul %227, %91, %cst_105 {dimension_numbers = #tpu.dot_dimension_numbers<[1], [0], [0], [1], [0, 0, 1, 1], [], []>} : vector<4x32xf32>, vector<32x32xf32>, vector<4x32xf32> -> vector<4x32xf32>
    %232 = vector.extract_strided_slice %62 {offsets = [16, 0], sizes = [4, 32], strides = [1, 1]} : vector<32x32xf32> to vector<4x32xf32>
    %233 = arith.addf %232, %228 : vector<4x32xf32>
    %234 = arith.negf %233 : vector<4x32xf32>
    %235 = math.exp %234 : vector<4x32xf32>
    %cst_106 = arith.constant 1.000000e+00 : f32
    %236 = vector.broadcast %cst_106 : f32 to vector<4x32xf32>
    %237 = arith.addf %236, %235 : vector<4x32xf32>
    %238 = arith.divf %236, %237 : vector<4x32xf32>
    %239 = vector.extract_strided_slice %69 {offsets = [16, 0], sizes = [4, 32], strides = [1, 1]} : vector<32x32xf32> to vector<4x32xf32>
    %240 = arith.addf %239, %229 : vector<4x32xf32>
    %241 = arith.negf %240 : vector<4x32xf32>
    %242 = math.exp %241 : vector<4x32xf32>
    %cst_107 = arith.constant 1.000000e+00 : f32
    %243 = vector.broadcast %cst_107 : f32 to vector<4x32xf32>
    %244 = arith.addf %243, %242 : vector<4x32xf32>
    %245 = arith.divf %243, %244 : vector<4x32xf32>
    %246 = vector.extract_strided_slice %76 {offsets = [16, 0], sizes = [4, 32], strides = [1, 1]} : vector<32x32xf32> to vector<4x32xf32>
    %247 = arith.addf %246, %230 : vector<4x32xf32>
    %248 = math.tanh %247 : vector<4x32xf32>
    %249 = vector.extract_strided_slice %83 {offsets = [16, 0], sizes = [4, 32], strides = [1, 1]} : vector<32x32xf32> to vector<4x32xf32>
    %250 = arith.addf %249, %231 : vector<4x32xf32>
    %251 = arith.negf %250 : vector<4x32xf32>
    %252 = math.exp %251 : vector<4x32xf32>
    %cst_108 = arith.constant 1.000000e+00 : f32
    %253 = vector.broadcast %cst_108 : f32 to vector<4x32xf32>
    %254 = arith.addf %253, %252 : vector<4x32xf32>
    %255 = arith.divf %253, %254 : vector<4x32xf32>
    %256 = arith.mulf %245, %225 : vector<4x32xf32>
    %257 = arith.mulf %238, %248 : vector<4x32xf32>
    %258 = arith.addf %256, %257 : vector<4x32xf32>
    %259 = math.tanh %258 : vector<4x32xf32>
    %260 = arith.mulf %255, %259 : vector<4x32xf32>
    %cst_109 = arith.constant dense<0.000000e+00> : vector<4x32xf32>
    %261 = tpu.matmul %260, %85, %cst_109 {dimension_numbers = #tpu.dot_dimension_numbers<[1], [0], [0], [1], [0, 0, 1, 1], [], []>} : vector<4x32xf32>, vector<32x32xf32>, vector<4x32xf32> -> vector<4x32xf32>
    %cst_110 = arith.constant dense<0.000000e+00> : vector<4x32xf32>
    %262 = tpu.matmul %260, %87, %cst_110 {dimension_numbers = #tpu.dot_dimension_numbers<[1], [0], [0], [1], [0, 0, 1, 1], [], []>} : vector<4x32xf32>, vector<32x32xf32>, vector<4x32xf32> -> vector<4x32xf32>
    %cst_111 = arith.constant dense<0.000000e+00> : vector<4x32xf32>
    %263 = tpu.matmul %260, %89, %cst_111 {dimension_numbers = #tpu.dot_dimension_numbers<[1], [0], [0], [1], [0, 0, 1, 1], [], []>} : vector<4x32xf32>, vector<32x32xf32>, vector<4x32xf32> -> vector<4x32xf32>
    %cst_112 = arith.constant dense<0.000000e+00> : vector<4x32xf32>
    %264 = tpu.matmul %260, %91, %cst_112 {dimension_numbers = #tpu.dot_dimension_numbers<[1], [0], [0], [1], [0, 0, 1, 1], [], []>} : vector<4x32xf32>, vector<32x32xf32>, vector<4x32xf32> -> vector<4x32xf32>
    %265 = vector.extract_strided_slice %62 {offsets = [20, 0], sizes = [4, 32], strides = [1, 1]} : vector<32x32xf32> to vector<4x32xf32>
    %266 = arith.addf %265, %261 : vector<4x32xf32>
    %267 = arith.negf %266 : vector<4x32xf32>
    %268 = math.exp %267 : vector<4x32xf32>
    %cst_113 = arith.constant 1.000000e+00 : f32
    %269 = vector.broadcast %cst_113 : f32 to vector<4x32xf32>
    %270 = arith.addf %269, %268 : vector<4x32xf32>
    %271 = arith.divf %269, %270 : vector<4x32xf32>
    %272 = vector.extract_strided_slice %69 {offsets = [20, 0], sizes = [4, 32], strides = [1, 1]} : vector<32x32xf32> to vector<4x32xf32>
    %273 = arith.addf %272, %262 : vector<4x32xf32>
    %274 = arith.negf %273 : vector<4x32xf32>
    %275 = math.exp %274 : vector<4x32xf32>
    %cst_114 = arith.constant 1.000000e+00 : f32
    %276 = vector.broadcast %cst_114 : f32 to vector<4x32xf32>
    %277 = arith.addf %276, %275 : vector<4x32xf32>
    %278 = arith.divf %276, %277 : vector<4x32xf32>
    %279 = vector.extract_strided_slice %76 {offsets = [20, 0], sizes = [4, 32], strides = [1, 1]} : vector<32x32xf32> to vector<4x32xf32>
    %280 = arith.addf %279, %263 : vector<4x32xf32>
    %281 = math.tanh %280 : vector<4x32xf32>
    %282 = vector.extract_strided_slice %83 {offsets = [20, 0], sizes = [4, 32], strides = [1, 1]} : vector<32x32xf32> to vector<4x32xf32>
    %283 = arith.addf %282, %264 : vector<4x32xf32>
    %284 = arith.negf %283 : vector<4x32xf32>
    %285 = math.exp %284 : vector<4x32xf32>
    %cst_115 = arith.constant 1.000000e+00 : f32
    %286 = vector.broadcast %cst_115 : f32 to vector<4x32xf32>
    %287 = arith.addf %286, %285 : vector<4x32xf32>
    %288 = arith.divf %286, %287 : vector<4x32xf32>
    %289 = arith.mulf %278, %258 : vector<4x32xf32>
    %290 = arith.mulf %271, %281 : vector<4x32xf32>
    %291 = arith.addf %289, %290 : vector<4x32xf32>
    %292 = math.tanh %291 : vector<4x32xf32>
    %293 = arith.mulf %288, %292 : vector<4x32xf32>
    %cst_116 = arith.constant dense<0.000000e+00> : vector<4x32xf32>
    %294 = tpu.matmul %293, %85, %cst_116 {dimension_numbers = #tpu.dot_dimension_numbers<[1], [0], [0], [1], [0, 0, 1, 1], [], []>} : vector<4x32xf32>, vector<32x32xf32>, vector<4x32xf32> -> vector<4x32xf32>
    %cst_117 = arith.constant dense<0.000000e+00> : vector<4x32xf32>
    %295 = tpu.matmul %293, %87, %cst_117 {dimension_numbers = #tpu.dot_dimension_numbers<[1], [0], [0], [1], [0, 0, 1, 1], [], []>} : vector<4x32xf32>, vector<32x32xf32>, vector<4x32xf32> -> vector<4x32xf32>
    %cst_118 = arith.constant dense<0.000000e+00> : vector<4x32xf32>
    %296 = tpu.matmul %293, %89, %cst_118 {dimension_numbers = #tpu.dot_dimension_numbers<[1], [0], [0], [1], [0, 0, 1, 1], [], []>} : vector<4x32xf32>, vector<32x32xf32>, vector<4x32xf32> -> vector<4x32xf32>
    %cst_119 = arith.constant dense<0.000000e+00> : vector<4x32xf32>
    %297 = tpu.matmul %293, %91, %cst_119 {dimension_numbers = #tpu.dot_dimension_numbers<[1], [0], [0], [1], [0, 0, 1, 1], [], []>} : vector<4x32xf32>, vector<32x32xf32>, vector<4x32xf32> -> vector<4x32xf32>
    %298 = vector.extract_strided_slice %62 {offsets = [24, 0], sizes = [4, 32], strides = [1, 1]} : vector<32x32xf32> to vector<4x32xf32>
    %299 = arith.addf %298, %294 : vector<4x32xf32>
    %300 = arith.negf %299 : vector<4x32xf32>
    %301 = math.exp %300 : vector<4x32xf32>
    %cst_120 = arith.constant 1.000000e+00 : f32
    %302 = vector.broadcast %cst_120 : f32 to vector<4x32xf32>
    %303 = arith.addf %302, %301 : vector<4x32xf32>
    %304 = arith.divf %302, %303 : vector<4x32xf32>
    %305 = vector.extract_strided_slice %69 {offsets = [24, 0], sizes = [4, 32], strides = [1, 1]} : vector<32x32xf32> to vector<4x32xf32>
    %306 = arith.addf %305, %295 : vector<4x32xf32>
    %307 = arith.negf %306 : vector<4x32xf32>
    %308 = math.exp %307 : vector<4x32xf32>
    %cst_121 = arith.constant 1.000000e+00 : f32
    %309 = vector.broadcast %cst_121 : f32 to vector<4x32xf32>
    %310 = arith.addf %309, %308 : vector<4x32xf32>
    %311 = arith.divf %309, %310 : vector<4x32xf32>
    %312 = vector.extract_strided_slice %76 {offsets = [24, 0], sizes = [4, 32], strides = [1, 1]} : vector<32x32xf32> to vector<4x32xf32>
    %313 = arith.addf %312, %296 : vector<4x32xf32>
    %314 = math.tanh %313 : vector<4x32xf32>
    %315 = vector.extract_strided_slice %83 {offsets = [24, 0], sizes = [4, 32], strides = [1, 1]} : vector<32x32xf32> to vector<4x32xf32>
    %316 = arith.addf %315, %297 : vector<4x32xf32>
    %317 = arith.negf %316 : vector<4x32xf32>
    %318 = math.exp %317 : vector<4x32xf32>
    %cst_122 = arith.constant 1.000000e+00 : f32
    %319 = vector.broadcast %cst_122 : f32 to vector<4x32xf32>
    %320 = arith.addf %319, %318 : vector<4x32xf32>
    %321 = arith.divf %319, %320 : vector<4x32xf32>
    %322 = arith.mulf %311, %291 : vector<4x32xf32>
    %323 = arith.mulf %304, %314 : vector<4x32xf32>
    %324 = arith.addf %322, %323 : vector<4x32xf32>
    %325 = math.tanh %324 : vector<4x32xf32>
    %326 = arith.mulf %321, %325 : vector<4x32xf32>
    %cst_123 = arith.constant dense<0.000000e+00> : vector<4x32xf32>
    %327 = tpu.matmul %326, %85, %cst_123 {dimension_numbers = #tpu.dot_dimension_numbers<[1], [0], [0], [1], [0, 0, 1, 1], [], []>} : vector<4x32xf32>, vector<32x32xf32>, vector<4x32xf32> -> vector<4x32xf32>
    %cst_124 = arith.constant dense<0.000000e+00> : vector<4x32xf32>
    %328 = tpu.matmul %326, %87, %cst_124 {dimension_numbers = #tpu.dot_dimension_numbers<[1], [0], [0], [1], [0, 0, 1, 1], [], []>} : vector<4x32xf32>, vector<32x32xf32>, vector<4x32xf32> -> vector<4x32xf32>
    %cst_125 = arith.constant dense<0.000000e+00> : vector<4x32xf32>
    %329 = tpu.matmul %326, %89, %cst_125 {dimension_numbers = #tpu.dot_dimension_numbers<[1], [0], [0], [1], [0, 0, 1, 1], [], []>} : vector<4x32xf32>, vector<32x32xf32>, vector<4x32xf32> -> vector<4x32xf32>
    %cst_126 = arith.constant dense<0.000000e+00> : vector<4x32xf32>
    %330 = tpu.matmul %326, %91, %cst_126 {dimension_numbers = #tpu.dot_dimension_numbers<[1], [0], [0], [1], [0, 0, 1, 1], [], []>} : vector<4x32xf32>, vector<32x32xf32>, vector<4x32xf32> -> vector<4x32xf32>
    %331 = vector.extract_strided_slice %62 {offsets = [28, 0], sizes = [4, 32], strides = [1, 1]} : vector<32x32xf32> to vector<4x32xf32>
    %332 = arith.addf %331, %327 : vector<4x32xf32>
    %333 = arith.negf %332 : vector<4x32xf32>
    %334 = math.exp %333 : vector<4x32xf32>
    %cst_127 = arith.constant 1.000000e+00 : f32
    %335 = vector.broadcast %cst_127 : f32 to vector<4x32xf32>
    %336 = arith.addf %335, %334 : vector<4x32xf32>
    %337 = arith.divf %335, %336 : vector<4x32xf32>
    %338 = vector.extract_strided_slice %69 {offsets = [28, 0], sizes = [4, 32], strides = [1, 1]} : vector<32x32xf32> to vector<4x32xf32>
    %339 = arith.addf %338, %328 : vector<4x32xf32>
    %340 = arith.negf %339 : vector<4x32xf32>
    %341 = math.exp %340 : vector<4x32xf32>
    %cst_128 = arith.constant 1.000000e+00 : f32
    %342 = vector.broadcast %cst_128 : f32 to vector<4x32xf32>
    %343 = arith.addf %342, %341 : vector<4x32xf32>
    %344 = arith.divf %342, %343 : vector<4x32xf32>
    %345 = vector.extract_strided_slice %76 {offsets = [28, 0], sizes = [4, 32], strides = [1, 1]} : vector<32x32xf32> to vector<4x32xf32>
    %346 = arith.addf %345, %329 : vector<4x32xf32>
    %347 = math.tanh %346 : vector<4x32xf32>
    %348 = vector.extract_strided_slice %83 {offsets = [28, 0], sizes = [4, 32], strides = [1, 1]} : vector<32x32xf32> to vector<4x32xf32>
    %349 = arith.addf %348, %330 : vector<4x32xf32>
    %350 = arith.negf %349 : vector<4x32xf32>
    %351 = math.exp %350 : vector<4x32xf32>
    %cst_129 = arith.constant 1.000000e+00 : f32
    %352 = vector.broadcast %cst_129 : f32 to vector<4x32xf32>
    %353 = arith.addf %352, %351 : vector<4x32xf32>
    %354 = arith.divf %352, %353 : vector<4x32xf32>
    %355 = arith.mulf %344, %324 : vector<4x32xf32>
    %356 = arith.mulf %337, %347 : vector<4x32xf32>
    %357 = arith.addf %355, %356 : vector<4x32xf32>
    %358 = math.tanh %357 : vector<4x32xf32>
    %359 = arith.mulf %354, %358 : vector<4x32xf32>
    %c0_130 = arith.constant 0 : index
    %c0_131 = arith.constant 0 : index
    %360 = vector.load %arg12[%c0_130, %c0_131] : memref<1x1024xf32, #tpu.memory_space<vmem>>, vector<1x1024xf32>
    %361 = vector.shape_cast %360 : vector<1x1024xf32> to vector<1x1024xf32>
    %362 = vector.broadcast %361 : vector<1x1024xf32> to vector<8x1024xf32>
    %363 = vector.extract_strided_slice %128 {offsets = [0, 0], sizes = [1, 32], strides = [1, 1]} : vector<4x32xf32> to vector<1x32xf32>
    %364 = vector.extract_strided_slice %161 {offsets = [0, 0], sizes = [1, 32], strides = [1, 1]} : vector<4x32xf32> to vector<1x32xf32>
    %365 = vector.extract_strided_slice %194 {offsets = [0, 0], sizes = [1, 32], strides = [1, 1]} : vector<4x32xf32> to vector<1x32xf32>
    %366 = vector.extract_strided_slice %227 {offsets = [0, 0], sizes = [1, 32], strides = [1, 1]} : vector<4x32xf32> to vector<1x32xf32>
    %367 = vector.extract_strided_slice %260 {offsets = [0, 0], sizes = [1, 32], strides = [1, 1]} : vector<4x32xf32> to vector<1x32xf32>
    %368 = vector.extract_strided_slice %293 {offsets = [0, 0], sizes = [1, 32], strides = [1, 1]} : vector<4x32xf32> to vector<1x32xf32>
    %369 = vector.extract_strided_slice %326 {offsets = [0, 0], sizes = [1, 32], strides = [1, 1]} : vector<4x32xf32> to vector<1x32xf32>
    %370 = vector.extract_strided_slice %359 {offsets = [0, 0], sizes = [1, 32], strides = [1, 1]} : vector<4x32xf32> to vector<1x32xf32>
    %371 = tpu.concatenate %363, %364, %365, %366, %367, %368, %369, %370 in 0 : vector<1x32xf32>, vector<1x32xf32>, vector<1x32xf32>, vector<1x32xf32>, vector<1x32xf32>, vector<1x32xf32>, vector<1x32xf32>, vector<1x32xf32> -> vector<8x32xf32>
    %372 = arith.truncf %371 : vector<8x32xf32> to vector<8x32xbf16>
    %c0_132 = arith.constant 0 : index
    %c0_133 = arith.constant 0 : index
    %373 = vector.load %arg11[%c0_132, %c0_133] : memref<128x1024xbf16, #tpu.memory_space<vmem>>, vector<32x1024xbf16>
    %cst_134 = arith.constant dense<0.000000e+00> : vector<8x1024xf32>
    %374 = tpu.matmul %372, %373, %cst_134 {dimension_numbers = #tpu.dot_dimension_numbers<[1], [0], [0], [1], [0, 0, 1, 1], [], []>} : vector<8x32xbf16>, vector<32x1024xbf16>, vector<8x1024xf32> -> vector<8x1024xf32>
    %375 = arith.addf %362, %374 : vector<8x1024xf32>
    %376 = vector.extract_strided_slice %128 {offsets = [1, 0], sizes = [1, 32], strides = [1, 1]} : vector<4x32xf32> to vector<1x32xf32>
    %377 = vector.extract_strided_slice %161 {offsets = [1, 0], sizes = [1, 32], strides = [1, 1]} : vector<4x32xf32> to vector<1x32xf32>
    %378 = vector.extract_strided_slice %194 {offsets = [1, 0], sizes = [1, 32], strides = [1, 1]} : vector<4x32xf32> to vector<1x32xf32>
    %379 = vector.extract_strided_slice %227 {offsets = [1, 0], sizes = [1, 32], strides = [1, 1]} : vector<4x32xf32> to vector<1x32xf32>
    %380 = vector.extract_strided_slice %260 {offsets = [1, 0], sizes = [1, 32], strides = [1, 1]} : vector<4x32xf32> to vector<1x32xf32>
    %381 = vector.extract_strided_slice %293 {offsets = [1, 0], sizes = [1, 32], strides = [1, 1]} : vector<4x32xf32> to vector<1x32xf32>
    %382 = vector.extract_strided_slice %326 {offsets = [1, 0], sizes = [1, 32], strides = [1, 1]} : vector<4x32xf32> to vector<1x32xf32>
    %383 = vector.extract_strided_slice %359 {offsets = [1, 0], sizes = [1, 32], strides = [1, 1]} : vector<4x32xf32> to vector<1x32xf32>
    %384 = tpu.concatenate %376, %377, %378, %379, %380, %381, %382, %383 in 0 : vector<1x32xf32>, vector<1x32xf32>, vector<1x32xf32>, vector<1x32xf32>, vector<1x32xf32>, vector<1x32xf32>, vector<1x32xf32>, vector<1x32xf32> -> vector<8x32xf32>
    %385 = arith.truncf %384 : vector<8x32xf32> to vector<8x32xbf16>
    %c32 = arith.constant 32 : index
    %c0_135 = arith.constant 0 : index
    %386 = vector.load %arg11[%c32, %c0_135] : memref<128x1024xbf16, #tpu.memory_space<vmem>>, vector<32x1024xbf16>
    %cst_136 = arith.constant dense<0.000000e+00> : vector<8x1024xf32>
    %387 = tpu.matmul %385, %386, %cst_136 {dimension_numbers = #tpu.dot_dimension_numbers<[1], [0], [0], [1], [0, 0, 1, 1], [], []>} : vector<8x32xbf16>, vector<32x1024xbf16>, vector<8x1024xf32> -> vector<8x1024xf32>
    %388 = arith.addf %375, %387 : vector<8x1024xf32>
    %389 = vector.extract_strided_slice %128 {offsets = [2, 0], sizes = [1, 32], strides = [1, 1]} : vector<4x32xf32> to vector<1x32xf32>
    %390 = vector.extract_strided_slice %161 {offsets = [2, 0], sizes = [1, 32], strides = [1, 1]} : vector<4x32xf32> to vector<1x32xf32>
    %391 = vector.extract_strided_slice %194 {offsets = [2, 0], sizes = [1, 32], strides = [1, 1]} : vector<4x32xf32> to vector<1x32xf32>
    %392 = vector.extract_strided_slice %227 {offsets = [2, 0], sizes = [1, 32], strides = [1, 1]} : vector<4x32xf32> to vector<1x32xf32>
    %393 = vector.extract_strided_slice %260 {offsets = [2, 0], sizes = [1, 32], strides = [1, 1]} : vector<4x32xf32> to vector<1x32xf32>
    %394 = vector.extract_strided_slice %293 {offsets = [2, 0], sizes = [1, 32], strides = [1, 1]} : vector<4x32xf32> to vector<1x32xf32>
    %395 = vector.extract_strided_slice %326 {offsets = [2, 0], sizes = [1, 32], strides = [1, 1]} : vector<4x32xf32> to vector<1x32xf32>
    %396 = vector.extract_strided_slice %359 {offsets = [2, 0], sizes = [1, 32], strides = [1, 1]} : vector<4x32xf32> to vector<1x32xf32>
    %397 = tpu.concatenate %389, %390, %391, %392, %393, %394, %395, %396 in 0 : vector<1x32xf32>, vector<1x32xf32>, vector<1x32xf32>, vector<1x32xf32>, vector<1x32xf32>, vector<1x32xf32>, vector<1x32xf32>, vector<1x32xf32> -> vector<8x32xf32>
    %398 = arith.truncf %397 : vector<8x32xf32> to vector<8x32xbf16>
    %c64 = arith.constant 64 : index
    %c0_137 = arith.constant 0 : index
    %399 = vector.load %arg11[%c64, %c0_137] : memref<128x1024xbf16, #tpu.memory_space<vmem>>, vector<32x1024xbf16>
    %cst_138 = arith.constant dense<0.000000e+00> : vector<8x1024xf32>
    %400 = tpu.matmul %398, %399, %cst_138 {dimension_numbers = #tpu.dot_dimension_numbers<[1], [0], [0], [1], [0, 0, 1, 1], [], []>} : vector<8x32xbf16>, vector<32x1024xbf16>, vector<8x1024xf32> -> vector<8x1024xf32>
    %401 = arith.addf %388, %400 : vector<8x1024xf32>
    %402 = vector.extract_strided_slice %128 {offsets = [3, 0], sizes = [1, 32], strides = [1, 1]} : vector<4x32xf32> to vector<1x32xf32>
    %403 = vector.extract_strided_slice %161 {offsets = [3, 0], sizes = [1, 32], strides = [1, 1]} : vector<4x32xf32> to vector<1x32xf32>
    %404 = vector.extract_strided_slice %194 {offsets = [3, 0], sizes = [1, 32], strides = [1, 1]} : vector<4x32xf32> to vector<1x32xf32>
    %405 = vector.extract_strided_slice %227 {offsets = [3, 0], sizes = [1, 32], strides = [1, 1]} : vector<4x32xf32> to vector<1x32xf32>
    %406 = vector.extract_strided_slice %260 {offsets = [3, 0], sizes = [1, 32], strides = [1, 1]} : vector<4x32xf32> to vector<1x32xf32>
    %407 = vector.extract_strided_slice %293 {offsets = [3, 0], sizes = [1, 32], strides = [1, 1]} : vector<4x32xf32> to vector<1x32xf32>
    %408 = vector.extract_strided_slice %326 {offsets = [3, 0], sizes = [1, 32], strides = [1, 1]} : vector<4x32xf32> to vector<1x32xf32>
    %409 = vector.extract_strided_slice %359 {offsets = [3, 0], sizes = [1, 32], strides = [1, 1]} : vector<4x32xf32> to vector<1x32xf32>
    %410 = tpu.concatenate %402, %403, %404, %405, %406, %407, %408, %409 in 0 : vector<1x32xf32>, vector<1x32xf32>, vector<1x32xf32>, vector<1x32xf32>, vector<1x32xf32>, vector<1x32xf32>, vector<1x32xf32>, vector<1x32xf32> -> vector<8x32xf32>
    %411 = arith.truncf %410 : vector<8x32xf32> to vector<8x32xbf16>
    %c96 = arith.constant 96 : index
    %c0_139 = arith.constant 0 : index
    %412 = vector.load %arg11[%c96, %c0_139] : memref<128x1024xbf16, #tpu.memory_space<vmem>>, vector<32x1024xbf16>
    %cst_140 = arith.constant dense<0.000000e+00> : vector<8x1024xf32>
    %413 = tpu.matmul %411, %412, %cst_140 {dimension_numbers = #tpu.dot_dimension_numbers<[1], [0], [0], [1], [0, 0, 1, 1], [], []>} : vector<8x32xbf16>, vector<32x1024xbf16>, vector<8x1024xf32> -> vector<8x1024xf32>
    %414 = arith.addf %401, %413 : vector<8x1024xf32>
    %415 = arith.truncf %414 : vector<8x1024xf32> to vector<8x1024xbf16>
    %c0_141 = arith.constant 0 : index
    %c0_142 = arith.constant 0 : index
    %416 = vector.load %arg13[%c0_141, %c0_142] : memref<1024x256xbf16, #tpu.memory_space<vmem>>, vector<1024x256xbf16>
    %cst_143 = arith.constant dense<0.000000e+00> : vector<8x256xf32>
    %417 = tpu.matmul %415, %416, %cst_143 {dimension_numbers = #tpu.dot_dimension_numbers<[1], [0], [0], [1], [0, 0, 1, 1], [], []>} : vector<8x1024xbf16>, vector<1024x256xbf16>, vector<8x256xf32> -> vector<8x256xf32>
    %c0_144 = arith.constant 0 : index
    %c0_145 = arith.constant 0 : index
    %418 = vector.load %arg14[%c0_144, %c0_145] : memref<1x256xf32, #tpu.memory_space<vmem>>, vector<1x256xf32>
    %419 = vector.broadcast %418 : vector<1x256xf32> to vector<8x256xf32>
    %420 = arith.addf %417, %419 : vector<8x256xf32>
    %c0_146 = arith.constant 0 : index
    %c0_147 = arith.constant 0 : index
    %421 = vector.load %arg15[%c0_146, %c0_147] : memref<256x8xf32, #tpu.memory_space<vmem>>, vector<256x8xf32>
    %cst_148 = arith.constant dense<0.000000e+00> : vector<8x8xf32>
    %422 = tpu.matmul %420, %421, %cst_148 {dimension_numbers = #tpu.dot_dimension_numbers<[1], [0], [0], [1], [0, 0, 1, 1], [], []>} : vector<8x256xf32>, vector<256x8xf32>, vector<8x8xf32> -> vector<8x8xf32>
    %c0_149 = arith.constant 0 : index
    %c0_150 = arith.constant 0 : index
    %423 = vector.load %arg16[%c0_149, %c0_150] : memref<1x8xf32, #tpu.memory_space<vmem>>, vector<1x8xf32>
    %424 = vector.broadcast %423 : vector<1x8xf32> to vector<8x8xf32>
    %425 = arith.addf %422, %424 : vector<8x8xf32>
    %c0_151 = arith.constant 0 : index
    %c0_152 = arith.constant 0 : index
    %426 = vector.load %arg17[%c0_151, %c0_152] : memref<8x8xf32, #tpu.memory_space<vmem>>, vector<8x8xf32>
    tpu.vector_store %arg17[%c0_151, %c0_152], %425 {strides = array<i32>} : memref<8x8xf32, #tpu.memory_space<vmem>>, vector<8x8xf32>,
    return
  }
}

</mosaic_0001>

<bundles_post_ra>
// kernel: _forward_impl.3
= control target key start
LH: loop header
LB: loop body
LE: loop exit
PB: predicated region body
PF: predicated region fallthrough
CT: control target
= control target key end

     0   :  { %s10534_s0 = inlined_call_operand.hbm [shape: f32[32,16], index: 0, kind: input, shape index: {}]   ;;  %s10535_s1 = inlined_call_operand.vmem [shape: f32[32,4], index: 1, kind: input, shape index: {}]   ;;  %s10536_s2 = inlined_call_operand.hbm [shape: f32[16,32], index: 2, kind: input, shape index: {}]   ;;  %s10537_s3 = inlined_call_operand.hbm [shape: f32[16,32], index: 3, kind: input, shape index: {}]   ;;  %s10538_s4 = inlined_call_operand.hbm [shape: f32[16,32], index: 4, kind: input, shape index: {}]   ;;  %s10539_s5 = inlined_call_operand.hbm [shape: f32[32,32], index: 5, kind: input, shape index: {}]   ;;  %s10540_s6 = inlined_call_operand.hbm [shape: f32[4,32,32], index: 6, kind: input, shape index: {}]   ;;  %s10541_s7 = inlined_call_operand.hbm [shape: f32[4,32,32], index: 7, kind: input, shape index: {}]   ;;  %s10542_s8 = inlined_call_operand.hbm [shape: f32[4,1,32], index: 8, kind: input, shape index: {}]   ;;  %s10543_s9 = inlined_call_operand.vmem [shape: f32[1,4,32], index: 9, kind: input, shape index: {}]   ;;  %s10544_s10 = inlined_call_operand.vmem [shape: f32[1,4,32], index: 10, kind: input, shape index: {}]   ;;  %s10545_s11 = inlined_call_operand.vmem [shape: bf16[128,1024], index: 11, kind: input, shape index: {}]   ;;  %s10546_s12 = inlined_call_operand.hbm [shape: f32[1,1024], index: 12, kind: input, shape index: {}]   ;;  %s10547_s13 = inlined_call_operand.hbm [shape: bf16[1024,256], index: 13, kind: input, shape index: {}]   ;;  %s10548_s14 = inlined_call_operand.hbm [shape: f32[1,256], index: 14, kind: input, shape index: {}]   ;;  %s10549_s15 = inlined_call_operand.vmem [shape: f32[256,8], index: 15, kind: input, shape index: {}]   ;;  %s10550_s16 = inlined_call_operand.vmem [shape: f32[1,8], index: 16, kind: input, shape index: {}]   ;;  %s10551_s17 = inlined_call_operand.hbm [shape: f32[8,8], index: 17, kind: output, shape index: {}]  }
   0x1   :  { %10554 = sst [smem:[#allocation28_spill]] %s10534_s0 }
   0x2   :  { %10555 = sst [smem:[#allocation29_spill]] %s10535_s1 }
   0x3   :  { %22 = vsyncpa [#allocation3], 0 }
   0x4   :  { %23 = vsyncpa [#allocation6], 0 }
   0x5   :  { %24 = vsyncpa [#allocation9], 0 }
   0x6   :  { %25 = vsyncpa [#allocation12], 0 }
   0x7   :  { %26 = vsyncpa [#allocation15], 0 }
   0x8   :  { %27 = vsyncpa [#allocation18], 0 }
   0x9   :  { %28 = vsyncpa [#allocation4], 0  ;;  %s9216_s24 = smov [#allocation5]   ;;  %s9217_s26 = smov [#allocation8]  }
   0xa   :  { %s48_s25 = sshll.u32 %s9216_s24, 4  ;;  %s72_s27 = sshll.u32 %s9217_s26, 4  ;;  %s49_s25 = int_to_ptr.vmem [resolvable:$true] %s48_s25  ;;  %s9326_s27 = int_to_ptr.vmem [resolvable:$true] %s72_s27 }
   0xb   :  { %s8938_s0 = scalar_lea.hbm %s10536_s2, 256 }
   0xc   :  { %p8939_p0 = scmp.ne.s32.totalorder %s10536_s2, %s8938_s0  ;;  %p8942_p1 = scmp.lt.u32.totalorder %s8938_s0, %s10536_s2 }
   0xe   :  { %p8944_p2 = pnand %p8942_p1, %p8939_p0 }
  0x10   :  { %8947 = shalt.err (!%p8944_p2)
}
  0x11   :  { %s8948_s20 = scalar_lea.vmem %s49_s25, 256  ;;  %p8953_p4 = scmp.lt.s32.totalorder %s49_s25, %s49_s25 }
  0x12   :  { %p8949_p3 = scmp.ne.s32.totalorder %s49_s25, %s8948_s20  ;;  %p8954_p5 = scmp.lt.s32.totalorder %s8948_s20, %s8948_s20 }
  0x14   :  { %p8955_p6 = por %p8954_p5, %p8953_p4 }
  0x16   :  { %p8956_p7 = pnand %p8955_p6, %p8949_p3 }
  0x18   :  { %8959 = shalt.err (!%p8956_p7)
}
  0x19   :  { %s9218_s21 = smov 128   ;;  %s9219_s22 = smov 8  }
  0x1a   :  { %54 = dma.hbm_to_vmem [thread:$0]  %s10536_s2, 256, %s49_s25, [#allocation6], %s9218_s21, %s9218_s21, %s9219_s22  }
  0x1b   :  { %s8960_s29 = scalar_lea.hbm %s10538_s4, 256 }
  0x1c   :  { %p8961_p8 = scmp.ne.s32.totalorder %s10538_s4, %s8960_s29  ;;  %p8964_p9 = scmp.lt.u32.totalorder %s8960_s29, %s10538_s4 }
  0x1e   :  { %p8966_p10 = pnand %p8964_p9, %p8961_p8 }
  0x20   :  { %8969 = shalt.err (!%p8966_p10)
}
  0x21   :  { %s8970_s1 = scalar_lea.vmem %s9326_s27, 256  ;;  %p8975_p12 = scmp.lt.s32.totalorder %s9326_s27, %s9326_s27 }
  0x22   :  { %p8971_p11 = scmp.ne.s32.totalorder %s9326_s27, %s8970_s1  ;;  %p8976_p13 = scmp.lt.s32.totalorder %s8970_s1, %s8970_s1 }
  0x24   :  { %p8977_p0 = por %p8976_p13, %p8975_p12 }
  0x26   :  { %p8978_p1 = pnand %p8977_p0, %p8971_p11 }
  0x28   :  { %8981 = shalt.err (!%p8978_p1)
}
  0x29   :  { %78 = dma.hbm_to_vmem [thread:$0]  %s10538_s4, 256, %s9326_s27, [#allocation9], %s9218_s21, %s9218_s21, %s9219_s22  }
  0x2a   :  { %s9220_s20 = smov [#allocation11]   ;;  %s9221_s24 = smov [#allocation14]  }
  0x2b   :  { %s96_s23 = sshll.u32 %s9220_s20, 4  ;;  %s120_s26 = sshll.u32 %s9221_s24, 4  ;;  %s97_s23 = int_to_ptr.vmem [resolvable:$true] %s96_s23  ;;  %s9363_s26 = int_to_ptr.vmem [resolvable:$true] %s120_s26 }
  0x2c   :  { %s8982_s0 = scalar_lea.hbm %s10540_s6, 2048 }
  0x2d   :  { %p8983_p2 = scmp.ne.s32.totalorder %s10540_s6, %s8982_s0  ;;  %p8986_p3 = scmp.lt.u32.totalorder %s8982_s0, %s10540_s6 }
  0x2f   :  { %p8988_p4 = pnand %p8986_p3, %p8983_p2 }
  0x31   :  { %8991 = shalt.err (!%p8988_p4)
}
  0x32   :  { %s8992_s4 = scalar_lea.vmem %s97_s23, 2048  ;;  %p8997_p6 = scmp.lt.s32.totalorder %s97_s23, %s97_s23 }
  0x33   :  { %p8993_p5 = scmp.ne.s32.totalorder %s97_s23, %s8992_s4  ;;  %p8998_p7 = scmp.lt.s32.totalorder %s8992_s4, %s8992_s4 }
  0x35   :  { %p8999_p8 = por %p8998_p7, %p8997_p6 }
  0x37   :  { %p9000_p9 = pnand %p8999_p8, %p8993_p5 }
  0x39   :  { %9003 = shalt.err (!%p9000_p9)
}
  0x3a   :  { %102 = dma.hbm_to_vmem [thread:$0]  %s10540_s6, 2048, %s97_s23, [#allocation12], %s9218_s21, %s9218_s21, %s9219_s22  }
  0x3b   :  { %s9004_s24 = scalar_lea.hbm %s10542_s8, 64 }
  0x3c   :  { %p9005_p10 = scmp.ne.s32.totalorder %s10542_s8, %s9004_s24  ;;  %p9008_p11 = scmp.lt.u32.totalorder %s9004_s24, %s10542_s8 }
  0x3e   :  { %p9010_p12 = pnand %p9008_p11, %p9005_p10 }
  0x40   :  { %9013 = shalt.err (!%p9010_p12)
}
  0x41   :  { %s9014_s18 = scalar_lea.vmem %s9363_s26, 64  ;;  %p9019_p0 = scmp.lt.s32.totalorder %s9363_s26, %s9363_s26 }
  0x42   :  { %p9015_p13 = scmp.ne.s32.totalorder %s9363_s26, %s9014_s18  ;;  %p9020_p1 = scmp.lt.s32.totalorder %s9014_s18, %s9014_s18 }
  0x44   :  { %p9021_p2 = por %p9020_p1, %p9019_p0 }
  0x46   :  { %p9022_p3 = pnand %p9021_p2, %p9015_p13 }
  0x48   :  { %9025 = shalt.err (!%p9022_p3)
}
  0x49   :  { %s9222_s6 = smov 16   ;;  %s9223_s23 = smov 1  }
  0x4a   :  { %126 = dma.hbm_to_vmem [thread:$0]  %s10542_s8, 64, %s9363_s26, [#allocation15], %s9222_s6, %s9222_s6, %s9223_s23  }
  0x4b   :  { %s9224_s4 = smov [#allocation17]   ;;  %s9225_s2 = smov [#allocation2]  }
  0x4c   :  { %s148_s27 = sshll.u32 %s9224_s4, 4  ;;  %s34_s25 = sshll.u32 %s9225_s2, 4  ;;  %s149_s27 = int_to_ptr.vmem [resolvable:$true] %s148_s27  ;;  %s9397_s25 = int_to_ptr.vmem [resolvable:$true] %s34_s25 }
  0x4d   :  { %s9026_s28 = scalar_lea.hbm %s10547_s13, 16384 }
  0x4e   :  { %p9027_p4 = scmp.ne.s32.totalorder %s10547_s13, %s9026_s28  ;;  %p9030_p5 = scmp.lt.u32.totalorder %s9026_s28, %s10547_s13 }
  0x50   :  { %p9032_p6 = pnand %p9030_p5, %p9027_p4 }
  0x52   :  { %9035 = shalt.err (!%p9032_p6)
}
  0x53   :  { %s9036_s8 = scalar_lea.vmem %s149_s27, 16384  ;;  %p9041_p8 = scmp.lt.s32.totalorder %s149_s27, %s149_s27 }
  0x54   :  { %p9037_p7 = scmp.ne.s32.totalorder %s149_s27, %s9036_s8  ;;  %p9042_p9 = scmp.lt.s32.totalorder %s9036_s8, %s9036_s8 }
  0x56   :  { %p9043_p10 = por %p9042_p9, %p9041_p8 }
  0x58   :  { %p9044_p11 = pnand %p9043_p10, %p9037_p7 }
  0x5a   :  { %9047 = shalt.err (!%p9044_p11)
}
  0x5b   :  { %154 = dma.hbm_to_vmem [thread:$0]  %s10547_s13, 16384, %s149_s27, [#allocation18], %s9218_s21, %s9218_s21, %s9219_s22  }
  0x5c   :  { %s10556_s1 = sld [smem:[#allocation28_spill]] }
  0x62   :  { %s9048_s4 = scalar_lea.hbm %s10556_s1, 512 }
  0x63   :  { %p9049_p12 = scmp.ne.s32.totalorder %s10556_s1, %s9048_s4  ;;  %p9052_p13 = scmp.lt.u32.totalorder %s9048_s4, %s10556_s1 }
  0x65   :  { %p9054_p0 = pnand %p9052_p13, %p9049_p12 }
  0x67   :  { %9057 = shalt.err (!%p9054_p0)
}
  0x68   :  { %s9058_s29 = scalar_lea.vmem %s9397_s25, 512  ;;  %p9063_p2 = scmp.lt.s32.totalorder %s9397_s25, %s9397_s25 }
  0x69   :  { %p9059_p1 = scmp.ne.s32.totalorder %s9397_s25, %s9058_s29  ;;  %p9064_p3 = scmp.lt.s32.totalorder %s9058_s29, %s9058_s29 }
  0x6b   :  { %p9065_p4 = por %p9064_p3, %p9063_p2 }
  0x6d   :  { %p9066_p5 = pnand %p9065_p4, %p9059_p1 }
  0x6f   :  { %9069 = shalt.err (!%p9066_p5)
}
  0x70   :  { %40 = dma.hbm_to_vmem [thread:$0]  %s10556_s1, 512, %s9397_s25, [#allocation3], %s9218_s21, %s9218_s21, %s9219_s22  }
  0x71   :  { %s9226_s0 = smov [#allocation7]   ;;  %s9227_s18 = smov [#allocation10]  }
  0x72   :  { %s60_s30 = sshll.u32 %s9226_s0, 4  ;;  %s84_s8 = sshll.u32 %s9227_s18, 4  ;;  %s61_s30 = int_to_ptr.vmem [resolvable:$true] %s60_s30  ;;  %s9434_s8 = int_to_ptr.vmem [resolvable:$true] %s84_s8 }
  0x73   :  { %s9070_s23 = scalar_lea.hbm %s10537_s3, 256 }
  0x74   :  { %p9071_p6 = scmp.ne.s32.totalorder %s10537_s3, %s9070_s23  ;;  %p9074_p7 = scmp.lt.u32.totalorder %s9070_s23, %s10537_s3 }
  0x76   :  { %p9076_p8 = pnand %p9074_p7, %p9071_p6 }
  0x78   :  { %9079 = shalt.err (!%p9076_p8)
}
  0x79   :  { %s9080_s25 = scalar_lea.vmem %s61_s30, 256  ;;  %p9085_p10 = scmp.lt.s32.totalorder %s61_s30, %s61_s30 }
  0x7a   :  { %p9081_p9 = scmp.ne.s32.totalorder %s61_s30, %s9080_s25  ;;  %p9086_p11 = scmp.lt.s32.totalorder %s9080_s25, %s9080_s25 }
  0x7c   :  { %p9087_p12 = por %p9086_p11, %p9085_p10 }
  0x7e   :  { %p9088_p13 = pnand %p9087_p12, %p9081_p9 }
  0x80   :  { %9091 = shalt.err (!%p9088_p13)
}
  0x81   :  { %66 = dma.hbm_to_vmem [thread:$0]  %s10537_s3, 256, %s61_s30, [#allocation6], %s9218_s21, %s9218_s21, %s9219_s22  }
  0x82   :  { %s9092_s13 = scalar_lea.hbm %s10539_s5, 512 }
  0x83   :  { %p9093_p0 = scmp.ne.s32.totalorder %s10539_s5, %s9092_s13  ;;  %p9096_p1 = scmp.lt.u32.totalorder %s9092_s13, %s10539_s5 }
  0x85   :  { %p9098_p2 = pnand %p9096_p1, %p9093_p0 }
  0x87   :  { %9101 = shalt.err (!%p9098_p2)
}
  0x88   :  { %s9102_s6 = scalar_lea.vmem %s9434_s8, 512  ;;  %p9107_p4 = scmp.lt.s32.totalorder %s9434_s8, %s9434_s8 }
  0x89   :  { %p9103_p3 = scmp.ne.s32.totalorder %s9434_s8, %s9102_s6  ;;  %p9108_p5 = scmp.lt.s32.totalorder %s9102_s6, %s9102_s6 }
  0x8b   :  { %p9109_p6 = por %p9108_p5, %p9107_p4 }
  0x8d   :  { %p9110_p7 = pnand %p9109_p6, %p9103_p3 }
  0x8f   :  { %9113 = shalt.err (!%p9110_p7)
}
  0x90   :  { %90 = dma.hbm_to_vmem [thread:$0]  %s10539_s5, 512, %s9434_s8, [#allocation9], %s9218_s21, %s9218_s21, %s9219_s22  }
  0x91   :  { %s9228_s23 = smov [#allocation13]   ;;  %s9229_s4 = smov [#allocation16]  }
  0x92   :  { %s108_s19 = sshll.u32 %s9228_s23, 4  ;;  %s139_s2 = sshll.u32 %s9229_s4, 4  ;;  %s109_s19 = int_to_ptr.vmem [resolvable:$true] %s108_s19  ;;  %s140_s2 = int_to_ptr.vmem [resolvable:$true] %s139_s2 }
  0x93   :  { %s9114_s1 = scalar_lea.hbm %s10541_s7, 2048 }
  0x94   :  { %p9115_p8 = scmp.ne.s32.totalorder %s10541_s7, %s9114_s1  ;;  %p9118_p9 = scmp.lt.u32.totalorder %s9114_s1, %s10541_s7 }
  0x96   :  { %p9120_p10 = pnand %p9118_p9, %p9115_p8 }
  0x98   :  { %9123 = shalt.err (!%p9120_p10)
}
  0x99   :  { %s9124_s5 = scalar_lea.vmem %s109_s19, 2048  ;;  %p9129_p12 = scmp.lt.s32.totalorder %s109_s19, %s109_s19 }
  0x9a   :  { %p9125_p11 = scmp.ne.s32.totalorder %s109_s19, %s9124_s5  ;;  %p9130_p13 = scmp.lt.s32.totalorder %s9124_s5, %s9124_s5 }
  0x9c   :  { %p9131_p0 = por %p9130_p13, %p9129_p12 }
  0x9e   :  { %p9132_p1 = pnand %p9131_p0, %p9125_p11 }
  0xa0   :  { %9135 = shalt.err (!%p9132_p1)
}
  0xa1   :  { %114 = dma.hbm_to_vmem [thread:$0]  %s10541_s7, 2048, %s109_s19, [#allocation12], %s9218_s21, %s9218_s21, %s9219_s22  }
  0xa2   :  { %s9136_s26 = scalar_lea.hbm %s10546_s12, 128 }
  0xa3   :  { %p9137_p2 = scmp.ne.s32.totalorder %s10546_s12, %s9136_s26  ;;  %p9140_p3 = scmp.lt.u32.totalorder %s9136_s26, %s10546_s12 }
  0xa5   :  { %p9142_p4 = pnand %p9140_p3, %p9137_p2 }
  0xa7   :  { %9145 = shalt.err (!%p9142_p4)
}
  0xa8   :  { %s9146_s4 = scalar_lea.vmem %s140_s2, 128  ;;  %p9151_p6 = scmp.lt.s32.totalorder %s140_s2, %s140_s2 }
  0xa9   :  { %p9147_p5 = scmp.ne.s32.totalorder %s140_s2, %s9146_s4  ;;  %p9152_p7 = scmp.lt.s32.totalorder %s9146_s4, %s9146_s4 }
  0xab   :  { %p9153_p8 = por %p9152_p7, %p9151_p6 }
  0xad   :  { %p9154_p9 = pnand %p9153_p8, %p9147_p5 }
  0xaf   :  { %9157 = shalt.err (!%p9154_p9)
}
  0xb0   :  { %142 = dma.hbm_to_vmem [thread:$0]  %s10546_s12, 128, %s140_s2, [#allocation15]  }
  0xb1   :  { %s9230_s22 = smov [#allocation19]   ;;  %s9158_s1 = scalar_lea.hbm %s10548_s14, 32 }
  0xb2   :  { %s161_s19 = sshll.u32 %s9230_s22, 4  ;;  %p9159_p10 = scmp.ne.s32.totalorder %s10548_s14, %s9158_s1  ;;  %s162_s19 = int_to_ptr.vmem [resolvable:$true] %s161_s19 }
  0xb3   :  { %p9162_p11 = scmp.lt.u32.totalorder %s9158_s1, %s10548_s14 }
  0xb5   :  { %p9164_p12 = pnand %p9162_p11, %p9159_p10 }
  0xb7   :  { %9167 = shalt.err (!%p9164_p12)
}
  0xb8   :  { %s9168_s5 = scalar_lea.vmem %s162_s19, 32  ;;  %p9173_p0 = scmp.lt.s32.totalorder %s162_s19, %s162_s19 }
  0xb9   :  { %p9169_p13 = scmp.ne.s32.totalorder %s162_s19, %s9168_s5  ;;  %p9174_p1 = scmp.lt.s32.totalorder %s9168_s5, %s9168_s5 }
  0xbb   :  { %p9175_p2 = por %p9174_p1, %p9173_p0 }
  0xbd   :  { %p9176_p3 = pnand %p9175_p2, %p9169_p13 }
  0xbf   :  { %9179 = shalt.err (!%p9176_p3)
}
  0xc0   :  { %164 = dma.hbm_to_vmem [thread:$0]  %s10548_s14, 32, %s162_s19, [#allocation18]  }
  0xc1   :  { %9202 = dma.done.wait [#allocation3], 512  }
  0xc2   :  { %9203 = vsyncadd [#allocation3], 4294966784 }
  0xc3   :  { %9204 = dma.done.wait [#allocation6], 512  }
  0xc4   :  { %9205 = vsyncadd [#allocation6], 4294966784 }
  0xc5   :  { %9206 = dma.done.wait [#allocation9], 768  }
  0xc6   :  { %9207 = vsyncadd [#allocation9], 4294966528 }
  0xc7   :  { %9208 = dma.done.wait [#allocation12], 4096  }
  0xc8   :  { %9209 = vsyncadd [#allocation12], 4294963200 }
  0xc9   :  { %9210 = dma.done.wait [#allocation15], 192  }
  0xca   :  { %9211 = vsyncadd [#allocation15], 4294967104 }
  0xcb   :  { %9212 = dma.done.wait [#allocation18], 16416  }
  0xcc   :  { %9213 = vsyncadd [#allocation18], 4294950880  ;;  %vm215_vm0 = vcmask 130048   ;;  %v213_v0 = vld [vmem:[#allocation7] sm:$0xff]  ;;  %v214_v1 = vld [vmem:[#allocation7 + $0x8] sm:$0xff]  ;;  %v9231_v7 = vmov 0.0  }
  0xcd   :  { %v9510_v2 = vld [vmem:[#allocation2] sm:$0xff]  ;;  %v8252_v3 = vpack.c.bf16 %v214_v1, %v213_v0  ;;  %v9514_v4 = vld [vmem:[#allocation2 + $0x10] sm:$0xff]  ;;  %v9516_v5 = vld [vmem:[#allocation2 + $0x8] sm:$0xff]  ;;  %vm9232_vm1 = vmmov 0   ;;  %vm317_vm2 = vcmask 1043456   ;;  %s10557_s27 = sld [smem:[#allocation29_spill]] }
  0xce   :  { %7724 = vmatprep.mubr.msk.f32.mxu0 %vm215_vm0, %v9510_v2  ;;  %7727 = vmatprep.mubr.msk.f32.mxu1 %vm215_vm0, %v9514_v4  ;;  %v9520_v6 = vld [vmem:[#allocation2 + $0x18] sm:$0xff]  ;;  %vm313_vm3 = vcmask 31744   ;;  %v211_v24 = vld [vmem:[#allocation5] sm:$0xff]  ;;  %v212_v25 = vld [vmem:[#allocation5 + $0x8] sm:$0xff]  ;;  %vm1034_vm4 = vcmask 261120   ;;  %vm4857_vm5 = vcmask 1040384  }
  0xcf   :  { %8253 = vmatprep.subr.bf16.mxu0 %v8252_v3  ;;  %8528 = vmatprep.subr.bf16.mxu1 %v8252_v3  ;;  %v8256_v26 = vpack.c.bf16 %v212_v25, %v211_v24  ;;  %v1030_v27 = vld [vmem:[#allocation10] sm:$0xff]  ;;  %v1031_v28 = vld [vmem:[#allocation10 + $0x8] sm:$0xff]  ;;  %v1032_v30 = vld [vmem:[#allocation10 + $0x10] sm:$0xff]  ;;  %vm4859_vm6 = vcmask 1041408   ;;  %vm4861_vm7 = vcmask 1042432   ;;  %vm4864_vm8 = vcmask 1044480  }
  0xd0   :  { %8255 = vmatpush3.bf16.msra.mxu0 %v8252_v3  ;;  %8529 = vmatpush3.bf16.msra.mxu1 %v8252_v3  ;;  %v8260_v29 = vpack.c.bf16 %v1031_v28, %v1030_v27  ;;  %v1033_v31 = vld [vmem:[#allocation10 + $0x18] sm:$0xff]  ;;  %vm4866_vm9 = vcmask 1045504   ;;  %vm4868_vm10 = vcmask 1046528   ;;  %s9235_s21 = smov [#allocation20]   ;;  %vm7080_vm11 = vcmask 64512  }
  0xd1   :  { %7730 = vmatprep.subr.mxu1 %v9231_v7  ;;  %7745 = vmatprep.subr.mxu0 %v9231_v7  ;;  %v8264_v32 = vpack.c.bf16 %v1033_v31, %v1032_v30  ;;  %v1029_v24 = vld [vmem:[#allocation8 + $0x8] sm:$0xff]  ;;  %v2122_v31 = vld [vmem:[#allocation11 + $0x60] sm:$0xff]  ;;  %s7088_s22 = sshll.u32 %s9235_s21, 4  ;;  %s7089_s22 = int_to_ptr.vmem [resolvable:$true] %s7088_s22 }
  0xd2   :  { %v1820_v28 = vld [vmem:[#allocation11 + $0x18] sm:$0xff]  ;;  %s9180_s19 = scalar_lea.vmem %s7089_s22, 128  ;;  %p9185_p5 = scmp.lt.s32.totalorder %s7089_s22, %s7089_s22 }
  0xd3   :  { %7725 = vmatmul.mubr.msk.f32.vlgmr.msra.gmra.mrb[0].mxu0 %vm215_vm0, %v9516_v5  ;;  %7728 = vmatmul.mubr.msk.f32.vlgmr.msra.gmra.mrb[0].mxu1 %vm215_vm0, %v9520_v6  ;;  %v9535_v8 = vld [vmem:[%s10557_s27 + $0x8] sm:$0xff]  ;;  %v9540_v10 = vld [vmem:[%s10557_s27] sm:$0xff]  ;;  %v9551_v19 = vld [vmem:[%s10557_s27 + $0x10] sm:$0xff]  ;;  %p9181_p4 = scmp.ne.s32.totalorder %s7089_s22, %s9180_s19  ;;  %p9186_p6 = scmp.lt.s32.totalorder %s9180_s19, %s9180_s19 }
  0xd4   :  { %7732 = vmatprep.mubr.msk.f32.mxu1 %vm9232_vm1, %v9231_v7  ;;  %7747 = vmatprep.mubr.msk.f32.mxu0 %vm9232_vm1, %v9231_v7  ;;  %v543_v16 = vrot.slane %v9535_v8, 4  ;;  %v391_v17 = vrot.slane %v9540_v10, 4  ;;  %v695_v20 = vrot.slane %v9551_v19, 4  ;;  %v9570_v22 = vld [vmem:[%s10557_s27 + $0x18] sm:$0xff] }
  0xd5   :  { %v847_v23 = vrot.slane %v9570_v22, 4  ;;  %p9187_p7 = por %p9186_p6, %p9185_p5 }
  0xd7   :  { %p9188_p8 = pnand %p9187_p7, %p9181_p4 }
 0x1a6   :  { %v7726_v9 = vpop.f32.mrb[0].mxu0  ;;  %v7729_v11 = vpop.f32.mrb[0].mxu1 }
 0x1a7   :  { %v544_v12 = vrot.slane %v7726_v9, 4  ;;  %v294_v13 = vpop.f32.mrb[1].mxu0  ;;  %v304_v14 = vpop.f32.mrb[1].mxu1  ;;  %v848_v21 = vrot.slane %v7729_v11, 4 }
 0x1a8   :  { %v392_v15 = vrot.slane %v294_v13, 4  ;;  %7731 = vmatpush3.msk.msra.mxu1 %vm317_vm2, %v294_v13  ;;  %v696_v18 = vrot.slane %v304_v14, 4 }
 0x1a9   :  { %7733 = vmatmul.mubr.msk.f32.vlgmr.msra.gmra.mrb[2].mxu1 %vm313_vm3, %v9540_v10  ;;  %7735 = vmatprep.subr.mxu1 %v9231_v7 }
 0x1aa   :  { %7746 = vmatpush3.msk.msra.mxu0 %vm317_vm2, %v544_v12  ;;  %7736 = vmatpush3.msk.msra.mxu1 %vm317_vm2, %v392_v15 }
 0x1ab   :  { %7737 = vmatprep.mubr.msk.f32.mxu1 %vm9232_vm1, %v9231_v7  ;;  %7740 = vmatprep.subr.mxu1 %v9231_v7 }
 0x1ac   :  { %7748 = vmatmul.mubr.msk.f32.vlgmr.msra.gmra.mrb[2].mxu0 %vm313_vm3, %v543_v16  ;;  %7755 = vmatprep.subr.mxu0 %v9231_v7 }
 0x1ad   :  { %7738 = vmatmul.mubr.msk.f32.vlgmr.msra.gmra.mrb[4].mxu1 %vm313_vm3, %v391_v17  ;;  %7756 = vmatpush3.msk.msra.mxu0 %vm317_vm2, %v696_v18 }
 0x1ae   :  { %7741 = vmatpush3.msk.msra.mxu1 %vm317_vm2, %v7726_v9  ;;  %7742 = vmatprep.mubr.msk.f32.mxu1 %vm9232_vm1, %v9231_v7 }
 0x1af   :  { %7750 = vmatprep.subr.mxu1 %v9231_v7  ;;  %7757 = vmatprep.mubr.msk.f32.mxu0 %vm9232_vm1, %v9231_v7 }
 0x1b0   :  { %7758 = vmatmul.mubr.msk.f32.vlgmr.msra.gmra.mrb[4].mxu0 %vm313_vm3, %v695_v20  ;;  %7765 = vmatprep.subr.mxu0 %v9231_v7 }
 0x1b1   :  { %7743 = vmatmul.mubr.msk.f32.vlgmr.msra.gmra.mrb[6].mxu1 %vm313_vm3, %v9535_v8  ;;  %7766 = vmatpush3.msk.msra.mxu0 %vm317_vm2, %v848_v21  ;;  %v1028_v21 = vld [vmem:[#allocation8] sm:$0xff] }
 0x1b2   :  { %7751 = vmatpush3.msk.msra.mxu1 %vm317_vm2, %v304_v14  ;;  %7752 = vmatprep.mubr.msk.f32.mxu1 %vm9232_vm1, %v9231_v7 }
 0x1b3   :  { %7760 = vmatprep.subr.mxu1 %v9231_v7  ;;  %7767 = vmatprep.mubr.msk.f32.mxu0 %vm9232_vm1, %v9231_v7 }
 0x1b4   :  { %7768 = vmatmul.mubr.msk.f32.vlgmr.msra.gmra.mrb[6].mxu0 %vm313_vm3, %v847_v23  ;;  %7804 = vmatprep.subr.mxu0 %v9231_v7 }
 0x1b5   :  { %7753 = vmatmul.mubr.msk.f32.vlgmr.msra.gmra.mrb[8].mxu1 %vm313_vm3, %v9551_v19  ;;  %7806 = vmatprep.mubr.msk.f32.mxu0 %vm9232_vm1, %v9231_v7 }
 0x1b6   :  { %7761 = vmatpush3.msk.msra.mxu1 %vm317_vm2, %v7729_v11  ;;  %7762 = vmatprep.mubr.msk.f32.mxu1 %vm9232_vm1, %v9231_v7 }
 0x1b7   :  { %8257 = vmatprep.subr.bf16.mxu1 %v8256_v26 }
 0x1b9   :  { %7763 = vmatmul.mubr.msk.f32.vlgmr.msra.gmra.mrb[10].mxu1 %vm313_vm3, %v9570_v22 }
 0x1ba   :  { %8259 = vmatpush3.bf16.msra.mxu1 %v8256_v26  ;;  %7774 = vmatprep.mubr.msk.f32.mxu1 %vm215_vm0, %v9510_v2  ;;  %v8268_v26 = vpack.c.bf16 %v1029_v24, %v1028_v21  ;;  %v2220_v21 = vld [vmem:[#allocation13 + $0x8] sm:$0xff]  ;;  %v2224_v24 = vld [vmem:[#allocation13 + $0x20] sm:$0xff] }
 0x1bb   :  { %8261 = vmatprep.subr.bf16.mxu1 %v8260_v29 }
 0x1bd   :  { %7775 = vmatmul.mubr.msk.f32.vlgmr.msra.gmra.mrb[12].mxu1 %vm215_vm0, %v9516_v5 }
 0x1be   :  { %7777 = vmatprep.mubr.msk.f32.mxu1 %vm215_vm0, %v9514_v4  ;;  %8263 = vmatpush3.bf16.msra.mxu1 %v8260_v29  ;;  %v1928_v29 = vld [vmem:[#allocation11 + $0x30] sm:$0xff] }
 0x1bf   :  { %8265 = vmatprep.subr.bf16.mxu1 %v8264_v32 }
 0x1c1   :  { %7778 = vmatmul.mubr.msk.f32.gmra.mrb[14].mxu1 %vm215_vm0, %v9520_v6 }
 0x1c2   :  { %8267 = vmatpush3.bf16.msra.mxu1 %v8264_v32 }
 0x1c3   :  { %7794 = vmatprep.subr.mxu1 %v9231_v7 }
 0x27c   :  { %v387_v33 = vpop.f32.mrb[2].mxu1 }
 0x27d   :  { %v7734_v34 = vpop.f32.mrb[3].mxu1 }
 0x27f   :  { %v615_v35 = vpop.f32.mrb[2].mxu0 }
 0x280   :  { %v463_v36 = vpop.f32.mrb[4].mxu1  ;;  %v7749_v37 = vpop.f32.mrb[3].mxu0  ;;  %v927_v40 = vrot.slane %v615_v35, 4 }
 0x281   :  { %v924_v38 = vrot.slane %v463_v36, 4  ;;  %v7739_v39 = vpop.f32.mrb[5].mxu1 }
 0x283   :  { %v767_v41 = vpop.f32.mrb[4].mxu0  ;;  %v935_v42 = vsel %vm317_vm2, %v387_v33, %v924_v38  ;;  %v2123_v33 = vld [vmem:[#allocation11 + $0x68] sm:$0xff] }
 0x284   :  { %v539_v43 = vpop.f32.mrb[6].mxu1  ;;  %v7759_v44 = vpop.f32.mrb[5].mxu0  ;;  %v930_v46 = vrot.slane %v767_v41, 4  ;;  %v8296_v34 = vpack.c.bf16 %v2123_v33, %v2122_v31  ;;  %v2232_v31 = vld [vmem:[#allocation13 + $0x58] sm:$0xff] }
 0x285   :  { %v7744_v45 = vpop.f32.mrb[7].mxu1  ;;  %v936_v47 = vsel %vm317_vm2, %v539_v43, %v927_v40  ;;  %v2237_v33 = vld [vmem:[#allocation13 + $0x78] sm:$0xff] }
 0x287   :  { %v919_v48 = vpop.f32.mrb[6].mxu0 }
 0x288   :  { %v691_v49 = vpop.f32.mrb[8].mxu1  ;;  %v7769_v50 = vpop.f32.mrb[7].mxu0  ;;  %v933_v52 = vrot.slane %v919_v48, 4 }
 0x289   :  { %v7754_v51 = vpop.f32.mrb[9].mxu1  ;;  %v937_v53 = vsel %vm317_vm2, %v691_v49, %v930_v46 }
 0x28c   :  { %v843_v54 = vpop.f32.mrb[10].mxu1 }
 0x28d   :  { %v7764_v55 = vpop.f32.mrb[11].mxu1  ;;  %v938_v56 = vsel %vm317_vm2, %v843_v54, %v933_v52  ;;  %v2026_v52 = vld [vmem:[#allocation11 + $0x50] sm:$0xff] }
 0x290   :  { %v7776_v57 = vpop.f32.mrb[12].mxu1 }
 0x291   :  { %v1011_v58 = vadd.f32 %v7776_v57, %v936_v47  ;;  %v1005_v59 = vpop.f32.mrb[13].mxu1  ;;  %v2124_v57 = vld [vmem:[#allocation11 + $0x70] sm:$0xff] }
 0x292   :  { %v1006_v60 = vadd.f32 %v1005_v59, %v935_v42 }
 0x293   :  { %v1025_v63 = vmax.f32 %v1011_v58, 0.0  ;;  %v2125_v58 = vld [vmem:[#allocation11 + $0x78] sm:$0xff] }
 0x294   :  { %v1024_v61 = vmax.f32 %v1006_v60, 0.0  ;;  %v7779_v62 = vpop.f32.mrb[14].mxu1 }
 0x295   :  { %v1021_v0 = vadd.f32 %v7779_v62, %v938_v56  ;;  %v1015_v1 = vpop.f32.mrb[15].mxu1  ;;  %v2027_v56 = vld [vmem:[#allocation11 + $0x58] sm:$0xff] }
 0x296   :  { %v1016_v3 = vadd.f32 %v1015_v1, %v937_v53  ;;  %7788 = vmatprep.mubr.msk.f32.mxu1 %vm1034_vm4, %v1024_v61  ;;  %v8300_v1 = vpack.c.bf16 %v2125_v58, %v2124_v57 }
 0x297   :  { %7789 = vmatmul.mubr.msk.f32.vlgmr.msra.gmra.mrb[16].mxu1 %vm1034_vm4, %v1025_v63  ;;  %v1027_v11 = vmax.f32 %v1021_v0, 0.0  ;;  %v8292_v0 = vpack.c.bf16 %v2027_v56, %v2026_v52  ;;  %v7160_v52 = vld [vmem:[#allocation14 + $0x2] ss:$0 sm:$0xff] }
 0x298   :  { %v1026_v9 = vmax.f32 %v1016_v3, 0.0 }
 0x29a   :  { %7791 = vmatprep.mubr.msk.f32.mxu1 %vm1034_vm4, %v1026_v9 }
 0x29b   :  { %7792 = vmatmul.mubr.msk.f32.gmra.mrb[18].mxu1 %vm1034_vm4, %v1027_v11 }
 0x29c   :  { %7796 = vmatprep.mubr.msk.f32.mxu1 %vm9232_vm1, %v9231_v7 }
 0x36a   :  { %v7790_v12 = vpop.f32.mrb[16].mxu1 }
 0x36b   :  { %v1113_v13 = vpop.f32.mrb[17].mxu1  ;;  %7805 = vmatpush3.msk.msra.mxu0 %vm317_vm2, %v7790_v12  ;;  %v1351_v25 = vrot.slane %v7790_v12, 4 }
 0x36c   :  { %v1205_v14 = vrot.slane %v1113_v13, 4  ;;  %7795 = vmatpush3.msk.msra.mxu1 %vm317_vm2, %v1113_v13  ;;  %7807 = vmatmul.mubr.msk.f32.vlgmr.msra.gmra.mrb[8].mxu0 %vm313_vm3, %v9535_v8  ;;  %v1818_v8 = vld [vmem:[#allocation11 + $0x8] sm:$0xff] }
 0x36d   :  { %7797 = vmatmul.mubr.msk.f32.vlgmr.msra.gmra.mrb[20].mxu1 %vm313_vm3, %v9540_v10  ;;  %7799 = vmatprep.subr.mxu1 %v9231_v7 }
 0x36e   :  { %v7793_v15 = vpop.f32.mrb[18].mxu1  ;;  %7800 = vmatpush3.msk.msra.mxu1 %vm317_vm2, %v1205_v14  ;;  %7814 = vmatprep.subr.mxu0 %v9231_v7 }
 0x36f   :  { %v1123_v18 = vpop.f32.mrb[19].mxu1  ;;  %7801 = vmatprep.mubr.msk.f32.mxu1 %vm9232_vm1, %v9231_v7  ;;  %7809 = vmatprep.subr.mxu1 %v9231_v7  ;;  %v1643_v10 = vrot.slane %v7793_v15, 4 }
 0x370   :  { %7815 = vmatpush3.msk.msra.mxu0 %vm317_vm2, %v1123_v18  ;;  %7816 = vmatprep.mubr.msk.f32.mxu0 %vm9232_vm1, %v9231_v7  ;;  %v1497_v27 = vrot.slane %v1123_v18, 4 }
 0x371   :  { %7802 = vmatmul.mubr.msk.f32.vlgmr.msra.gmra.mrb[22].mxu1 %vm313_vm3, %v391_v17  ;;  %7817 = vmatmul.mubr.msk.f32.vlgmr.msra.gmra.mrb[10].mxu0 %vm313_vm3, %v9551_v19  ;;  %v1927_v19 = vld [vmem:[#allocation11 + $0x28] sm:$0xff] }
 0x372   :  { %7810 = vmatpush3.msk.msra.mxu1 %vm317_vm2, %v1351_v25  ;;  %7824 = vmatprep.subr.mxu0 %v9231_v7  ;;  %v2225_v25 = vld [vmem:[#allocation13 + $0x28] sm:$0xff] }
 0x373   :  { %7825 = vmatpush3.msk.msra.mxu0 %vm317_vm2, %v7793_v15  ;;  %7811 = vmatprep.mubr.msk.f32.mxu1 %vm9232_vm1, %v9231_v7  ;;  %v2219_v15 = vld [vmem:[#allocation13] sm:$0xff] }
 0x374   :  { %7819 = vmatprep.subr.mxu1 %v9231_v7  ;;  %7826 = vmatprep.mubr.msk.f32.mxu0 %vm9232_vm1, %v9231_v7 }
 0x375   :  { %7812 = vmatmul.mubr.msk.f32.vlgmr.msra.gmra.mrb[24].mxu1 %vm313_vm3, %v543_v16  ;;  %7827 = vmatmul.mubr.msk.f32.vlgmr.msra.gmra.mrb[12].mxu0 %vm313_vm3, %v9570_v22  ;;  %v1926_v16 = vld [vmem:[#allocation11 + $0x20] sm:$0xff]  ;;  %v1929_v22 = vld [vmem:[#allocation11 + $0x38] sm:$0xff] }
 0x376   :  { %7820 = vmatpush3.msk.msra.mxu1 %vm317_vm2, %v1497_v27  ;;  %8269 = vmatprep.subr.bf16.mxu0 %v8268_v26  ;;  %v8284_v30 = vpack.c.bf16 %v1929_v22, %v1928_v29  ;;  %v9692_v27 = vpack.c.bf16 %v2225_v25, %v2224_v24  ;;  %v2234_v29 = vld [vmem:[#allocation13 + $0x60] sm:$0xff]  ;;  %v2238_v22 = vld [vmem:[%s10543_s9] sm:$0xf] }
 0x377   :  { %8271 = vmatpush3.bf16.msra.mxu0 %v8268_v26  ;;  %7821 = vmatprep.mubr.msk.f32.mxu1 %vm9232_vm1, %v9231_v7  ;;  %v9690_v26 = vpack.c.bf16 %v2220_v21, %v2219_v15 }
 0x378   :  { %7829 = vmatprep.subr.mxu1 %v9231_v7  ;;  %7838 = vmatprep.mubr.msk.f32.mxu0 %vm215_vm0, %v9510_v2  ;;  %v1817_v2 = vld [vmem:[#allocation11] sm:$0xff] }
 0x379   :  { %7822 = vmatmul.mubr.msk.f32.vlgmr.msra.gmra.mrb[26].mxu1 %vm313_vm3, %v695_v20  ;;  %v8272_v17 = vpack.c.bf16 %v1818_v8, %v1817_v2  ;;  %v8280_v20 = vpack.c.bf16 %v1927_v19, %v1926_v16  ;;  %v2222_v2 = vld [vmem:[#allocation13 + $0x18] sm:$0xff]  ;;  %v2226_v8 = vld [vmem:[#allocation13 + $0x30] sm:$0xff] }
 0x37a   :  { %7830 = vmatpush3.msk.msra.mxu1 %vm317_vm2, %v1643_v10  ;;  %7839 = vmatmul.mubr.msk.f32.vlgmr.msra.gmra.mrb[14].mxu0 %vm215_vm0, %v9516_v5  ;;  %v1819_v5 = vld [vmem:[#allocation11 + $0x10] sm:$0xff]  ;;  %v2227_v16 = vld [vmem:[#allocation13 + $0x38] sm:$0xff] }
 0x37b   :  { %7831 = vmatprep.mubr.msk.f32.mxu1 %vm9232_vm1, %v9231_v7  ;;  %7841 = vmatprep.mubr.msk.f32.mxu0 %vm215_vm0, %v9514_v4  ;;  %v8276_v4 = vpack.c.bf16 %v1820_v28, %v1819_v5  ;;  %v2221_v10 = vld [vmem:[#allocation13 + $0x10] sm:$0xff]  ;;  %v2229_v5 = vld [vmem:[#allocation13 + $0x40] sm:$0xff]  ;;  %v2230_v28 = vld [vmem:[#allocation13 + $0x48] sm:$0xff] }
 0x37c   :  { %8273 = vmatprep.subr.bf16.mxu1 %v8272_v17  ;;  %8281 = vmatprep.subr.bf16.mxu0 %v8280_v20  ;;  %v9702_v19 = vpack.c.bf16 %v2222_v2, %v2221_v10 }
 0x37d   :  { %7832 = vmatmul.mubr.msk.f32.vlgmr.msra.gmra.mrb[28].mxu1 %vm313_vm3, %v847_v23  ;;  %8283 = vmatpush3.bf16.msra.mxu0 %v8280_v20  ;;  %v2025_v23 = vld [vmem:[#allocation11 + $0x48] sm:$0xff]  ;;  %v9704_v20 = vpack.c.bf16 %v2227_v16, %v2226_v8 }
 0x37e   :  { %7842 = vmatmul.mubr.msk.f32.gmra.mrb[16].mxu0 %vm215_vm0, %v9520_v6  ;;  %8275 = vmatpush3.bf16.msra.mxu1 %v8272_v17  ;;  %v2024_v6 = vld [vmem:[#allocation11 + $0x40] sm:$0xff]  ;;  %v9233_v17 = vmov 0.0|0.0  }
 0x37f   :  { %8277 = vmatprep.subr.bf16.mxu1 %v8276_v4  ;;  %8285 = vmatprep.subr.bf16.mxu0 %v8284_v30  ;;  %v8288_v32 = vpack.c.bf16 %v2025_v23, %v2024_v6  ;;  %v2231_v23 = vld [vmem:[#allocation13 + $0x50] sm:$0xff] }
 0x381   :  { %8287 = vmatpush3.bf16.msra.mxu0 %v8284_v30  ;;  %v9717_v30 = vpack.c.bf16 %v2230_v28, %v2229_v5 }
 0x382   :  { %8279 = vmatpush3.bf16.msra.mxu1 %v8276_v4  ;;  %8297 = vmatprep.subr.bf16.mxu0 %v8296_v34  ;;  %v2235_v4 = vld [vmem:[#allocation13 + $0x68] sm:$0xff] }
 0x383   :  { %8289 = vmatprep.subr.bf16.mxu1 %v8288_v32  ;;  %v9719_v6 = vpack.c.bf16 %v2235_v4, %v2234_v29 }
 0x43f   :  { %v1347_v35 = vpop.f32.mrb[8].mxu0 }
 0x440   :  { %v1201_v36 = vpop.f32.mrb[20].mxu1  ;;  %v7808_v37 = vpop.f32.mrb[9].mxu0 }
 0x441   :  { %v7798_v38 = vpop.f32.mrb[21].mxu1  ;;  %v7155_v37 = vld [vmem:[#allocation14 + $0x1] ss:$0 sm:$0xff] }
 0x444   :  { %v1274_v39 = vpop.f32.mrb[22].mxu1  ;;  %v1493_v40 = vpop.f32.mrb[10].mxu0 }
 0x445   :  { %v1717_v41 = vrot.slane %v1274_v39, 4  ;;  %v7803_v42 = vpop.f32.mrb[23].mxu1  ;;  %v7818_v43 = vpop.f32.mrb[11].mxu0 }
 0x447   :  { %v1728_v44 = vsel %vm317_vm2, %v1201_v36, %v1717_v41  ;;  %v7150_v36 = vld [vmem:[#allocation14] ss:$0 sm:$0xff] }
 0x448   :  { %v1420_v45 = vpop.f32.mrb[24].mxu1  ;;  %v1639_v46 = vpop.f32.mrb[12].mxu0 }
 0x449   :  { %v1720_v47 = vrot.slane %v1420_v45, 4  ;;  %v7813_v48 = vpop.f32.mrb[25].mxu1  ;;  %v7828_v49 = vpop.f32.mrb[13].mxu0 }
 0x44b   :  { %v1729_v50 = vsel %vm317_vm2, %v1347_v35, %v1720_v47 }
 0x44c   :  { %v1566_v51 = vpop.f32.mrb[26].mxu1 }
 0x44d   :  { %v1723_v53 = vrot.slane %v1566_v51, 4  ;;  %v7840_v54 = vpop.f32.mrb[14].mxu0  ;;  %v7823_v55 = vpop.f32.mrb[27].mxu1 }
 0x44e   :  { %v1804_v59 = vadd.f32 %v7840_v54, %v1729_v50  ;;  %v1798_v60 = vpop.f32.mrb[15].mxu0 }
 0x44f   :  { %v1799_v61 = vadd.f32 %v1798_v60, %v1728_v44  ;;  %v1730_v62 = vsel %vm317_vm2, %v1493_v40, %v1723_v53  ;;  %v7165_v53 = vld [vmem:[#allocation14 + $0x3] ss:$0 sm:$0xff] }
 0x450   :  { %v1712_v63 = vpop.f32.mrb[28].mxu1 }
 0x451   :  { %v1726_v3 = vrot.slane %v1712_v63, 4  ;;  %v7843_v9 = vpop.f32.mrb[16].mxu0  ;;  %7852 = vmatprep.mubr.msk.f32.mxu1 %vm1034_vm4, %v1799_v61  ;;  %7866 = vmatprep.mubr.msk.f32.mxu0 %vm1034_vm4, %v1799_v61  ;;  %v7833_v11 = vpop.f32.mrb[29].mxu1 }
 0x452   :  { %v1808_v12 = vpop.f32.mrb[17].mxu0  ;;  %7853 = vmatmul.mubr.msk.f32.vlgmr.msra.gmra.mrb[30].mxu1 %vm1034_vm4, %v1804_v59  ;;  %7867 = vmatmul.mubr.msk.f32.vlgmr.msra.gmra.mrb[18].mxu0 %vm1034_vm4, %v1804_v59 }
 0x453   :  { %v1731_v13 = vsel %vm317_vm2, %v1639_v46, %v1726_v3  ;;  %v1809_v14 = vadd.f32 %v1808_v12, %v1730_v62  ;;  %8291 = vmatpush3.bf16.msra.mxu1 %v8288_v32  ;;  %8299 = vmatpush3.bf16.msra.mxu0 %v8296_v34  ;;  %v2236_v32 = vld [vmem:[#allocation13 + $0x70] sm:$0xff]  ;;  %v9731_v34 = vpack.c.bf16 %v2232_v31, %v2231_v23 }
 0x454   :  { %v1814_v18 = vadd.f32 %v7843_v9, %v1731_v13  ;;  %8293 = vmatprep.subr.bf16.mxu1 %v8292_v0  ;;  %8301 = vmatprep.subr.bf16.mxu0 %v8300_v1  ;;  %v9733_v35 = vpack.c.bf16 %v2237_v33, %v2236_v32 }
 0x455   :  { %7855 = vmatprep.mubr.msk.f32.mxu1 %vm1034_vm4, %v1809_v14  ;;  %7869 = vmatprep.mubr.msk.f32.mxu0 %vm1034_vm4, %v1809_v14 }
 0x456   :  { %7856 = vmatmul.mubr.msk.f32.gmra.mrb[32].mxu1 %vm1034_vm4, %v1814_v18  ;;  %7870 = vmatmul.mubr.msk.f32.gmra.mrb[20].mxu0 %vm1034_vm4, %v1814_v18 }
 0x457   :  { %8295 = vmatpush3.bf16.msra.mxu1 %v8292_v0  ;;  %8303 = vmatpush3.bf16.msra.mxu0 %v8300_v1 }
 0x458   :  { %7880 = vmatprep.mubr.msk.f32.mxu1 %vm1034_vm4, %v1799_v61  ;;  %7894 = vmatprep.mubr.msk.f32.mxu0 %vm1034_vm4, %v1799_v61 }
 0x459   :  { %8304 = vmatprep.subr.bf16.mxu1 %v9233_v17  ;;  %8310 = vmatprep.subr.bf16.mxu0 %v9233_v17 }
 0x45a   :  { %7881 = vmatmul.mubr.msk.f32.vlgmr.msra.gmra.mrb[34].mxu1 %vm1034_vm4, %v1804_v59  ;;  %7895 = vmatmul.mubr.msk.f32.vlgmr.msra.gmra.mrb[22].mxu0 %vm1034_vm4, %v1804_v59 }
 0x45b   :  { %8306 = vmatpush3.bf16.msra.mxu1 %v9690_v26  ;;  %8312 = vmatpush3.bf16.msra.mxu0 %v9692_v27 }
 0x45c   :  { %7883 = vmatprep.mubr.msk.f32.mxu1 %vm1034_vm4, %v1809_v14  ;;  %7897 = vmatprep.mubr.msk.f32.mxu0 %vm1034_vm4, %v1809_v14 }
 0x45d   :  { %8307 = vmatprep.subr.bf16.mxu1 %v9233_v17  ;;  %8313 = vmatprep.subr.bf16.mxu0 %v9233_v17 }
 0x45e   :  { %7884 = vmatmul.mubr.msk.f32.gmra.mrb[36].mxu1 %vm1034_vm4, %v1814_v18  ;;  %7898 = vmatmul.mubr.msk.f32.gmra.mrb[24].mxu0 %vm1034_vm4, %v1814_v18 }
 0x45f   :  { %8309 = vmatpush3.bf16.msra.mxu1 %v9702_v19  ;;  %8315 = vmatpush3.bf16.msra.mxu0 %v9704_v20 }
 0x460   :  { %7908 = vmatprep.mubr.msk.f32.mxu1 %vm9232_vm1, %v9231_v7  ;;  %7919 = vmatprep.mubr.msk.f32.mxu0 %vm9232_vm1, %v9231_v7 }
 0x461   :  { %8316 = vmatprep.subr.bf16.mxu1 %v9233_v17  ;;  %8322 = vmatprep.subr.bf16.mxu0 %v9233_v17 }
 0x462   :  { %7909 = vmatmul.mubr.msk.f32.vlgmr.msra.gmra.mrb[38].mxu1 %vm1034_vm4, %v2238_v22  ;;  %7920 = vmatmul.mubr.msk.f32.vlgmr.msra.gmra.mrb[26].mxu0 %vm1034_vm4, %v2238_v22 }
 0x463   :  { %8318 = vmatpush3.bf16.msra.mxu1 %v9717_v30  ;;  %8324 = vmatpush3.bf16.msra.mxu0 %v9719_v6 }
 0x464   :  { %8319 = vmatprep.subr.bf16.mxu1 %v9233_v17  ;;  %8325 = vmatprep.subr.bf16.mxu0 %v9233_v17 }
 0x465   :  { %7930 = vmatprep.mubr.msk.f32.mxu1 %vm9232_vm1, %v9231_v7  ;;  %7941 = vmatprep.mubr.msk.f32.mxu0 %vm9232_vm1, %v9231_v7 }
 0x467   :  { %8321 = vmatpush3.bf16.msra.mxu1 %v9731_v34  ;;  %8327 = vmatpush3.bf16.msra.mxu0 %v9733_v35 }
 0x468   :  { %8328 = vmatprep.subr.bf16.mxu1 %v9233_v17  ;;  %8334 = vmatprep.subr.bf16.mxu0 %v9233_v17 }
 0x46a   :  { %7931 = vmatmul.mubr.msk.f32.vlgmr.msra.gmra.mrb[40].mxu1 %vm1034_vm4, %v2238_v22  ;;  %7942 = vmatmul.mubr.msk.f32.vlgmr.msra.gmra.mrb[28].mxu0 %vm1034_vm4, %v2238_v22 }
 0x46b   :  { %8330 = vmatpush3.bf16.msra.mxu1 %v9690_v26  ;;  %8336 = vmatpush3.bf16.msra.mxu0 %v9692_v27 }
 0x46c   :  { %8331 = vmatprep.subr.bf16.mxu1 %v9233_v17  ;;  %8337 = vmatprep.subr.bf16.mxu0 %v9233_v17 }
 0x46d   :  { %7952 = vmatprep.mubr.msk.f32.mxu1 %vm9232_vm1, %v9231_v7  ;;  %7963 = vmatprep.mubr.msk.f32.mxu0 %vm9232_vm1, %v9231_v7 }
 0x46f   :  { %8333 = vmatpush3.bf16.msra.mxu1 %v9702_v19  ;;  %8339 = vmatpush3.bf16.msra.mxu0 %v9704_v20 }
 0x470   :  { %8340 = vmatprep.subr.bf16.mxu1 %v9233_v17  ;;  %8346 = vmatprep.subr.bf16.mxu0 %v9233_v17 }
 0x525   :  { %v7854_v38 = vpop.f32.mrb[30].mxu1  ;;  %v7868_v39 = vpop.f32.mrb[18].mxu0 }
 0x526   :  { %v9759_v40 = vadd.f32 %v7854_v38, %v7150_v36  ;;  %v9761_v41 = vadd.f32 %v7868_v39, %v7155_v37  ;;  %v1906_v42 = vpop.f32.mrb[31].mxu1  ;;  %v2004_v43 = vpop.f32.mrb[19].mxu0  ;;  %v2239_v39 = vld [vmem:[%s10544_s10] sm:$0xf] }
 0x527   :  { %v9783_v11 = vadd.f32 %v7150_v36, %v1906_v42  ;;  %v9785_v12 = vadd.f32 %v7155_v37, %v2004_v43 }
 0x529   :  { %v7857_v44 = vpop.f32.mrb[32].mxu1  ;;  %v7871_v45 = vpop.f32.mrb[20].mxu0 }
 0x52a   :  { %v9763_v46 = vadd.f32 %v7857_v44, %v7150_v36  ;;  %v9765_v47 = vadd.f32 %v7871_v45, %v7155_v37  ;;  %v1916_v48 = vpop.f32.mrb[33].mxu1  ;;  %v2014_v49 = vpop.f32.mrb[21].mxu0 }
 0x52b   :  { %v9767_v50 = vadd.f32 %v7150_v36, %v1916_v48  ;;  %v9769_v51 = vadd.f32 %v7155_v37, %v2014_v49 }
 0x52d   :  { %v7882_v54 = vpop.f32.mrb[34].mxu1  ;;  %v7896_v55 = vpop.f32.mrb[22].mxu0 }
 0x52e   :  { %v9771_v56 = vadd.f32 %v7882_v54, %v7160_v52  ;;  %v9773_v57 = vadd.f32 %v7896_v55, %v7165_v53  ;;  %v2102_v58 = vpop.f32.mrb[35].mxu1  ;;  %v2200_v59 = vpop.f32.mrb[23].mxu0 }
 0x52f   :  { %v9789_v2 = vadd.f32 %v7165_v53, %v2200_v59  ;;  %v9792_v4 = vadd.f32 %v7160_v52, %v2102_v58 }
 0x531   :  { %v7885_v60 = vpop.f32.mrb[36].mxu1  ;;  %v7899_v61 = vpop.f32.mrb[24].mxu0 }
 0x532   :  { %v9775_v62 = vadd.f32 %v7885_v60, %v7160_v52  ;;  %v9777_v63 = vadd.f32 %v7899_v61, %v7165_v53  ;;  %v2112_v0 = vpop.f32.mrb[37].mxu1  ;;  %v2210_v1 = vpop.f32.mrb[25].mxu0 }
 0x533   :  { %v9779_v3 = vadd.f32 %v7160_v52, %v2112_v0  ;;  %v9781_v9 = vadd.f32 %v7165_v53, %v2210_v1 }
 0x535   :  { %v2309_v13 = vpop.f32.mrb[38].mxu1  ;;  %v2379_v14 = vpop.f32.mrb[26].mxu0 }
 0x536   :  { %v2523_v15 = vadd.f32 %v2309_v13, %v9783_v11  ;;  %v2530_v18 = vadd.f32 %v2379_v14, %v9785_v12  ;;  %v7910_v21 = vpop.f32.mrb[39].mxu1  ;;  %v7921_v24 = vpop.f32.mrb[27].mxu0 }
 0x538   :  { %v7174_v25 = vmul.f32 -1.442695, %v2523_v15  ;;  %v7175_v10 = vmul.f32 -1.442695, %v2530_v18 }
 0x53a   :  { %8810 = vpow2.f32 %v7174_v25 }
 0x53b   :  { %8812 = vpow2.f32 %v7175_v10 }
 0x53d   :  { %v2449_v8 = vpop.f32.mrb[40].mxu1  ;;  %v2519_v16 = vpop.f32.mrb[28].mxu0 }
 0x53e   :  { %v2539_v5 = vadd.f32 %v2519_v16, %v9789_v2  ;;  %v7932_v28 = vpop.f32.mrb[41].mxu1  ;;  %v7943_v29 = vpop.f32.mrb[29].mxu0  ;;  %v2537_v23 = vadd.f32 %v2449_v8, %v9792_v4 }
 0x540   :  { %v7176_v22 = vmul.f32 -1.442695, %v2539_v5 }
 0x542   :  { %8814 = vpow2.f32 %v7176_v22 }
 0x543   :  { %8816 = vtanh.f32 %v2537_v23 }
 0x544   :  { %v8811_v31 = vpop.eup %8810 }
 0x545   :  { %v8813_v32 = vpop.eup %8812  ;;  %v2527_v33 = vadd.f32 1.0, %v8811_v31 }
 0x546   :  { %v2534_v36 = vadd.f32 1.0, %v8813_v32 }
 0x547   :  { %8818 = vrcp.f32 %v2527_v33 }
 0x548   :  { %8820 = vrcp.f32 %v2534_v36 }
 0x54c   :  { %v8815_v37 = vpop.eup %8814 }
 0x54d   :  { %v8817_v38 = vpop.eup %8816  ;;  %v2543_v45 = vadd.f32 1.0, %v8815_v37 }
 0x54f   :  { %8822 = vrcp.f32 %v2543_v45 }
 0x551   :  { %v8819_v42 = vpop.eup %8818 }
 0x552   :  { %v8821_v43 = vpop.eup %8820  ;;  %v2547_v44 = vmul.f32 %v8819_v42, %v8817_v38 }
 0x553   :  { %v2546_v48 = vmul.f32 %v8821_v43, %v2239_v39 }
 0x555   :  { %v9798_v49 = vadd.f32 %v2547_v44, %v2546_v48 }
 0x557   :  { %8824 = vtanh.f32 %v9798_v49  ;;  %v2870_v33 = vrot.slane %v9798_v49, 4 }
 0x559   :  { %v8823_v52 = vpop.eup %8822 }
 0x561   :  { %v8825_v53 = vpop.eup %8824 }
 0x562   :  { %v9801_v54 = vmul.f32 %v8825_v53, %v8823_v52 }
 0x564   :  { %7953 = vmatmul.mubr.msk.f32.vlgmr.msra.gmra.mrb[42].mxu1 %vm1034_vm4, %v9801_v54  ;;  %7964 = vmatmul.mubr.msk.f32.vlgmr.msra.gmra.mrb[30].mxu0 %vm1034_vm4, %v9801_v54 }
 0x565   :  { %8342 = vmatpush3.bf16.msra.mxu1 %v9717_v30  ;;  %8348 = vmatpush3.bf16.msra.mxu0 %v9719_v6 }
 0x566   :  { %8343 = vmatprep.subr.bf16.mxu1 %v9233_v17  ;;  %8349 = vmatprep.subr.bf16.mxu0 %v9233_v17 }
 0x567   :  { %7974 = vmatprep.mubr.msk.f32.mxu1 %vm9232_vm1, %v9231_v7  ;;  %7985 = vmatprep.mubr.msk.f32.mxu0 %vm9232_vm1, %v9231_v7 }
 0x569   :  { %8345 = vmatpush3.bf16.msra.mxu1 %v9731_v34  ;;  %8351 = vmatpush3.bf16.msra.mxu0 %v9733_v35 }
 0x56a   :  { %8352 = vmatprep.subr.bf16.mxu1 %v9233_v17  ;;  %8358 = vmatprep.subr.bf16.mxu0 %v9233_v17 }
 0x56c   :  { %7975 = vmatmul.mubr.msk.f32.vlgmr.msra.gmra.mrb[44].mxu1 %vm1034_vm4, %v9801_v54  ;;  %7986 = vmatmul.mubr.msk.f32.vlgmr.msra.gmra.mrb[32].mxu0 %vm1034_vm4, %v9801_v54 }
 0x56d   :  { %8354 = vmatpush3.bf16.msra.mxu1 %v9690_v26  ;;  %8360 = vmatpush3.bf16.msra.mxu0 %v9692_v27 }
 0x56e   :  { %8355 = vmatprep.subr.bf16.mxu1 %v9233_v17  ;;  %8361 = vmatprep.subr.bf16.mxu0 %v9233_v17 }
 0x56f   :  { %7996 = vmatprep.mubr.msk.f32.mxu1 %vm9232_vm1, %v9231_v7  ;;  %8007 = vmatprep.mubr.msk.f32.mxu0 %vm9232_vm1, %v9231_v7 }
 0x571   :  { %8357 = vmatpush3.bf16.msra.mxu1 %v9702_v19  ;;  %8363 = vmatpush3.bf16.msra.mxu0 %v9704_v20 }
 0x572   :  { %8364 = vmatprep.subr.bf16.mxu1 %v9233_v17  ;;  %8370 = vmatprep.subr.bf16.mxu0 %v9233_v17 }
 0x637   :  { %v2620_v55 = vpop.f32.mrb[42].mxu1  ;;  %v2690_v58 = vpop.f32.mrb[30].mxu0 }
 0x638   :  { %v2835_v59 = vrot.slane %v2620_v55, 4  ;;  %v2845_v60 = vrot.slane %v2690_v58, 4  ;;  %v7954_v61 = vpop.f32.mrb[43].mxu1  ;;  %v7965_v0 = vpop.f32.mrb[31].mxu0 }
 0x63a   :  { %v2837_v1 = vadd.f32 %v2835_v59, %v9783_v11  ;;  %v2847_v13 = vadd.f32 %v2845_v60, %v9785_v12 }
 0x63c   :  { %v7181_v14 = vmul.f32 -1.442695, %v2837_v1  ;;  %v7182_v15 = vmul.f32 -1.442695, %v2847_v13 }
 0x63e   :  { %8826 = vpow2.f32 %v7181_v14 }
 0x63f   :  { %8828 = vpow2.f32 %v7182_v15  ;;  %v2760_v18 = vpop.f32.mrb[44].mxu1  ;;  %v2830_v21 = vpop.f32.mrb[32].mxu0 }
 0x640   :  { %v2860_v24 = vrot.slane %v2830_v21, 4  ;;  %v7976_v25 = vpop.f32.mrb[45].mxu1  ;;  %v7987_v10 = vpop.f32.mrb[33].mxu0  ;;  %v2855_v8 = vrot.slane %v2760_v18, 4 }
 0x642   :  { %v2862_v16 = vadd.f32 %v2860_v24, %v9789_v2  ;;  %v2857_v28 = vadd.f32 %v2855_v8, %v9792_v4 }
 0x644   :  { %v7183_v5 = vmul.f32 -1.442695, %v2862_v16 }
 0x646   :  { %8830 = vpow2.f32 %v7183_v5 }
 0x647   :  { %8832 = vtanh.f32 %v2857_v28 }
 0x648   :  { %v8827_v29 = vpop.eup %8826 }
 0x649   :  { %v8829_v22 = vpop.eup %8828  ;;  %v2841_v11 = vadd.f32 1.0, %v8827_v29 }
 0x64a   :  { %v2851_v12 = vadd.f32 1.0, %v8829_v22 }
 0x64b   :  { %8834 = vrcp.f32 %v2841_v11 }
 0x64c   :  { %8836 = vrcp.f32 %v2851_v12 }
 0x650   :  { %v8831_v23 = vpop.eup %8830 }
 0x651   :  { %v8833_v31 = vpop.eup %8832  ;;  %v2866_v38 = vadd.f32 1.0, %v8831_v23 }
 0x653   :  { %8838 = vrcp.f32 %v2866_v38 }
 0x655   :  { %v8835_v32 = vpop.eup %8834 }
 0x656   :  { %v8837_v36 = vpop.eup %8836  ;;  %v2873_v37 = vmul.f32 %v8835_v32, %v8833_v31 }
 0x657   :  { %v2872_v2 = vmul.f32 %v8837_v36, %v2870_v33 }
 0x659   :  { %v9840_v39 = vadd.f32 %v2873_v37, %v2872_v2  ;;  %v5434_v37 = vrot.slane %v9801_v54, 2  ;;  %v5142_v2 = vrot.slane %v9801_v54, 1 }
 0x65b   :  { %8840 = vtanh.f32 %v9840_v39  ;;  %v3185_v5 = vrot.slane %v9840_v39, 4 }
 0x65d   :  { %v8839_v4 = vpop.eup %8838 }
 0x665   :  { %v8841_v42 = vpop.eup %8840 }
 0x666   :  { %v9843_v43 = vmul.f32 %v8841_v42, %v8839_v4  ;;  %v5727_v4 = vrot.slane %v9801_v54, 3 }
 0x668   :  { %v9846_v44 = vrot.slane %v9843_v43, 4  ;;  %v5436_v23 = vrot.slane %v9843_v43, 5  ;;  %v4842_v33 = vrot.slane %v9843_v43, 3  ;;  %v5729_v36 = vrot.slane %v9843_v43, 6 }
 0x66a   :  { %7997 = vmatmul.mubr.msk.f32.vlgmr.msra.gmra.mrb[46].mxu1 %vm1034_vm4, %v9846_v44  ;;  %8008 = vmatmul.mubr.msk.f32.vlgmr.msra.gmra.mrb[34].mxu0 %vm1034_vm4, %v9846_v44  ;;  %v5448_v39 = vsel %vm4857_vm5, %v5434_v37, %v5436_v23 }
 0x66b   :  { %8366 = vmatpush3.bf16.msra.mxu1 %v9717_v30  ;;  %8372 = vmatpush3.bf16.msra.mxu0 %v9719_v6 }
 0x66c   :  { %8367 = vmatprep.subr.bf16.mxu1 %v9233_v17  ;;  %8373 = vmatprep.subr.bf16.mxu0 %v9233_v17 }
 0x66d   :  { %8018 = vmatprep.mubr.msk.f32.mxu1 %vm9232_vm1, %v9231_v7  ;;  %8029 = vmatprep.mubr.msk.f32.mxu0 %vm9232_vm1, %v9231_v7 }
 0x66f   :  { %8369 = vmatpush3.bf16.msra.mxu1 %v9731_v34  ;;  %8375 = vmatpush3.bf16.msra.mxu0 %v9733_v35 }
 0x670   :  { %8376 = vmatprep.subr.bf16.mxu1 %v9233_v17  ;;  %8382 = vmatprep.subr.bf16.mxu0 %v9233_v17 }
 0x672   :  { %8019 = vmatmul.mubr.msk.f32.vlgmr.msra.gmra.mrb[48].mxu1 %vm1034_vm4, %v9846_v44  ;;  %8030 = vmatmul.mubr.msk.f32.vlgmr.msra.gmra.mrb[36].mxu0 %vm1034_vm4, %v9846_v44 }
 0x673   :  { %8378 = vmatpush3.bf16.msra.mxu1 %v9690_v26  ;;  %8384 = vmatpush3.bf16.msra.mxu0 %v9692_v27 }
 0x674   :  { %8379 = vmatprep.subr.bf16.mxu1 %v9233_v17  ;;  %8385 = vmatprep.subr.bf16.mxu0 %v9233_v17 }
 0x675   :  { %8040 = vmatprep.mubr.msk.f32.mxu1 %vm9232_vm1, %v9231_v7  ;;  %8051 = vmatprep.mubr.msk.f32.mxu0 %vm9232_vm1, %v9231_v7 }
 0x677   :  { %8381 = vmatpush3.bf16.msra.mxu1 %v9702_v19  ;;  %8387 = vmatpush3.bf16.msra.mxu0 %v9704_v20 }
 0x678   :  { %8388 = vmatprep.subr.bf16.mxu1 %v9233_v17  ;;  %8394 = vmatprep.subr.bf16.mxu0 %v9233_v17 }
 0x73d   :  { %v2947_v45 = vpop.f32.mrb[46].mxu1  ;;  %v3017_v48 = vpop.f32.mrb[34].mxu0 }
 0x73e   :  { %v3161_v49 = vadd.f32 %v2947_v45, %v9759_v40  ;;  %v3168_v52 = vadd.f32 %v3017_v48, %v9761_v41  ;;  %v7998_v53 = vpop.f32.mrb[47].mxu1  ;;  %v8009_v55 = vpop.f32.mrb[35].mxu0 }
 0x73f   :  { %v5740_v53 = vsel %vm4857_vm5, %v5727_v4, %v5729_v36 }
 0x740   :  { %v7188_v58 = vmul.f32 -1.442695, %v3161_v49  ;;  %v7189_v59 = vmul.f32 -1.442695, %v3168_v52  ;;  %v5155_v49 = vsel %vm4857_vm5, %v5142_v2, %v9846_v44  ;;  %v4858_v52 = vsel %vm4857_vm5, %v9801_v54, %v4842_v33 }
 0x742   :  { %8842 = vpow2.f32 %v7188_v58 }
 0x743   :  { %8844 = vpow2.f32 %v7189_v59 }
 0x745   :  { %v3087_v60 = vpop.f32.mrb[48].mxu1  ;;  %v3157_v61 = vpop.f32.mrb[36].mxu0 }
 0x746   :  { %v3177_v0 = vadd.f32 %v3157_v61, %v9773_v57  ;;  %v8020_v1 = vpop.f32.mrb[49].mxu1  ;;  %v8031_v13 = vpop.f32.mrb[37].mxu0  ;;  %v3175_v15 = vadd.f32 %v3087_v60, %v9771_v56 }
 0x748   :  { %v7190_v14 = vmul.f32 -1.442695, %v3177_v0 }
 0x74a   :  { %8846 = vpow2.f32 %v7190_v14 }
 0x74b   :  { %8848 = vtanh.f32 %v3175_v15 }
 0x74c   :  { %v8843_v18 = vpop.eup %8842 }
 0x74d   :  { %v8845_v21 = vpop.eup %8844  ;;  %v3165_v24 = vadd.f32 1.0, %v8843_v18 }
 0x74e   :  { %v3172_v25 = vadd.f32 1.0, %v8845_v21 }
 0x74f   :  { %8850 = vrcp.f32 %v3165_v24 }
 0x750   :  { %8852 = vrcp.f32 %v3172_v25 }
 0x754   :  { %v8847_v10 = vpop.eup %8846 }
 0x755   :  { %v8849_v8 = vpop.eup %8848  ;;  %v3181_v22 = vadd.f32 1.0, %v8847_v10 }
 0x757   :  { %8854 = vrcp.f32 %v3181_v22 }
 0x759   :  { %v8851_v16 = vpop.eup %8850 }
 0x75a   :  { %v8853_v28 = vpop.eup %8852  ;;  %v3188_v29 = vmul.f32 %v8851_v16, %v8849_v8 }
 0x75b   :  { %v3187_v11 = vmul.f32 %v8853_v28, %v3185_v5 }
 0x75d   :  { %v9885_v12 = vadd.f32 %v3188_v29, %v3187_v11 }
 0x75f   :  { %8856 = vtanh.f32 %v9885_v12  ;;  %v3511_v33 = vrot.slane %v9885_v12, 4 }
 0x761   :  { %v8855_v31 = vpop.eup %8854 }
 0x769   :  { %v8857_v32 = vpop.eup %8856 }
 0x76a   :  { %v3191_v38 = vmul.f32 %v8857_v32, %v8855_v31 }
 0x76c   :  { %8041 = vmatmul.mubr.msk.f32.vlgmr.msra.gmra.mrb[50].mxu1 %vm1034_vm4, %v3191_v38  ;;  %8052 = vmatmul.mubr.msk.f32.vlgmr.msra.gmra.mrb[38].mxu0 %vm1034_vm4, %v3191_v38  ;;  %v4844_v42 = vrot.slane %v3191_v38, 6  ;;  %v5145_v45 = vrot.slane %v3191_v38, 7  ;;  %v9898_v48 = vsel %vm4859_vm6, %v5448_v39, %v3191_v38  ;;  %v5731_v43 = vrot.slane %v3191_v38, 1 }
 0x76d   :  { %8390 = vmatpush3.bf16.msra.mxu1 %v9717_v30  ;;  %8396 = vmatpush3.bf16.msra.mxu0 %v9719_v6 }
 0x76e   :  { %8391 = vmatprep.subr.bf16.mxu1 %v9233_v17  ;;  %8397 = vmatprep.subr.bf16.mxu0 %v9233_v17  ;;  %v9910_v55 = vsel %vm4859_vm6, %v4858_v52, %v4844_v42  ;;  %v9913_v58 = vsel %vm4859_vm6, %v5155_v49, %v5145_v45  ;;  %v9916_v44 = vsel %vm4859_vm6, %v5740_v53, %v5731_v43 }
 0x76f   :  { %8062 = vmatprep.mubr.msk.f32.mxu1 %vm9232_vm1, %v9231_v7  ;;  %8073 = vmatprep.mubr.msk.f32.mxu0 %vm9232_vm1, %v9231_v7 }
 0x771   :  { %8393 = vmatpush3.bf16.msra.mxu1 %v9731_v34  ;;  %8399 = vmatpush3.bf16.msra.mxu0 %v9733_v35 }
 0x772   :  { %8400 = vmatprep.subr.bf16.mxu1 %v9233_v17  ;;  %8406 = vmatprep.subr.bf16.mxu0 %v9233_v17 }
 0x774   :  { %8063 = vmatmul.mubr.msk.f32.vlgmr.msra.gmra.mrb[52].mxu1 %vm1034_vm4, %v3191_v38  ;;  %8074 = vmatmul.mubr.msk.f32.vlgmr.msra.gmra.mrb[40].mxu0 %vm1034_vm4, %v3191_v38 }
 0x775   :  { %8402 = vmatpush3.bf16.msra.mxu1 %v9690_v26  ;;  %8408 = vmatpush3.bf16.msra.mxu0 %v9692_v27 }
 0x776   :  { %8403 = vmatprep.subr.bf16.mxu1 %v9233_v17  ;;  %8409 = vmatprep.subr.bf16.mxu0 %v9233_v17 }
 0x777   :  { %8084 = vmatprep.mubr.msk.f32.mxu1 %vm9232_vm1, %v9231_v7  ;;  %8095 = vmatprep.mubr.msk.f32.mxu0 %vm9232_vm1, %v9231_v7 }
 0x779   :  { %8405 = vmatpush3.bf16.msra.mxu1 %v9702_v19  ;;  %8411 = vmatpush3.bf16.msra.mxu0 %v9704_v20 }
 0x77a   :  { %8412 = vmatprep.subr.bf16.mxu1 %v9233_v17  ;;  %8418 = vmatprep.subr.bf16.mxu0 %v9233_v17 }
 0x83f   :  { %v3261_v54 = vpop.f32.mrb[50].mxu1  ;;  %v3331_v59 = vpop.f32.mrb[38].mxu0 }
 0x840   :  { %v3476_v60 = vrot.slane %v3261_v54, 4  ;;  %v3486_v61 = vrot.slane %v3331_v59, 4  ;;  %v8042_v0 = vpop.f32.mrb[51].mxu1  ;;  %v8053_v1 = vpop.f32.mrb[39].mxu0 }
 0x842   :  { %v3478_v13 = vadd.f32 %v3476_v60, %v9759_v40  ;;  %v3488_v14 = vadd.f32 %v3486_v61, %v9761_v41 }
 0x844   :  { %v7195_v15 = vmul.f32 -1.442695, %v3478_v13  ;;  %v7196_v18 = vmul.f32 -1.442695, %v3488_v14 }
 0x846   :  { %8858 = vpow2.f32 %v7195_v15 }
 0x847   :  { %8860 = vpow2.f32 %v7196_v18  ;;  %v3401_v21 = vpop.f32.mrb[52].mxu1  ;;  %v3471_v24 = vpop.f32.mrb[40].mxu0 }
 0x848   :  { %v3501_v25 = vrot.slane %v3471_v24, 4  ;;  %v8064_v10 = vpop.f32.mrb[53].mxu1  ;;  %v8075_v8 = vpop.f32.mrb[41].mxu0  ;;  %v3496_v16 = vrot.slane %v3401_v21, 4 }
 0x84a   :  { %v3503_v5 = vadd.f32 %v3501_v25, %v9773_v57  ;;  %v3498_v29 = vadd.f32 %v3496_v16, %v9771_v56 }
 0x84c   :  { %v7197_v28 = vmul.f32 -1.442695, %v3503_v5 }
 0x84e   :  { %8862 = vpow2.f32 %v7197_v28 }
 0x84f   :  { %8864 = vtanh.f32 %v3498_v29 }
 0x850   :  { %v8859_v22 = vpop.eup %8858 }
 0x851   :  { %v8861_v11 = vpop.eup %8860  ;;  %v3482_v40 = vadd.f32 1.0, %v8859_v22 }
 0x852   :  { %v3492_v41 = vadd.f32 1.0, %v8861_v11 }
 0x853   :  { %8866 = vrcp.f32 %v3482_v40 }
 0x854   :  { %8868 = vrcp.f32 %v3492_v41 }
 0x858   :  { %v8863_v23 = vpop.eup %8862 }
 0x859   :  { %v8865_v31 = vpop.eup %8864  ;;  %v3507_v38 = vadd.f32 1.0, %v8863_v23 }
 0x85b   :  { %8870 = vrcp.f32 %v3507_v38 }
 0x85d   :  { %v8867_v32 = vpop.eup %8866 }
 0x85e   :  { %v8869_v36 = vpop.eup %8868  ;;  %v3514_v37 = vmul.f32 %v8867_v32, %v8865_v31 }
 0x85f   :  { %v3513_v57 = vmul.f32 %v8869_v36, %v3511_v33 }
 0x861   :  { %v9945_v2 = vadd.f32 %v3514_v37, %v3513_v57 }
 0x863   :  { %8872 = vtanh.f32 %v9945_v2  ;;  %v3826_v22 = vrot.slane %v9945_v2, 4 }
 0x865   :  { %v8871_v56 = vpop.eup %8870 }
 0x86d   :  { %v8873_v39 = vpop.eup %8872 }
 0x86e   :  { %v3517_v4 = vmul.f32 %v8873_v39, %v8871_v56 }
 0x870   :  { %v3519_v42 = vrot.slane %v3517_v4, 4  ;;  %v4846_v45 = vrot.slane %v3517_v4, 1  ;;  %v5147_v43 = vrot.slane %v3517_v4, 2  ;;  %v5438_v49 = vrot.slane %v3517_v4, 3 }
 0x872   :  { %8085 = vmatmul.mubr.msk.f32.vlgmr.msra.gmra.mrb[54].mxu1 %vm1034_vm4, %v3519_v42  ;;  %8096 = vmatmul.mubr.msk.f32.vlgmr.msra.gmra.mrb[42].mxu0 %vm1034_vm4, %v3519_v42  ;;  %v9951_v12 = vsel %vm4861_vm7, %v9910_v55, %v4846_v45  ;;  %v9954_v52 = vsel %vm4861_vm7, %v9913_v58, %v5147_v43  ;;  %v9957_v53 = vsel %vm4861_vm7, %v9898_v48, %v5438_v49 }
 0x873   :  { %8414 = vmatpush3.bf16.msra.mxu1 %v9717_v30  ;;  %8420 = vmatpush3.bf16.msra.mxu0 %v9719_v6  ;;  %v9962_v54 = vsel %vm4861_vm7, %v9916_v44, %v3519_v42 }
 0x874   :  { %8415 = vmatprep.subr.bf16.mxu1 %v9233_v17  ;;  %8421 = vmatprep.subr.bf16.mxu0 %v9233_v17 }
 0x875   :  { %8106 = vmatprep.mubr.msk.f32.mxu1 %vm9232_vm1, %v9231_v7  ;;  %8117 = vmatprep.mubr.msk.f32.mxu0 %vm9232_vm1, %v9231_v7 }
 0x877   :  { %8417 = vmatpush3.bf16.msra.mxu1 %v9731_v34  ;;  %8423 = vmatpush3.bf16.msra.mxu0 %v9733_v35 }
 0x878   :  { %8424 = vmatprep.subr.bf16.mxu1 %v9233_v17  ;;  %8430 = vmatprep.subr.bf16.mxu0 %v9233_v17 }
 0x87a   :  { %8107 = vmatmul.mubr.msk.f32.vlgmr.msra.gmra.mrb[56].mxu1 %vm1034_vm4, %v3519_v42  ;;  %8118 = vmatmul.mubr.msk.f32.vlgmr.msra.gmra.mrb[44].mxu0 %vm1034_vm4, %v3519_v42 }
 0x87b   :  { %8426 = vmatpush3.bf16.msra.mxu1 %v9690_v26  ;;  %8432 = vmatpush3.bf16.msra.mxu0 %v9692_v27 }
 0x87c   :  { %8427 = vmatprep.subr.bf16.mxu1 %v9233_v17  ;;  %8433 = vmatprep.subr.bf16.mxu0 %v9233_v17 }
 0x87d   :  { %8128 = vmatprep.mubr.msk.f32.mxu1 %vm9232_vm1, %v9231_v7  ;;  %8139 = vmatprep.mubr.msk.f32.mxu0 %vm9232_vm1, %v9231_v7 }
 0x87f   :  { %8429 = vmatpush3.bf16.msra.mxu1 %v9702_v19  ;;  %8435 = vmatpush3.bf16.msra.mxu0 %v9704_v20 }
 0x880   :  { %8436 = vmatprep.subr.bf16.mxu1 %v9233_v17  ;;  %8442 = vmatprep.subr.bf16.mxu0 %v9233_v17 }
 0x945   :  { %v3588_v48 = vpop.f32.mrb[54].mxu1  ;;  %v3658_v55 = vpop.f32.mrb[42].mxu0 }
 0x946   :  { %v3802_v58 = vadd.f32 %v3588_v48, %v9767_v50  ;;  %v3809_v44 = vadd.f32 %v3658_v55, %v9769_v51  ;;  %v8086_v59 = vpop.f32.mrb[55].mxu1  ;;  %v8097_v60 = vpop.f32.mrb[43].mxu0 }
 0x948   :  { %v7202_v61 = vmul.f32 -1.442695, %v3802_v58  ;;  %v7203_v0 = vmul.f32 -1.442695, %v3809_v44 }
 0x94a   :  { %8874 = vpow2.f32 %v7202_v61 }
 0x94b   :  { %8876 = vpow2.f32 %v7203_v0 }
 0x94d   :  { %v3728_v1 = vpop.f32.mrb[56].mxu1  ;;  %v3798_v13 = vpop.f32.mrb[44].mxu0 }
 0x94e   :  { %v3818_v14 = vadd.f32 %v3798_v13, %v9781_v9  ;;  %v8108_v15 = vpop.f32.mrb[57].mxu1  ;;  %v8119_v18 = vpop.f32.mrb[45].mxu0  ;;  %v3816_v24 = vadd.f32 %v3728_v1, %v9779_v3 }
 0x950   :  { %v7204_v21 = vmul.f32 -1.442695, %v3818_v14 }
 0x952   :  { %8878 = vpow2.f32 %v7204_v21 }
 0x953   :  { %8880 = vtanh.f32 %v3816_v24 }
 0x954   :  { %v8875_v25 = vpop.eup %8874 }
 0x955   :  { %v8877_v10 = vpop.eup %8876  ;;  %v3806_v8 = vadd.f32 1.0, %v8875_v25 }
 0x956   :  { %v3813_v16 = vadd.f32 1.0, %v8877_v10 }
 0x957   :  { %8882 = vrcp.f32 %v3806_v8 }
 0x958   :  { %8884 = vrcp.f32 %v3813_v16 }
 0x95c   :  { %v8879_v5 = vpop.eup %8878 }
 0x95d   :  { %v8881_v28 = vpop.eup %8880  ;;  %v3822_v41 = vadd.f32 1.0, %v8879_v5 }
 0x95f   :  { %8886 = vrcp.f32 %v3822_v41 }
 0x961   :  { %v8883_v29 = vpop.eup %8882 }
 0x962   :  { %v8885_v11 = vpop.eup %8884  ;;  %v3829_v40 = vmul.f32 %v8883_v29, %v8881_v28 }
 0x963   :  { %v3828_v23 = vmul.f32 %v8885_v11, %v3826_v22 }
 0x965   :  { %v9993_v31 = vadd.f32 %v3829_v40, %v3828_v23 }
 0x967   :  { %8888 = vtanh.f32 %v9993_v31  ;;  %v4152_v8 = vrot.slane %v9993_v31, 4 }
 0x969   :  { %v8887_v32 = vpop.eup %8886 }
 0x971   :  { %v8889_v33 = vpop.eup %8888 }
 0x972   :  { %v3832_v36 = vmul.f32 %v8889_v33, %v8887_v32 }
 0x974   :  { %8129 = vmatmul.mubr.msk.f32.vlgmr.msra.gmra.mrb[58].mxu1 %vm1034_vm4, %v3832_v36  ;;  %8140 = vmatmul.mubr.msk.f32.vlgmr.msra.gmra.mrb[46].mxu0 %vm1034_vm4, %v3832_v36  ;;  %v4848_v37 = vrot.slane %v3832_v36, 4  ;;  %v5149_v38 = vrot.slane %v3832_v36, 5  ;;  %v5440_v57 = vrot.slane %v3832_v36, 6  ;;  %v5734_v2 = vrot.slane %v3832_v36, 7 }
 0x975   :  { %8438 = vmatpush3.bf16.msra.mxu1 %v9717_v30  ;;  %8444 = vmatpush3.bf16.msra.mxu0 %v9719_v6 }
 0x976   :  { %8439 = vmatprep.subr.bf16.mxu1 %v9233_v17  ;;  %8445 = vmatprep.subr.bf16.mxu0 %v9233_v17  ;;  %v10004_v56 = vsel %vm317_vm2, %v9951_v12, %v4848_v37  ;;  %v10008_v39 = vsel %vm317_vm2, %v9954_v52, %v5149_v38  ;;  %v10012_v4 = vsel %vm317_vm2, %v9957_v53, %v5440_v57 }
 0x977   :  { %8150 = vmatprep.mubr.msk.f32.mxu1 %vm9232_vm1, %v9231_v7  ;;  %8161 = vmatprep.mubr.msk.f32.mxu0 %vm9232_vm1, %v9231_v7  ;;  %v10020_v42 = vsel %vm317_vm2, %v9962_v54, %v5734_v2 }
 0x979   :  { %8441 = vmatpush3.bf16.msra.mxu1 %v9731_v34  ;;  %8447 = vmatpush3.bf16.msra.mxu0 %v9733_v35 }
 0x97a   :  { %8448 = vmatprep.subr.bf16.mxu1 %v9233_v17  ;;  %8454 = vmatprep.subr.bf16.mxu0 %v9233_v17 }
 0x97c   :  { %8151 = vmatmul.mubr.msk.f32.vlgmr.msra.gmra.mrb[60].mxu1 %vm1034_vm4, %v3832_v36  ;;  %8162 = vmatmul.mubr.msk.f32.vlgmr.msra.gmra.mrb[48].mxu0 %vm1034_vm4, %v3832_v36 }
 0x97d   :  { %8450 = vmatpush3.bf16.msra.mxu1 %v9690_v26  ;;  %8456 = vmatpush3.bf16.msra.mxu0 %v9692_v27 }
 0x97e   :  { %8451 = vmatprep.subr.bf16.mxu1 %v9233_v17  ;;  %8457 = vmatprep.subr.bf16.mxu0 %v9233_v17 }
 0x97f   :  { %8172 = vmatprep.mubr.msk.f32.mxu1 %vm9232_vm1, %v9231_v7  ;;  %8183 = vmatprep.mubr.msk.f32.mxu0 %vm9232_vm1, %v9231_v7 }
 0x981   :  { %8453 = vmatpush3.bf16.msra.mxu1 %v9702_v19  ;;  %8459 = vmatpush3.bf16.msra.mxu0 %v9704_v20 }
 0x982   :  { %8460 = vmatprep.subr.bf16.mxu1 %v9233_v17  ;;  %8466 = vmatprep.subr.bf16.mxu0 %v9233_v17 }
 0xa47   :  { %v3902_v45 = vpop.f32.mrb[58].mxu1  ;;  %v3972_v43 = vpop.f32.mrb[46].mxu0 }
 0xa48   :  { %v4117_v49 = vrot.slane %v3902_v45, 4  ;;  %v4127_v12 = vrot.slane %v3972_v43, 4  ;;  %v8130_v52 = vpop.f32.mrb[59].mxu1  ;;  %v8141_v53 = vpop.f32.mrb[47].mxu0 }
 0xa4a   :  { %v4119_v54 = vadd.f32 %v4117_v49, %v9767_v50  ;;  %v4129_v48 = vadd.f32 %v4127_v12, %v9769_v51 }
 0xa4c   :  { %v7209_v55 = vmul.f32 -1.442695, %v4119_v54  ;;  %v7210_v58 = vmul.f32 -1.442695, %v4129_v48 }
 0xa4e   :  { %8890 = vpow2.f32 %v7209_v55 }
 0xa4f   :  { %8892 = vpow2.f32 %v7210_v58  ;;  %v4042_v44 = vpop.f32.mrb[60].mxu1  ;;  %v4112_v59 = vpop.f32.mrb[48].mxu0 }
 0xa50   :  { %v4142_v60 = vrot.slane %v4112_v59, 4  ;;  %v8152_v61 = vpop.f32.mrb[61].mxu1  ;;  %v8163_v0 = vpop.f32.mrb[49].mxu0  ;;  %v4137_v1 = vrot.slane %v4042_v44, 4 }
 0xa52   :  { %v4144_v13 = vadd.f32 %v4142_v60, %v9781_v9  ;;  %v4139_v15 = vadd.f32 %v4137_v1, %v9779_v3 }
 0xa54   :  { %v7211_v14 = vmul.f32 -1.442695, %v4144_v13 }
 0xa56   :  { %8894 = vpow2.f32 %v7211_v14 }
 0xa57   :  { %8896 = vtanh.f32 %v4139_v15 }
 0xa58   :  { %v8891_v18 = vpop.eup %8890 }
 0xa59   :  { %v8893_v21 = vpop.eup %8892  ;;  %v4123_v50 = vadd.f32 1.0, %v8891_v18 }
 0xa5a   :  { %v4133_v51 = vadd.f32 1.0, %v8893_v21 }
 0xa5b   :  { %8898 = vrcp.f32 %v4123_v50 }
 0xa5c   :  { %8900 = vrcp.f32 %v4133_v51 }
 0xa60   :  { %v8895_v24 = vpop.eup %8894 }
 0xa61   :  { %v8897_v25 = vpop.eup %8896  ;;  %v4148_v28 = vadd.f32 1.0, %v8895_v24 }
 0xa63   :  { %8902 = vrcp.f32 %v4148_v28 }
 0xa65   :  { %v8899_v10 = vpop.eup %8898 }
 0xa66   :  { %v8901_v16 = vpop.eup %8900  ;;  %v4155_v5 = vmul.f32 %v8899_v10, %v8897_v25 }
 0xa67   :  { %v4154_v9 = vmul.f32 %v8901_v16, %v4152_v8 }
 0xa69   :  { %v10045_v29 = vadd.f32 %v4155_v5, %v4154_v9  ;;  %v4879_v9 = vld [vmem:[%s10545_s11 + $0x40] sm:$0xff] }
 0xa6b   :  { %8904 = vtanh.f32 %v10045_v29  ;;  %v4467_v59 = vrot.slane %v10045_v29, 4  ;;  %v4883_v29 = vld [vmem:[%s10545_s11 + $0x60] sm:$0xff] }
 0xa6d   :  { %v8903_v3 = vpop.eup %8902 }
 0xa75   :  { %v8905_v22 = vpop.eup %8904 }
 0xa76   :  { %v4158_v11 = vmul.f32 %v8905_v22, %v8903_v3  ;;  %v4880_v3 = vld [vmem:[%s10545_s11 + $0x48] sm:$0xff]  ;;  %v7234_v22 = vcombine.low %v4879_v9, %v4883_v29 }
 0xa78   :  { %v4160_v40 = vrot.slane %v4158_v11, 4  ;;  %v4850_v41 = vrot.slane %v4158_v11, 7  ;;  %v10049_v23 = vsel %vm4864_vm8, %v10008_v39, %v4158_v11  ;;  %v5442_v32 = vrot.slane %v4158_v11, 1 }
 0xa79   :  { %v5736_v31 = vrot.slane %v4158_v11, 2  ;;  %v7235_v11 = vcombine.high %v4879_v9, %v4883_v29 }
 0xa7a   :  { %8173 = vmatmul.mubr.msk.f32.vlgmr.msra.gmra.mrb[62].mxu1 %vm1034_vm4, %v4160_v40  ;;  %8184 = vmatmul.mubr.msk.f32.vlgmr.msra.gmra.mrb[50].mxu0 %vm1034_vm4, %v4160_v40  ;;  %v10054_v33 = vsel %vm4864_vm8, %v10004_v56, %v4850_v41  ;;  %v10057_v36 = vsel %vm4864_vm8, %v10012_v4, %v5442_v32  ;;  %v9234_v41 = vmov 0  }
 0xa7b   :  { %8462 = vmatpush3.bf16.msra.mxu1 %v9717_v30  ;;  %8468 = vmatpush3.bf16.msra.mxu0 %v9719_v6  ;;  %v10062_v37 = vsel %vm4864_vm8, %v10020_v42, %v5736_v31  ;;  %v10155_v31 = vld [vmem:[%s10545_s11 + $0x10] sm:$0xff] }
 0xa7c   :  { %8463 = vmatprep.subr.bf16.mxu1 %v9233_v17  ;;  %8469 = vmatprep.subr.bf16.mxu0 %v9233_v17 }
 0xa7d   :  { %8194 = vmatprep.mubr.msk.f32.mxu1 %vm9232_vm1, %v9231_v7  ;;  %8205 = vmatprep.mubr.msk.f32.mxu0 %vm9232_vm1, %v9231_v7 }
 0xa7f   :  { %8465 = vmatpush3.bf16.msra.mxu1 %v9731_v34  ;;  %8471 = vmatpush3.bf16.msra.mxu0 %v9733_v35 }
 0xa80   :  { %8472 = vmatprep.subr.bf16.mxu1 %v9233_v17  ;;  %8478 = vmatprep.subr.bf16.mxu0 %v9233_v17 }
 0xa82   :  { %8195 = vmatmul.mubr.msk.f32.vlgmr.msra.gmra.mrb[64].mxu1 %vm1034_vm4, %v4160_v40  ;;  %8206 = vmatmul.mubr.msk.f32.vlgmr.msra.gmra.mrb[52].mxu0 %vm1034_vm4, %v4160_v40  ;;  %v4884_v40 = vld [vmem:[%s10545_s11 + $0x68] sm:$0xff] }
 0xa83   :  { %8474 = vmatpush3.bf16.msra.mxu1 %v9690_v26  ;;  %8480 = vmatpush3.bf16.msra.mxu0 %v9692_v27  ;;  %v7237_v32 = vcombine.high %v4880_v3, %v4884_v40 }
 0xa84   :  { %8475 = vmatprep.subr.bf16.mxu1 %v9233_v17  ;;  %8481 = vmatprep.subr.bf16.mxu0 %v9233_v17 }
 0xa85   :  { %8216 = vmatprep.mubr.msk.f32.mxu1 %vm9232_vm1, %v9231_v7  ;;  %8227 = vmatprep.mubr.msk.f32.mxu0 %vm9232_vm1, %v9231_v7 }
 0xa87   :  { %8477 = vmatpush3.bf16.msra.mxu1 %v9702_v19  ;;  %8483 = vmatpush3.bf16.msra.mxu0 %v9704_v20 }
 0xa88   :  { %8484 = vmatprep.subr.bf16.mxu1 %v9233_v17  ;;  %8490 = vmatprep.subr.bf16.mxu0 %v9233_v17 }
 0xb4d   :  { %v4229_v26 = vpop.f32.mrb[62].mxu1  ;;  %v4299_v27 = vpop.f32.mrb[50].mxu0 }
 0xb4e   :  { %v4443_v38 = vadd.f32 %v4229_v26, %v9763_v46  ;;  %v4450_v57 = vadd.f32 %v4299_v27, %v9765_v47  ;;  %v8174_v2 = vpop.f32.mrb[63].mxu1  ;;  %v8185_v56 = vpop.f32.mrb[51].mxu0  ;;  %v10172_v26 = vld [vmem:[%s10545_s11 + $0x38] sm:$0xff] }
 0xb50   :  { %v7216_v39 = vmul.f32 -1.442695, %v4443_v38  ;;  %v7217_v4 = vmul.f32 -1.442695, %v4450_v57 }
 0xb52   :  { %8906 = vpow2.f32 %v7216_v39 }
 0xb53   :  { %8908 = vpow2.f32 %v7217_v4 }
 0xb55   :  { %v4369_v42 = vpop.f32.mrb[64].mxu1  ;;  %v4439_v19 = vpop.f32.mrb[52].mxu0 }
 0xb56   :  { %v4459_v20 = vadd.f32 %v4439_v19, %v9777_v63  ;;  %v8196_v45 = vpop.f32.mrb[65].mxu1  ;;  %v8207_v43 = vpop.f32.mrb[53].mxu0  ;;  %v4457_v12 = vadd.f32 %v4369_v42, %v9775_v62 }
 0xb58   :  { %v7218_v49 = vmul.f32 -1.442695, %v4459_v20 }
 0xb5a   :  { %8910 = vpow2.f32 %v7218_v49 }
 0xb5b   :  { %8912 = vtanh.f32 %v4457_v12 }
 0xb5c   :  { %v8907_v52 = vpop.eup %8906 }
 0xb5d   :  { %v8909_v53 = vpop.eup %8908  ;;  %v4447_v54 = vadd.f32 1.0, %v8907_v52 }
 0xb5e   :  { %v4454_v48 = vadd.f32 1.0, %v8909_v53 }
 0xb5f   :  { %8914 = vrcp.f32 %v4447_v54 }
 0xb60   :  { %8916 = vrcp.f32 %v4454_v48 }
 0xb64   :  { %v8911_v55 = vpop.eup %8910 }
 0xb65   :  { %v8913_v58 = vpop.eup %8912  ;;  %v4463_v0 = vadd.f32 1.0, %v8911_v55 }
 0xb67   :  { %8918 = vrcp.f32 %v4463_v0 }
 0xb69   :  { %v8915_v44 = vpop.eup %8914 }
 0xb6a   :  { %v8917_v60 = vpop.eup %8916  ;;  %v4470_v61 = vmul.f32 %v8915_v44, %v8913_v58 }
 0xb6b   :  { %v4469_v1 = vmul.f32 %v8917_v60, %v4467_v59 }
 0xb6d   :  { %v10093_v13 = vadd.f32 %v4470_v61, %v4469_v1 }
 0xb6f   :  { %8920 = vtanh.f32 %v10093_v13 }
 0xb71   :  { %v8919_v14 = vpop.eup %8918 }
 0xb79   :  { %v8921_v15 = vpop.eup %8920 }
 0xb7a   :  { %v4473_v18 = vmul.f32 %v8921_v15, %v8919_v14  ;;  %v4793_v15 = vrot.slane %v10093_v13, 4  ;;  %v4885_v13 = vld [vmem:[%s10545_s11 + $0x70] sm:$0xff] }
 0xb7c   :  { %8217 = vmatmul.mubr.msk.f32.vlgmr.msra.gmra.mrb[66].mxu1 %vm1034_vm4, %v4473_v18  ;;  %8228 = vmatmul.mubr.msk.f32.vlgmr.msra.gmra.mrb[54].mxu0 %vm1034_vm4, %v4473_v18  ;;  %v4852_v21 = vrot.slane %v4473_v18, 2  ;;  %v5151_v50 = vrot.slane %v4473_v18, 3  ;;  %v5444_v51 = vrot.slane %v4473_v18, 4  ;;  %v5738_v24 = vrot.slane %v4473_v18, 5 }
 0xb7d   :  { %8486 = vmatpush3.bf16.msra.mxu1 %v9717_v30  ;;  %8492 = vmatpush3.bf16.msra.mxu0 %v9719_v6  ;;  %v4871_v30 = vld [vmem:[%s10545_s11] sm:$0xff]  ;;  %v4872_v6 = vld [vmem:[%s10545_s11 + $0x8] sm:$0xff] }
 0xb7e   :  { %8487 = vmatprep.subr.bf16.mxu1 %v9233_v17  ;;  %8493 = vmatprep.subr.bf16.mxu0 %v9233_v17  ;;  %v10104_v25 = vsel %vm4866_vm9, %v10054_v33, %v4852_v21  ;;  %v10108_v10 = vsel %vm4866_vm9, %v10049_v23, %v5151_v50  ;;  %v10112_v8 = vsel %vm4866_vm9, %v10057_v36, %v5444_v51  ;;  %v10160_v33 = vld [vmem:[%s10545_s11 + $0x30] sm:$0xff]  ;;  %v10165_v36 = vld [vmem:[%s10545_s11 + $0x18] sm:$0xff] }
 0xb7f   :  { %8238 = vmatprep.mubr.msk.f32.mxu1 %vm9232_vm1, %v9231_v7  ;;  %8249 = vmatprep.mubr.msk.f32.mxu0 %vm9232_vm1, %v9231_v7  ;;  %v10120_v17 = vsel %vm4866_vm9, %v10062_v37, %v5738_v24  ;;  %v4875_v7 = vld [vmem:[%s10545_s11 + $0x20] sm:$0xff]  ;;  %v7236_v23 = vcombine.low %v4880_v3, %v4884_v40  ;;  %v7231_v37 = vcombine.high %v10155_v31, %v10160_v33 }
 0xb80   :  { %v7227_v16 = vcombine.high %v4871_v30, %v4875_v7  ;;  %v7230_v27 = vcombine.low %v10155_v31, %v10160_v33  ;;  %v7232_v38 = vcombine.low %v10165_v36, %v10172_v26  ;;  %v7233_v57 = vcombine.high %v10165_v36, %v10172_v26  ;;  %v5175_v31 = vld [vmem:[%s10545_s11 + $0xe0] sm:$0xff]  ;;  %v5172_v33 = vld [vmem:[%s10545_s11 + $0xc8] sm:$0xff] }
 0xb81   :  { %8489 = vmatpush3.bf16.msra.mxu1 %v9731_v34  ;;  %8495 = vmatpush3.bf16.msra.mxu0 %v9733_v35  ;;  %v4876_v34 = vld [vmem:[%s10545_s11 + $0x28] sm:$0xff]  ;;  %v7226_v35 = vcombine.low %v4871_v30, %v4875_v7  ;;  %v4881_v7 = vld [vmem:[%s10545_s11 + $0x50] sm:$0xff] }
 0xb82   :  { %v7228_v5 = vcombine.low %v4872_v6, %v4876_v34  ;;  %v7229_v28 = vcombine.high %v4872_v6, %v4876_v34  ;;  %4970 = vmatprep.subr.bf16.mxu1 %v7227_v16  ;;  %v4882_v16 = vld [vmem:[%s10545_s11 + $0x58] sm:$0xff]  ;;  %v5176_v36 = vld [vmem:[%s10545_s11 + $0xe8] sm:$0xff] }
 0xb83   :  { %v4886_v34 = vld [vmem:[%s10545_s11 + $0x78] sm:$0xff] }
 0xb84   :  { %8239 = vmatmul.mubr.msk.f32.vlgmr.msra.gmra.mrb[68].mxu1 %vm1034_vm4, %v4473_v18  ;;  %8250 = vmatmul.mubr.msk.f32.vlgmr.msra.gmra.mrb[56].mxu0 %vm1034_vm4, %v4473_v18  ;;  %v7241_v40 = vcombine.high %v4882_v16, %v4886_v34 }
 0xb85   :  { %5011 = vmatprep.subr.bf16.mxu0 %v7229_v28  ;;  %4971 = vmatpush1.bf16.msra.mxu1 %v7226_v35 }
 0xb86   :  { %5012 = vmatpush1.bf16.msra.mxu0 %v7228_v5  ;;  %5002 = vmatprep.mubr.bf16.mxu1 %v9234_v41 }
 0xb87   :  { %5043 = vmatprep.mubr.bf16.mxu0 %v9234_v41  ;;  %4972 = vmatprep.subr.bf16.mxu1 %v7235_v11  ;;  %v7239_v11 = vcombine.high %v4881_v7, %v4885_v13 }
 0xb88   :  { %5013 = vmatprep.subr.bf16.mxu0 %v7237_v32  ;;  %v5167_v32 = vld [vmem:[%s10545_s11 + $0xa0] sm:$0xff] }
 0xb89   :  { %4973 = vmatpush1.bf16.msra.mxu1 %v7234_v22 }
 0xb8a   :  { %5014 = vmatpush1.bf16.msra.mxu0 %v7236_v23  ;;  %5052 = vmatprep.subr.bf16.mxu1 %v7231_v37  ;;  %v5163_v23 = vld [vmem:[%s10545_s11 + $0x80] sm:$0xff] }
 0xb8b   :  { %5093 = vmatprep.subr.bf16.mxu0 %v7233_v57  ;;  %v7247_v37 = vcombine.high %v5163_v23, %v5167_v32  ;;  %v7246_v26 = vcombine.low %v5163_v23, %v5167_v32 }
 0xc4f   :  { %v4543_v2 = vpop.f32.mrb[66].mxu1  ;;  %v4613_v56 = vpop.f32.mrb[54].mxu0 }
 0xc50   :  { %v4758_v39 = vrot.slane %v4543_v2, 4  ;;  %v4768_v4 = vrot.slane %v4613_v56, 4  ;;  %v8218_v42 = vpop.f32.mrb[67].mxu1  ;;  %v8229_v19 = vpop.f32.mrb[55].mxu0  ;;  %v5171_v2 = vld [vmem:[%s10545_s11 + $0xc0] sm:$0xff]  ;;  %v7257_v56 = vcombine.high %v5172_v33, %v5176_v36 }
 0xc51   :  { %v5166_v42 = vld [vmem:[%s10545_s11 + $0x98] sm:$0xff] }
 0xc52   :  { %v4760_v20 = vadd.f32 %v4758_v39, %v9763_v46  ;;  %v4770_v45 = vadd.f32 %v4768_v4, %v9765_v47  ;;  %v5165_v39 = vld [vmem:[%s10545_s11 + $0x90] sm:$0xff]  ;;  %v5170_v19 = vld [vmem:[%s10545_s11 + $0xb8] sm:$0xff] }
 0xc53   :  { %v5169_v4 = vld [vmem:[%s10545_s11 + $0xb0] sm:$0xff] }
 0xc54   :  { %v7223_v43 = vmul.f32 -1.442695, %v4760_v20  ;;  %v7224_v49 = vmul.f32 -1.442695, %v4770_v45  ;;  %v7254_v20 = vcombine.low %v5171_v2, %v5175_v31  ;;  %v7256_v45 = vcombine.low %v5172_v33, %v5176_v36 }
 0xc56   :  { %8922 = vpow2.f32 %v7223_v43  ;;  %v7251_v43 = vcombine.high %v5165_v39, %v5169_v4 }
 0xc57   :  { %8924 = vpow2.f32 %v7224_v49  ;;  %v4683_v12 = vpop.f32.mrb[68].mxu1  ;;  %v4753_v52 = vpop.f32.mrb[56].mxu0  ;;  %v7253_v49 = vcombine.high %v5166_v42, %v5170_v19 }
 0xc58   :  { %v4783_v53 = vrot.slane %v4753_v52, 4  ;;  %v8240_v54 = vpop.f32.mrb[69].mxu1  ;;  %v8251_v48 = vpop.f32.mrb[57].mxu0  ;;  %v4778_v55 = vrot.slane %v4683_v12, 4  ;;  %v5173_v12 = vld [vmem:[%s10545_s11 + $0xd0] sm:$0xff] }
 0xc59   :  { %v5177_v52 = vld [vmem:[%s10545_s11 + $0xf0] sm:$0xff]  ;;  %v5178_v54 = vld [vmem:[%s10545_s11 + $0xf8] sm:$0xff]  ;;  %v7250_v48 = vcombine.low %v5165_v39, %v5169_v4 }
 0xc5a   :  { %v4785_v58 = vadd.f32 %v4783_v53, %v9777_v63  ;;  %v4780_v59 = vadd.f32 %v4778_v55, %v9775_v62  ;;  %v5174_v53 = vld [vmem:[%s10545_s11 + $0xd8] sm:$0xff]  ;;  %v7252_v55 = vcombine.low %v5166_v42, %v5170_v19 }
 0xc5c   :  { %v7225_v44 = vmul.f32 -1.442695, %v4785_v58 }
 0xc5e   :  { %8926 = vpow2.f32 %v7225_v44  ;;  %v7259_v44 = vcombine.high %v5173_v12, %v5177_v52 }
 0xc5f   :  { %8928 = vtanh.f32 %v4780_v59  ;;  %v7261_v59 = vcombine.high %v5174_v53, %v5178_v54 }
 0xc60   :  { %v8923_v60 = vpop.eup %8922 }
 0xc61   :  { %v8925_v61 = vpop.eup %8924  ;;  %v4764_v46 = vadd.f32 1.0, %v8923_v60  ;;  %v5456_v60 = vld [vmem:[%s10545_s11 + $0x100] sm:$0xff] }
 0xc62   :  { %v4774_v47 = vadd.f32 1.0, %v8925_v61  ;;  %v5460_v61 = vld [vmem:[%s10545_s11 + $0x120] sm:$0xff] }
 0xc63   :  { %8930 = vrcp.f32 %v4764_v46  ;;  %v5457_v46 = vld [vmem:[%s10545_s11 + $0x108] sm:$0xff] }
 0xc64   :  { %8932 = vrcp.f32 %v4774_v47  ;;  %v5461_v47 = vld [vmem:[%s10545_s11 + $0x128] sm:$0xff] }
 0xc68   :  { %v8927_v0 = vpop.eup %8926 }
 0xc69   :  { %v8929_v1 = vpop.eup %8928  ;;  %v4789_v50 = vadd.f32 1.0, %v8927_v0  ;;  %v7258_v0 = vcombine.low %v5173_v12, %v5177_v52 }
 0xc6b   :  { %8934 = vrcp.f32 %v4789_v50  ;;  %v5465_v50 = vld [vmem:[%s10545_s11 + $0x148] sm:$0xff] }
 0xc6d   :  { %v8931_v14 = vpop.eup %8930 }
 0xc6e   :  { %v8933_v18 = vpop.eup %8932  ;;  %v4796_v21 = vmul.f32 %v8931_v14, %v8929_v1  ;;  %v7260_v1 = vcombine.low %v5174_v53, %v5178_v54  ;;  %v7267_v14 = vcombine.high %v5456_v60, %v5460_v61 }
 0xc6f   :  { %v4795_v63 = vmul.f32 %v8933_v18, %v4793_v15  ;;  %v7269_v15 = vcombine.high %v5457_v46, %v5461_v47  ;;  %v5464_v18 = vld [vmem:[%s10545_s11 + $0x140] sm:$0xff] }
 0xc71   :  { %v4797_v51 = vadd.f32 %v4796_v21, %v4795_v63  ;;  %v5468_v21 = vld [vmem:[%s10545_s11 + $0x160] sm:$0xff]  ;;  %v5469_v63 = vld [vmem:[%s10545_s11 + $0x168] sm:$0xff] }
 0xc73   :  { %8936 = vtanh.f32 %v4797_v51  ;;  %v7266_v51 = vcombine.low %v5456_v60, %v5460_v61 }
 0xc75   :  { %v8935_v62 = vpop.eup %8934 }
 0xc7d   :  { %v8937_v24 = vpop.eup %8936 }
 0xc7e   :  { %v4799_v30 = vmul.f32 %v8937_v24, %v8935_v62  ;;  %v7268_v62 = vcombine.low %v5457_v46, %v5461_v47  ;;  %v7275_v24 = vcombine.high %v5464_v18, %v5468_v21 }
 0xc80   :  { %v4855_v6 = vrot.slane %v4799_v30, 5  ;;  %v5153_v35 = vrot.slane %v4799_v30, 6  ;;  %v5446_v5 = vrot.slane %v4799_v30, 7  ;;  %v10198_v28 = vsel %vm4868_vm10, %v10120_v17, %v4799_v30 }
 0xc81   :  { %v7240_v17 = vcombine.low %v4882_v16, %v4886_v34  ;;  %v7277_v30 = vcombine.high %v5465_v50, %v5469_v63  ;;  %v5463_v16 = vld [vmem:[%s10545_s11 + $0x138] sm:$0xff]  ;;  %v7274_v34 = vcombine.low %v5464_v18, %v5468_v21  ;;  %v5747_v61 = vpack.c.bf16 %v10198_v28, %v10198_v28 }
 0xc82   :  { %v4869_v9 = vsel %vm4868_vm10, %v10104_v25, %v4855_v6  ;;  %v5161_v29 = vsel %vm4868_vm10, %v10108_v10, %v5153_v35  ;;  %v10203_v3 = vsel %vm4868_vm10, %v10112_v8, %v5446_v5  ;;  %v5164_v25 = vld [vmem:[%s10545_s11 + $0x88] sm:$0xff]  ;;  %v7238_v8 = vcombine.low %v4881_v7, %v4885_v13  ;;  %v5458_v7 = vld [vmem:[%s10545_s11 + $0x110] sm:$0xff]  ;;  %v5459_v13 = vld [vmem:[%s10545_s11 + $0x118] sm:$0xff] }
 0xc83   :  { %v4870_v22 = vpack.c.bf16 %v4869_v9, %v4869_v9  ;;  %v5168_v10 = vld [vmem:[%s10545_s11 + $0xa8] sm:$0xff]  ;;  %v5162_v58 = vpack.c.bf16 %v5161_v29, %v5161_v29  ;;  %v5462_v6 = vld [vmem:[%s10545_s11 + $0x130] sm:$0xff]  ;;  %v7276_v35 = vcombine.low %v5465_v50, %v5469_v63  ;;  %v7273_v9 = vcombine.high %v5459_v13, %v5463_v16  ;;  %v8618_v28 = vld [vmem:[#allocation17] ss:$8 sps:$4 sm:$0xff]  }
 0xc84   :  { %v7249_v57 = vcombine.high %v5164_v25, %v5168_v10  ;;  %v7271_v5 = vcombine.high %v5458_v7, %v5462_v6  ;;  %v5466_v29 = vld [vmem:[%s10545_s11 + $0x150] sm:$0xff]  ;;  %v7270_v23 = vcombine.low %v5458_v7, %v5462_v6  ;;  %v7272_v32 = vcombine.low %v5459_v13, %v5463_v16  ;;  %v8627_v18 = vld [vmem:[#allocation17 + $0x200] ss:$8 sps:$4 sm:$0xff]  }
 0xc85   :  { %7242 = vmatmul.mubr.msk.bf16.vlgmr.msra.gmra.mrb[72].mxu1 %vm1034_vm4, %v4870_v22  ;;  %7243 = vmatmul.mubr.msk.bf16.vlgmr.msra.gmra.mrb[60].mxu0 %vm1034_vm4, %v4870_v22  ;;  %v8623_v21 = vld [vmem:[#allocation17 + $0x14] ss:$8 sps:$4 sm:$0xff]   ;;  %v8621_v63 = vld [vmem:[#allocation17 + $0x10] ss:$8 sps:$4 sm:$0xff]  }
 0xc86   :  { %5053 = vmatpush1.bf16.msra.mxu1 %v7230_v27  ;;  %5094 = vmatpush1.bf16.msra.mxu0 %v7232_v38  ;;  %v7248_v27 = vcombine.low %v5164_v25, %v5168_v10  ;;  %v7255_v38 = vcombine.high %v5171_v2, %v5175_v31  ;;  %v5455_v25 = vpack.c.bf16 %v10203_v3, %v10203_v3  ;;  %v5753_v3 = vld [vmem:[%s10545_s11 + $0x1a8] sm:$0xff]  ;;  %v8635_v50 = vld [vmem:[#allocation17 + $0x214] ss:$8 sps:$4 sm:$0xff]  }
 0xc87   :  { %5054 = vmatprep.subr.bf16.mxu1 %v7239_v11  ;;  %5095 = vmatprep.subr.bf16.mxu0 %v7241_v40  ;;  %v5467_v11 = vld [vmem:[%s10545_s11 + $0x158] sm:$0xff]  ;;  %v8630_v13 = vld [vmem:[#allocation17 + $0x30] ss:$8 sps:$4 sm:$0xff]  }
 0xc88   :  { %5084 = vmatprep.mubr.bf16.mxu1 %v9234_v41  ;;  %5125 = vmatprep.mubr.bf16.mxu0 %v9234_v41  ;;  %v5471_v40 = vld [vmem:[%s10545_s11 + $0x178] sm:$0xff]  ;;  %v8645_v16 = vld [vmem:[#allocation17 + $0x230] ss:$8 sps:$4 sm:$0xff]  }
 0xc89   :  { %v7280_v31 = vcombine.low %v5467_v11, %v5471_v40  ;;  %v8632_v7 = vld [vmem:[#allocation17 + $0x34] ss:$8 sps:$4 sm:$0xff]  }
 0xc8a   :  { %5055 = vmatpush1.bf16.msra.mxu1 %v7238_v8  ;;  %5096 = vmatpush1.bf16.msra.mxu0 %v7240_v17  ;;  %v7281_v8 = vcombine.high %v5467_v11, %v5471_v40  ;;  %v5748_v17 = vld [vmem:[%s10545_s11 + $0x180] sm:$0xff]  ;;  %v8647_v6 = vld [vmem:[#allocation17 + $0x234] ss:$8 sps:$4 sm:$0xff]   ;;  %v8642_v11 = vld [vmem:[#allocation17 + $0x50] ss:$8 sps:$4 sm:$0xff]  }
 0xc8b   :  { %5262 = vmatprep.subr.bf16.mxu1 %v7247_v37  ;;  %5303 = vmatprep.subr.bf16.mxu0 %v7249_v57  ;;  %v5752_v37 = vld [vmem:[%s10545_s11 + $0x1a0] sm:$0xff]  ;;  %v5749_v57 = vld [vmem:[%s10545_s11 + $0x188] sm:$0xff] }
 0xc8c   :  { %v7287_v33 = vcombine.high %v5748_v17, %v5752_v37  ;;  %v7289_v36 = vcombine.high %v5749_v57, %v5753_v3  ;;  %v7286_v39 = vcombine.low %v5748_v17, %v5752_v37  ;;  %v7288_v4 = vcombine.low %v5749_v57, %v5753_v3  ;;  %v8657_v40 = vld [vmem:[#allocation17 + $0x250] ss:$8 sps:$4 sm:$0xff]   ;;  %v8671_v17 = vld [vmem:[#allocation17 + $0x274] ss:$8 sps:$4 sm:$0xff]   ;;  %v8662_v3 = vld [vmem:[#allocation17 + $0x84] ss:$8 sps:$4 sm:$0xff]  }
 0xc8d   :  { %7244 = vmatmul.mubr.msk.bf16.vlgmr.msra.gmra.mrb[76].mxu1 %vm1034_vm4, %v4870_v22  ;;  %7245 = vmatmul.mubr.msk.bf16.vlgmr.msra.gmra.mrb[64].mxu0 %vm1034_vm4, %v4870_v22  ;;  %v5470_v22 = vld [vmem:[%s10545_s11 + $0x170] sm:$0xff] }
 0xc8e   :  { %5263 = vmatpush1.bf16.msra.mxu1 %v7246_v26  ;;  %5304 = vmatpush1.bf16.msra.mxu0 %v7248_v27  ;;  %v7279_v10 = vcombine.high %v5466_v29, %v5470_v22  ;;  %v7278_v2 = vcombine.low %v5466_v29, %v5470_v22  ;;  %v5756_v26 = vld [vmem:[%s10545_s11 + $0x1c0] sm:$0xff]  ;;  %v8644_v29 = vld [vmem:[#allocation17 + $0x54] ss:$8 sps:$4 sm:$0xff]   ;;  %v8654_v37 = vld [vmem:[#allocation17 + $0x70] ss:$8 sps:$4 sm:$0xff]  }
 0xc8f   :  { %5264 = vmatprep.subr.bf16.mxu1 %v7255_v38  ;;  %5305 = vmatprep.subr.bf16.mxu0 %v7257_v56  ;;  %v5760_v27 = vld [vmem:[%s10545_s11 + $0x1e0] sm:$0xff]  ;;  %v5757_v38 = vld [vmem:[%s10545_s11 + $0x1c8] sm:$0xff]  ;;  %v8659_v22 = vld [vmem:[#allocation17 + $0x254] ss:$8 sps:$4 sm:$0xff]  }
 0xc90   :  { %5294 = vmatprep.mubr.bf16.mxu1 %v9234_v41  ;;  %5335 = vmatprep.mubr.bf16.mxu0 %v9234_v41  ;;  %v5761_v56 = vld [vmem:[%s10545_s11 + $0x1e8] sm:$0xff]  ;;  %v7295_v42 = vcombine.high %v5756_v26, %v5760_v27  ;;  %v7294_v12 = vcombine.low %v5756_v26, %v5760_v27  ;;  %v8683_v26 = vld [vmem:[#allocation17 + $0x294] ss:$8 sps:$4 sm:$0xff]  }
 0xc91   :  { %v7297_v19 = vcombine.high %v5757_v38, %v5761_v56  ;;  %v7296_v52 = vcombine.low %v5757_v38, %v5761_v56  ;;  %v8669_v57 = vld [vmem:[#allocation17 + $0x270] ss:$8 sps:$4 sm:$0xff]   ;;  %v8674_v56 = vld [vmem:[#allocation17 + $0xa4] ss:$8 sps:$4 sm:$0xff]  }
 0xc92   :  { %5265 = vmatpush1.bf16.msra.mxu1 %v7254_v20  ;;  %5306 = vmatpush1.bf16.msra.mxu0 %v7256_v45  ;;  %v5750_v20 = vld [vmem:[%s10545_s11 + $0x190] sm:$0xff] }
 0xc93   :  { %5344 = vmatprep.subr.bf16.mxu1 %v7251_v43  ;;  %5385 = vmatprep.subr.bf16.mxu0 %v7253_v49  ;;  %v5754_v45 = vld [vmem:[%s10545_s11 + $0x1b0] sm:$0xff]  ;;  %v5751_v43 = vld [vmem:[%s10545_s11 + $0x198] sm:$0xff] }
 0xc94   :  { %v5755_v49 = vld [vmem:[%s10545_s11 + $0x1b8] sm:$0xff]  ;;  %v7291_v53 = vcombine.high %v5750_v20, %v5754_v45  ;;  %v8666_v27 = vld [vmem:[#allocation17 + $0x90] ss:$8 sps:$4 sm:$0xff]  }
 0xc95   :  { %7262 = vmatmul.mubr.msk.bf16.vlgmr.msra.gmra.mrb[72].mxu1 %vm1034_vm4, %v5162_v58  ;;  %7263 = vmatmul.mubr.msk.bf16.vlgmr.msra.gmra.mrb[60].mxu0 %vm1034_vm4, %v5162_v58  ;;  %v7293_v54 = vcombine.high %v5751_v43, %v5755_v49  ;;  %v7292_v60 = vcombine.low %v5751_v43, %v5755_v49  ;;  %v8681_v38 = vld [vmem:[#allocation17 + $0x290] ss:$8 sps:$4 sm:$0xff]   ;;  %v8686_v49 = vld [vmem:[#allocation17 + $0xc4] ss:$8 sps:$4 sm:$0xff]  }
 0xc96   :  { %5345 = vmatpush1.bf16.msra.mxu1 %v7250_v48  ;;  %5386 = vmatpush1.bf16.msra.mxu0 %v7252_v55  ;;  %v5758_v48 = vld [vmem:[%s10545_s11 + $0x1d0] sm:$0xff] }
 0xc97   :  { %5346 = vmatprep.subr.bf16.mxu1 %v7259_v44  ;;  %5387 = vmatprep.subr.bf16.mxu0 %v7261_v59  ;;  %v5762_v55 = vld [vmem:[%s10545_s11 + $0x1f0] sm:$0xff]  ;;  %v5763_v44 = vld [vmem:[%s10545_s11 + $0x1f8] sm:$0xff]  ;;  %v7290_v59 = vcombine.low %v5750_v20, %v5754_v45 }
 0xc98   :  { %5376 = vmatprep.mubr.bf16.mxu1 %v9234_v41  ;;  %5417 = vmatprep.mubr.bf16.mxu0 %v9234_v41  ;;  %v7299_v46 = vcombine.high %v5758_v48, %v5762_v55  ;;  %v8695_v20 = vld [vmem:[#allocation17 + $0x2b4] ss:$8 sps:$4 sm:$0xff]   ;;  %v8678_v45 = vld [vmem:[#allocation17 + $0xb0] ss:$8 sps:$4 sm:$0xff]  }
 0xc99   :  { %v8693_v43 = vld [vmem:[#allocation17 + $0x2b0] ss:$8 sps:$4 sm:$0xff]  }
 0xc9a   :  { %5347 = vmatpush1.bf16.msra.mxu1 %v7258_v0  ;;  %5388 = vmatpush1.bf16.msra.mxu0 %v7260_v1  ;;  %v7298_v0 = vcombine.low %v5758_v48, %v5762_v55  ;;  %v8690_v48 = vld [vmem:[#allocation17 + $0xd0] ss:$8 sps:$4 sm:$0xff]   ;;  %v8698_v55 = vld [vmem:[#allocation17 + $0xe4] ss:$8 sps:$4 sm:$0xff]  }
 0xc9b   :  { %5555 = vmatprep.subr.bf16.mxu1 %v7267_v14  ;;  %5596 = vmatprep.subr.bf16.mxu0 %v7269_v15  ;;  %v8620_v14 = vld [vmem:[#allocation17 + $0x4] ss:$8 sps:$4 sm:$0xff]  }
 0xc9c   :  { %v8629_v15 = vld [vmem:[#allocation17 + $0x204] ss:$8 sps:$4 sm:$0xff]  }
 0xc9d   :  { %7264 = vmatmul.mubr.msk.bf16.vlgmr.msra.gmra.mrb[76].mxu1 %vm1034_vm4, %v5162_v58  ;;  %7265 = vmatmul.mubr.msk.bf16.vlgmr.msra.gmra.mrb[64].mxu0 %vm1034_vm4, %v5162_v58  ;;  %v5759_v58 = vld [vmem:[%s10545_s11 + $0x1d8] sm:$0xff] }
 0xc9e   :  { %5556 = vmatpush1.bf16.msra.mxu1 %v7266_v51  ;;  %5597 = vmatpush1.bf16.msra.mxu0 %v7268_v62  ;;  %v7301_v47 = vcombine.high %v5759_v58, %v5763_v44  ;;  %v7300_v1 = vcombine.low %v5759_v58, %v5763_v44  ;;  %v8633_v51 = vld [vmem:[#allocation17 + $0x210] ss:$8 sps:$4 sm:$0xff]   ;;  %v8626_v62 = vld [vmem:[#allocation17 + $0x24] ss:$8 sps:$4 sm:$0xff]   ;;  %v8696_v58 = vld [vmem:[#allocation17 + $0xe0] ss:$8 sps:$4 sm:$0xff]  }
 0xc9f   :  { %5557 = vmatprep.subr.bf16.mxu1 %v7275_v24  ;;  %5598 = vmatprep.subr.bf16.mxu0 %v7277_v30  ;;  %v8624_v24 = vld [vmem:[#allocation17 + $0x20] ss:$8 sps:$4 sm:$0xff]   ;;  %v8704_v44 = vld [vmem:[#allocation17 + $0xf4] ss:$8 sps:$4 sm:$0xff]  }
 0xca0   :  { %5587 = vmatprep.mubr.bf16.mxu1 %v9234_v41  ;;  %5628 = vmatprep.mubr.bf16.mxu0 %v9234_v41  ;;  %v8639_v30 = vld [vmem:[#allocation17 + $0x220] ss:$8 sps:$4 sm:$0xff]  }
 0xca2   :  { %5558 = vmatpush1.bf16.msra.mxu1 %v7274_v34  ;;  %5599 = vmatpush1.bf16.msra.mxu0 %v7276_v35  ;;  %v8638_v34 = vld [vmem:[#allocation17 + $0x44] ss:$8 sps:$4 sm:$0xff]  }
 0xca3   :  { %5637 = vmatprep.subr.bf16.mxu1 %v7271_v5  ;;  %5678 = vmatprep.subr.bf16.mxu0 %v7273_v9  ;;  %v8653_v35 = vld [vmem:[#allocation17 + $0x244] ss:$8 sps:$4 sm:$0xff]   ;;  %v8636_v5 = vld [vmem:[#allocation17 + $0x40] ss:$8 sps:$4 sm:$0xff]  }
 0xca4   :  { %v8651_v9 = vld [vmem:[#allocation17 + $0x240] ss:$8 sps:$4 sm:$0xff]  }
 0xca5   :  { %7282 = vmatmul.mubr.msk.bf16.vlgmr.msra.gmra.mrb[72].mxu1 %vm1034_vm4, %v5455_v25  ;;  %7283 = vmatmul.mubr.msk.bf16.vlgmr.msra.gmra.mrb[60].mxu0 %vm1034_vm4, %v5455_v25 }
 0xca6   :  { %5638 = vmatpush1.bf16.msra.mxu1 %v7270_v23  ;;  %5679 = vmatpush1.bf16.msra.mxu0 %v7272_v32  ;;  %v8650_v23 = vld [vmem:[#allocation17 + $0x64] ss:$8 sps:$4 sm:$0xff]  }
 0xca7   :  { %5639 = vmatprep.subr.bf16.mxu1 %v7279_v10  ;;  %5680 = vmatprep.subr.bf16.mxu0 %v7281_v8  ;;  %v8665_v32 = vld [vmem:[#allocation17 + $0x264] ss:$8 sps:$4 sm:$0xff]   ;;  %v8663_v10 = vld [vmem:[#allocation17 + $0x260] ss:$8 sps:$4 sm:$0xff]   ;;  %v8656_v8 = vld [vmem:[#allocation17 + $0x74] ss:$8 sps:$4 sm:$0xff]  }
 0xca8   :  { %5669 = vmatprep.mubr.bf16.mxu1 %v9234_v41  ;;  %5710 = vmatprep.mubr.bf16.mxu0 %v9234_v41 }
 0xcaa   :  { %5640 = vmatpush1.bf16.msra.mxu1 %v7278_v2  ;;  %5681 = vmatpush1.bf16.msra.mxu0 %v7280_v31  ;;  %v8677_v2 = vld [vmem:[#allocation17 + $0x284] ss:$8 sps:$4 sm:$0xff]   ;;  %v8660_v31 = vld [vmem:[#allocation17 + $0x80] ss:$8 sps:$4 sm:$0xff]  }
 0xcab   :  { %5847 = vmatprep.subr.bf16.mxu1 %v7287_v33  ;;  %5888 = vmatprep.subr.bf16.mxu0 %v7289_v36  ;;  %v8675_v33 = vld [vmem:[#allocation17 + $0x280] ss:$8 sps:$4 sm:$0xff]   ;;  %v8668_v36 = vld [vmem:[#allocation17 + $0x94] ss:$8 sps:$4 sm:$0xff]  }
 0xcad   :  { %7284 = vmatmul.mubr.msk.bf16.vlgmr.msra.gmra.mrb[76].mxu1 %vm1034_vm4, %v5455_v25  ;;  %7285 = vmatmul.mubr.msk.bf16.vlgmr.msra.gmra.mrb[64].mxu0 %vm1034_vm4, %v5455_v25  ;;  %v8648_v25 = vld [vmem:[#allocation17 + $0x60] ss:$8 sps:$4 sm:$0xff]  }
 0xcae   :  { %5848 = vmatpush1.bf16.msra.mxu1 %v7286_v39  ;;  %5889 = vmatpush1.bf16.msra.mxu0 %v7288_v4  ;;  %v8689_v39 = vld [vmem:[#allocation17 + $0x2a4] ss:$8 sps:$4 sm:$0xff]   ;;  %v8672_v4 = vld [vmem:[#allocation17 + $0xa0] ss:$8 sps:$4 sm:$0xff]  }
 0xcaf   :  { %5849 = vmatprep.subr.bf16.mxu1 %v7295_v42  ;;  %5890 = vmatprep.subr.bf16.mxu0 %v7297_v19  ;;  %v8687_v42 = vld [vmem:[#allocation17 + $0x2a0] ss:$8 sps:$4 sm:$0xff]   ;;  %v8680_v19 = vld [vmem:[#allocation17 + $0xb4] ss:$8 sps:$4 sm:$0xff]  }
 0xcb0   :  { %5879 = vmatprep.mubr.bf16.mxu1 %v9234_v41  ;;  %5920 = vmatprep.mubr.bf16.mxu0 %v9234_v41 }
 0xcb2   :  { %5850 = vmatpush1.bf16.msra.mxu1 %v7294_v12  ;;  %5891 = vmatpush1.bf16.msra.mxu0 %v7296_v52  ;;  %v8701_v12 = vld [vmem:[#allocation17 + $0x2c4] ss:$8 sps:$4 sm:$0xff]   ;;  %v8684_v52 = vld [vmem:[#allocation17 + $0xc0] ss:$8 sps:$4 sm:$0xff]  }
 0xcb3   :  { %5929 = vmatprep.subr.bf16.mxu1 %v7291_v53  ;;  %5970 = vmatprep.subr.bf16.mxu0 %v7293_v54  ;;  %v8699_v53 = vld [vmem:[#allocation17 + $0x2c0] ss:$8 sps:$4 sm:$0xff]   ;;  %v8692_v54 = vld [vmem:[#allocation17 + $0xd4] ss:$8 sps:$4 sm:$0xff]  }
 0xcb5   :  { %7302 = vmatmul.mubr.msk.bf16.vlgmr.msra.gmra.mrb[72].mxu1 %vm1034_vm4, %v5747_v61  ;;  %7303 = vmatmul.mubr.msk.bf16.vlgmr.msra.gmra.mrb[60].mxu0 %vm1034_vm4, %v5747_v61 }
 0xcb6   :  { %5930 = vmatpush1.bf16.msra.mxu1 %v7290_v59  ;;  %5971 = vmatpush1.bf16.msra.mxu0 %v7292_v60  ;;  %v8707_v59 = vld [vmem:[#allocation17 + $0x2d4] ss:$8 sps:$4 sm:$0xff]   ;;  %v8702_v60 = vld [vmem:[#allocation17 + $0xf0] ss:$8 sps:$4 sm:$0xff]  }
 0xcb7   :  { %5931 = vmatprep.subr.bf16.mxu1 %v7299_v46  ;;  %5972 = vmatprep.subr.bf16.mxu0 %v7301_v47  ;;  %v8710_v46 = vld [vmem:[#allocation17 + $0x104] ss:$8 sps:$4 sm:$0xff]  }
 0xcb8   :  { %5961 = vmatprep.mubr.bf16.mxu1 %v9234_v41  ;;  %6002 = vmatprep.mubr.bf16.mxu0 %v9234_v41  ;;  %v8641_v41 = vld [vmem:[#allocation17 + $0x224] ss:$8 sps:$4 sm:$0xff]  }
 0xcb9   :  { %v8713_v47 = vld [vmem:[#allocation17 + $0x2e4] ss:$8 sps:$4 sm:$0xff]  }
 0xcba   :  { %5932 = vmatpush1.bf16.msra.mxu1 %v7298_v0  ;;  %5973 = vmatpush1.bf16.msra.mxu0 %v7300_v1  ;;  %v8711_v0 = vld [vmem:[#allocation17 + $0x2e0] ss:$8 sps:$4 sm:$0xff]   ;;  %v8719_v1 = vld [vmem:[#allocation17 + $0x2f4] ss:$8 sps:$4 sm:$0xff]  }
 0xcbb   :  { %6807 = vmatprep.subr.bf16.mxu0 %v8620_v14  ;;  %6889 = vmatprep.subr.bf16.mxu1 %v8629_v15  ;;  %v8717_v14 = vld [vmem:[#allocation17 + $0x2f0] ss:$8 sps:$4 sm:$0xff]   ;;  %v8725_v15 = vld [vmem:[#allocation17 + $0x304] ss:$8 sps:$4 sm:$0xff]  }
 0xcbd   :  { %7304 = vmatmul.mubr.msk.bf16.vlgmr.msra.gmra.mrb[76].mxu1 %vm1034_vm4, %v5747_v61  ;;  %7305 = vmatmul.mubr.msk.bf16.vlgmr.msra.gmra.mrb[64].mxu0 %vm1034_vm4, %v5747_v61  ;;  %v8705_v61 = vld [vmem:[#allocation17 + $0x2d0] ss:$8 sps:$4 sm:$0xff]  }
 0xcbe   :  { %6808 = vmatpush1.bf16.msra.mxu0 %v8618_v28  ;;  %6890 = vmatpush1.bf16.msra.mxu1 %v8627_v18  ;;  %v4802_v28 = vlaneseq }
 0xcbf   :  { %6809 = vmatprep.subr.bf16.mxu0 %v8623_v21  ;;  %6891 = vmatprep.subr.bf16.mxu1 %v8635_v50  ;;  %v10392_v50 = vld [vmem:[#allocation16] sm:$0xff] }
 0xcc0   :  { %v10389_v18 = vshrl.u32 %v4802_v28, 7  ;;  %v8747_v28 = vld [vmem:[#allocation17 + $0x340] ss:$8 sps:$4 sm:$0xff]  }
 0xcc2   :  { %6810 = vmatpush1.bf16.msra.mxu0 %v8621_v63  ;;  %6892 = vmatpush1.bf16.msra.mxu1 %v8633_v51  ;;  %v4804_v21 = vsub.s32 0, %v10389_v18  ;;  %v4808_v63 = vsub.s32 1, %v10389_v18  ;;  %v4816_v51 = vsub.s32 3, %v10389_v18 }
 0xcc3   :  { %6811 = vmatprep.subr.bf16.mxu0 %v8626_v62  ;;  %6893 = vmatprep.subr.bf16.mxu1 %v8641_v41 }
 0xcc4   :  { %v4805_v62 = vrot.slane %v10392_v50, %v4804_v21  ;;  %v4809_v41 = vrot.slane %v10392_v50, %v4808_v63 }
 0xcc6   :  { %6812 = vmatpush1.bf16.msra.mxu0 %v8624_v24  ;;  %6894 = vmatpush1.bf16.msra.mxu1 %v8639_v30  ;;  %v4817_v24 = vrot.slane %v10392_v50, %v4816_v51  ;;  %v8752_v51 = vld [vmem:[#allocation17 + $0x174] ss:$8 sps:$4 sm:$0xff]  }
 0xcc7   :  { %6813 = vmatprep.subr.bf16.mxu0 %v8632_v7  ;;  %6895 = vmatprep.subr.bf16.mxu1 %v8647_v6 }
 0xcca   :  { %6814 = vmatpush1.bf16.msra.mxu0 %v8630_v13  ;;  %6896 = vmatpush1.bf16.msra.mxu1 %v8645_v16 }
 0xccb   :  { %6815 = vmatprep.subr.bf16.mxu0 %v8638_v34  ;;  %6897 = vmatprep.subr.bf16.mxu1 %v8653_v35  ;;  %v4820_v34 = vsub.s32 4, %v10389_v18 }
 0xcce   :  { %6816 = vmatpush1.bf16.msra.mxu0 %v8636_v5  ;;  %6898 = vmatpush1.bf16.msra.mxu1 %v8651_v9 }
 0xccf   :  { %6817 = vmatprep.subr.bf16.mxu0 %v8644_v29  ;;  %6899 = vmatprep.subr.bf16.mxu1 %v8659_v22  ;;  %v4824_v22 = vsub.s32 5, %v10389_v18 }
 0xcd2   :  { %6818 = vmatpush1.bf16.msra.mxu0 %v8642_v11  ;;  %6900 = vmatpush1.bf16.msra.mxu1 %v8657_v40 }
 0xcd3   :  { %6819 = vmatprep.subr.bf16.mxu0 %v8650_v23  ;;  %6901 = vmatprep.subr.bf16.mxu1 %v8665_v32  ;;  %v4832_v23 = vsub.s32 7, %v10389_v18 }
 0xcd6   :  { %6820 = vmatpush1.bf16.msra.mxu0 %v8648_v25  ;;  %6902 = vmatpush1.bf16.msra.mxu1 %v8663_v10  ;;  %v8708_v25 = vld [vmem:[#allocation17 + $0x100] ss:$8 sps:$4 sm:$0xff]  }
 0xcd7   :  { %6821 = vmatprep.subr.bf16.mxu0 %v8656_v8  ;;  %6903 = vmatprep.subr.bf16.mxu1 %v8671_v17  ;;  %v4821_v8 = vrot.slane %v10392_v50, %v4820_v34  ;;  %v8716_v17 = vld [vmem:[#allocation17 + $0x114] ss:$8 sps:$4 sm:$0xff]  }
 0xcd8   :  { %v8764_v34 = vld [vmem:[#allocation17 + $0x194] ss:$8 sps:$4 sm:$0xff]  }
 0xcda   :  { %6822 = vmatpush1.bf16.msra.mxu0 %v8654_v37  ;;  %6904 = vmatpush1.bf16.msra.mxu1 %v8669_v57  ;;  %v4825_v57 = vrot.slane %v10392_v50, %v4824_v22  ;;  %v8773_v22 = vld [vmem:[#allocation17 + $0x384] ss:$8 sps:$4 sm:$0xff]  }
 0xcdb   :  { %6823 = vmatprep.subr.bf16.mxu0 %v8662_v3  ;;  %6905 = vmatprep.subr.bf16.mxu1 %v8677_v2  ;;  %v4833_v3 = vrot.slane %v10392_v50, %v4832_v23  ;;  %v8776_v23 = vld [vmem:[#allocation17 + $0x1b4] ss:$8 sps:$4 sm:$0xff]  }
 0xcde   :  { %6824 = vmatpush1.bf16.msra.mxu0 %v8660_v31  ;;  %6906 = vmatpush1.bf16.msra.mxu1 %v8675_v33  ;;  %v8714_v33 = vld [vmem:[#allocation17 + $0x110] ss:$8 sps:$4 sm:$0xff]  }
 0xcdf   :  { %6825 = vmatprep.subr.bf16.mxu0 %v8668_v36  ;;  %6907 = vmatprep.subr.bf16.mxu1 %v8683_v26 }
 0xce2   :  { %6826 = vmatpush1.bf16.msra.mxu0 %v8666_v27  ;;  %6908 = vmatpush1.bf16.msra.mxu1 %v8681_v38  ;;  %v8722_v38 = vld [vmem:[#allocation17 + $0x124] ss:$8 sps:$4 sm:$0xff]  }
 0xce3   :  { %6827 = vmatprep.subr.bf16.mxu0 %v8674_v56  ;;  %6909 = vmatprep.subr.bf16.mxu1 %v8689_v39 }
 0xce6   :  { %6828 = vmatpush1.bf16.msra.mxu0 %v8672_v4  ;;  %6910 = vmatpush1.bf16.msra.mxu1 %v8687_v42 }
 0xce7   :  { %6829 = vmatprep.subr.bf16.mxu0 %v8680_v19  ;;  %6911 = vmatprep.subr.bf16.mxu1 %v8695_v20 }
 0xcea   :  { %6830 = vmatpush1.bf16.msra.mxu0 %v8678_v45  ;;  %6912 = vmatpush1.bf16.msra.mxu1 %v8693_v43  ;;  %v8720_v43 = vld [vmem:[#allocation17 + $0x120] ss:$8 sps:$4 sm:$0xff]  }
 0xceb   :  { %6831 = vmatprep.subr.bf16.mxu0 %v8686_v49  ;;  %6913 = vmatprep.subr.bf16.mxu1 %v8701_v12  ;;  %v8723_v49 = vld [vmem:[#allocation17 + $0x300] ss:$8 sps:$4 sm:$0xff]  }
 0xcee   :  { %6832 = vmatpush1.bf16.msra.mxu0 %v8684_v52  ;;  %6914 = vmatpush1.bf16.msra.mxu1 %v8699_v53  ;;  %v8728_v52 = vld [vmem:[#allocation17 + $0x134] ss:$8 sps:$4 sm:$0xff]  }
 0xcef   :  { %6833 = vmatprep.subr.bf16.mxu0 %v8692_v54  ;;  %6915 = vmatprep.subr.bf16.mxu1 %v8707_v59  ;;  %v8731_v53 = vld [vmem:[#allocation17 + $0x314] ss:$8 sps:$4 sm:$0xff]   ;;  %v8732_v59 = vld [vmem:[#allocation17 + $0x140] ss:$8 sps:$4 sm:$0xff]  }
 0xcf2   :  { %6834 = vmatpush1.bf16.msra.mxu0 %v8690_v48  ;;  %6916 = vmatpush1.bf16.msra.mxu1 %v8705_v61  ;;  %v8726_v48 = vld [vmem:[#allocation17 + $0x130] ss:$8 sps:$4 sm:$0xff]   ;;  %v8740_v61 = vld [vmem:[#allocation17 + $0x154] ss:$8 sps:$4 sm:$0xff]  }
 0xcf3   :  { %6835 = vmatprep.subr.bf16.mxu0 %v8698_v55  ;;  %6917 = vmatprep.subr.bf16.mxu1 %v8713_v47  ;;  %v8729_v55 = vld [vmem:[#allocation17 + $0x310] ss:$8 sps:$4 sm:$0xff]  }
 0xcf4   :  { %v8738_v47 = vld [vmem:[#allocation17 + $0x150] ss:$8 sps:$4 sm:$0xff]  }
 0xcf6   :  { %6836 = vmatpush1.bf16.msra.mxu0 %v8696_v58  ;;  %6918 = vmatpush1.bf16.msra.mxu1 %v8711_v0  ;;  %v8734_v58 = vld [vmem:[#allocation17 + $0x144] ss:$8 sps:$4 sm:$0xff]   ;;  %v8741_v0 = vld [vmem:[#allocation17 + $0x330] ss:$8 sps:$4 sm:$0xff]  }
 0xcf7   :  { %6837 = vmatprep.subr.bf16.mxu0 %v8704_v44  ;;  %6919 = vmatprep.subr.bf16.mxu1 %v8719_v1  ;;  %v8737_v44 = vld [vmem:[#allocation17 + $0x324] ss:$8 sps:$4 sm:$0xff]  }
 0xcf8   :  { %v8746_v1 = vld [vmem:[#allocation17 + $0x164] ss:$8 sps:$4 sm:$0xff]  }
 0xcfa   :  { %6838 = vmatpush1.bf16.msra.mxu0 %v8702_v60  ;;  %6920 = vmatpush1.bf16.msra.mxu1 %v8717_v14  ;;  %v8735_v60 = vld [vmem:[#allocation17 + $0x320] ss:$8 sps:$4 sm:$0xff]   ;;  %v8749_v14 = vld [vmem:[#allocation17 + $0x344] ss:$8 sps:$4 sm:$0xff]  }
 0xcfb   :  { %6848 = vmatprep.subr.bf16.mxu0 %v8710_v46  ;;  %6930 = vmatprep.subr.bf16.mxu1 %v8725_v15  ;;  %v8743_v46 = vld [vmem:[#allocation17 + $0x334] ss:$8 sps:$4 sm:$0xff]   ;;  %v8744_v15 = vld [vmem:[#allocation17 + $0x160] ss:$8 sps:$4 sm:$0xff]  }
 0xd88   :  { %v5881_v30 = vpop.f32.mrb[72].mxu1  ;;  %v10403_v7 = vpop.f32.mrb[60].mxu0 }
 0xd89   :  { %v8530_v6 = vadd.f32 %v5881_v30, %v4805_v62  ;;  %v5883_v13 = vpop.f32.mrb[73].mxu1  ;;  %v5924_v16 = vpop.f32.mrb[61].mxu0  ;;  %v8755_v62 = vld [vmem:[#allocation17 + $0x354] ss:$8 sps:$4 sm:$0xff]   ;;  %v8758_v30 = vld [vmem:[#allocation17 + $0x184] ss:$8 sps:$4 sm:$0xff]  }
 0xd8a   :  { %v8531_v35 = vadd.f32 %v5883_v13, %v4809_v41  ;;  %v8533_v5 = vadd.f32 %v5924_v16, %v4817_v24  ;;  %v5885_v9 = vpop.f32.mrb[74].mxu1  ;;  %v5926_v29 = vpop.f32.mrb[62].mxu0  ;;  %v8750_v41 = vld [vmem:[#allocation17 + $0x170] ss:$8 sps:$4 sm:$0xff]   ;;  %v8756_v13 = vld [vmem:[#allocation17 + $0x180] ss:$8 sps:$4 sm:$0xff]  }
 0xd8b   :  { %v5886_v11 = vpop.f32.mrb[75].mxu1  ;;  %v5927_v40 = vpop.f32.mrb[63].mxu0  ;;  %v6019_v10 = vpack.c.bf16 %v8530_v6, %v8530_v6  ;;  %v8753_v24 = vld [vmem:[#allocation17 + $0x350] ss:$8 sps:$4 sm:$0xff]   ;;  %v8761_v6 = vld [vmem:[#allocation17 + $0x364] ss:$8 sps:$4 sm:$0xff]  }
 0xd8c   :  { %v6020_v32 = vpack.c.bf16 %v8531_v35, %v8531_v35  ;;  %v6022_v37 = vpack.c.bf16 %v8533_v5, %v8533_v5  ;;  %v8759_v16 = vld [vmem:[#allocation17 + $0x360] ss:$8 sps:$4 sm:$0xff]   ;;  %v8767_v35 = vld [vmem:[#allocation17 + $0x374] ss:$8 sps:$4 sm:$0xff]   ;;  %v8762_v5 = vld [vmem:[#allocation17 + $0x190] ss:$8 sps:$4 sm:$0xff]  }
 0xd8d   :  { %v8765_v9 = vld [vmem:[#allocation17 + $0x370] ss:$8 sps:$4 sm:$0xff]   ;;  %v8770_v29 = vld [vmem:[#allocation17 + $0x1a4] ss:$8 sps:$4 sm:$0xff]   ;;  %v8768_v11 = vld [vmem:[#allocation17 + $0x1a0] ss:$8 sps:$4 sm:$0xff]  }
 0xd8e   :  { %6839 = vmatprep.mubr.bf16.mxu0 %v6020_v32  ;;  %v8771_v40 = vld [vmem:[#allocation17 + $0x380] ss:$8 sps:$4 sm:$0xff]   ;;  %v8779_v32 = vld [vmem:[#allocation17 + $0x394] ss:$8 sps:$4 sm:$0xff]  }
 0xd8f   :  { %6840 = vmatmul.mubr.bf16.vlgmr.msra.gmra.mrb[68].mxu0 %v6019_v10  ;;  %v8777_v10 = vld [vmem:[#allocation17 + $0x390] ss:$8 sps:$4 sm:$0xff]  }
 0xd90   :  { %6849 = vmatpush1.bf16.msra.mxu0 %v8708_v25  ;;  %v5963_v2 = vpop.f32.mrb[76].mxu1  ;;  %v10411_v31 = vpop.f32.mrb[64].mxu0  ;;  %6880 = vmatprep.mubr.bf16.mxu0 %v6022_v37  ;;  %v8774_v25 = vld [vmem:[#allocation17 + $0x1b0] ss:$8 sps:$4 sm:$0xff]   ;;  %v8780_v37 = vld [vmem:[#allocation17 + $0x1c0] ss:$8 sps:$4 sm:$0xff]  }
 0xd91   :  { %v8534_v36 = vadd.f32 %v5963_v2, %v4821_v8  ;;  %v5965_v26 = vpop.f32.mrb[77].mxu1  ;;  %v6006_v27 = vpop.f32.mrb[65].mxu0  ;;  %6850 = vmatprep.subr.bf16.mxu0 %v8716_v17  ;;  %v8782_v8 = vld [vmem:[#allocation17 + $0x1c4] ss:$8 sps:$4 sm:$0xff]   ;;  %v8791_v2 = vld [vmem:[#allocation17 + $0x3b4] ss:$8 sps:$4 sm:$0xff]  }
 0xd92   :  { %v8535_v56 = vadd.f32 %v5965_v26, %v4825_v57  ;;  %v5967_v39 = vpop.f32.mrb[78].mxu1  ;;  %v6008_v4 = vpop.f32.mrb[66].mxu0  ;;  %v8537_v42 = vadd.f32 %v6006_v27, %v4833_v3  ;;  %v8785_v17 = vld [vmem:[#allocation17 + $0x3a4] ss:$8 sps:$4 sm:$0xff]   ;;  %v8783_v57 = vld [vmem:[#allocation17 + $0x3a0] ss:$8 sps:$4 sm:$0xff]  }
 0xd93   :  { %v5968_v19 = vpop.f32.mrb[79].mxu1  ;;  %v6009_v20 = vpop.f32.mrb[67].mxu0  ;;  %v6023_v12 = vpack.c.bf16 %v8534_v36, %v8534_v36  ;;  %v8788_v3 = vld [vmem:[#allocation17 + $0x1d4] ss:$8 sps:$4 sm:$0xff]   ;;  %v8789_v36 = vld [vmem:[#allocation17 + $0x3b0] ss:$8 sps:$4 sm:$0xff]  }
 0xd94   :  { %v6024_v45 = vpack.c.bf16 %v8535_v56, %v8535_v56  ;;  %6851 = vmatpush1.bf16.msra.mxu0 %v8714_v33  ;;  %v6026_v54 = vpack.c.bf16 %v8537_v42, %v8537_v42  ;;  %v8786_v33 = vld [vmem:[#allocation17 + $0x1d0] ss:$8 sps:$4 sm:$0xff]   ;;  %v4812_v26 = vsub.s32 2, %v10389_v18  ;;  %v8794_v27 = vld [vmem:[#allocation17 + $0x1e4] ss:$8 sps:$4 sm:$0xff]  }
 0xd95   :  { %6852 = vmatprep.subr.bf16.mxu0 %v8722_v38  ;;  %v8797_v38 = vld [vmem:[#allocation17 + $0x3c4] ss:$8 sps:$4 sm:$0xff]   ;;  %v8792_v56 = vld [vmem:[#allocation17 + $0x1e0] ss:$8 sps:$4 sm:$0xff]   ;;  %v8800_v42 = vld [vmem:[#allocation17 + $0x1f4] ss:$8 sps:$4 sm:$0xff]  }
 0xd96   :  { %6921 = vmatprep.mubr.bf16.mxu1 %v6024_v45  ;;  %v8795_v39 = vld [vmem:[#allocation17 + $0x3c0] ss:$8 sps:$4 sm:$0xff]   ;;  %v4813_v4 = vrot.slane %v10392_v50, %v4812_v26  ;;  %v8803_v19 = vld [vmem:[#allocation17 + $0x3d4] ss:$8 sps:$4 sm:$0xff]   ;;  %v6988_v45 = vld [vmem:[%s10549_s15 + $0x88] sm:$0xff] }
 0xd97   :  { %6922 = vmatmul.mubr.bf16.vlgmr.msra.gmra.mrb[80].mxu1 %v6023_v12  ;;  %v6987_v20 = vld [vmem:[%s10549_s15 + $0x80] sm:$0xff] }
 0xd98   :  { %6853 = vmatpush1.bf16.msra.mxu0 %v8720_v43  ;;  %6931 = vmatpush1.bf16.msra.mxu1 %v8723_v49  ;;  %v8798_v43 = vld [vmem:[#allocation17 + $0x1f0] ss:$8 sps:$4 sm:$0xff]   ;;  %v8532_v12 = vadd.f32 %v10403_v7, %v4813_v4  ;;  %v6990_v7 = vld [vmem:[%s10549_s15 + $0x98] sm:$0xff] }
 0xd99   :  { %6962 = vmatprep.mubr.bf16.mxu1 %v6026_v54  ;;  %6854 = vmatprep.subr.bf16.mxu0 %v8728_v52  ;;  %v8801_v49 = vld [vmem:[#allocation17 + $0x3d0] ss:$8 sps:$4 sm:$0xff]   ;;  %v4828_v52 = vsub.s32 6, %v10389_v18  ;;  %v8496_v54 = vpack.c.bf16 %v6988_v45, %v6987_v20  ;;  %v6986_v4 = vld [vmem:[%s10549_s15 + $0x78] sm:$0xff] }
 0xd9a   :  { %6932 = vmatprep.subr.bf16.mxu1 %v8731_v53  ;;  %v8806_v53 = vld [vmem:[#allocation17 + $0x3e4] ss:$8 sps:$4 sm:$0xff]  }
 0xd9c   :  { %6855 = vmatpush1.bf16.msra.mxu0 %v8726_v48  ;;  %6933 = vmatpush1.bf16.msra.mxu1 %v8729_v55  ;;  %v6971_v48 = vld [vmem:[%s10549_s15] sm:$0xff]  ;;  %v6972_v55 = vld [vmem:[%s10549_s15 + $0x8] sm:$0xff] }
 0xd9d   :  { %6856 = vmatprep.subr.bf16.mxu0 %v8734_v58  ;;  %6934 = vmatprep.subr.bf16.mxu1 %v8737_v44  ;;  %v6989_v58 = vld [vmem:[%s10549_s15 + $0x90] sm:$0xff]  ;;  %v8804_v44 = vld [vmem:[#allocation17 + $0x3e0] ss:$8 sps:$4 sm:$0xff]  }
 0xda0   :  { %6857 = vmatpush1.bf16.msra.mxu0 %v8732_v59  ;;  %6935 = vmatpush1.bf16.msra.mxu1 %v8735_v60  ;;  %v8498_v59 = vpack.c.bf16 %v6972_v55, %v6971_v48  ;;  %v6021_v60 = vpack.c.bf16 %v8532_v12, %v8532_v12 }
 0xda1   :  { %6858 = vmatprep.subr.bf16.mxu0 %v8740_v61  ;;  %6936 = vmatprep.subr.bf16.mxu1 %v8743_v46  ;;  %v4829_v61 = vrot.slane %v10392_v50, %v4828_v52  ;;  %v8809_v46 = vld [vmem:[#allocation17 + $0x3f4] ss:$8 sps:$4 sm:$0xff]   ;;  %v6992_v50 = vld [vmem:[%s10549_s15 + $0xa8] sm:$0xff] }
 0xda4   :  { %6859 = vmatpush1.bf16.msra.mxu0 %v8738_v47  ;;  %6937 = vmatpush1.bf16.msra.mxu1 %v8741_v0  ;;  %v8500_v47 = vpack.c.bf16 %v6990_v7, %v6989_v58  ;;  %v6973_v0 = vld [vmem:[%s10549_s15 + $0x10] sm:$0xff] }
 0xda5   :  { %6860 = vmatprep.subr.bf16.mxu0 %v8746_v1  ;;  %6938 = vmatprep.subr.bf16.mxu1 %v8749_v14  ;;  %v6974_v1 = vld [vmem:[%s10549_s15 + $0x18] sm:$0xff]  ;;  %v6991_v14 = vld [vmem:[%s10549_s15 + $0xa0] sm:$0xff] }
 0xda8   :  { %6861 = vmatpush1.bf16.msra.mxu0 %v8744_v15  ;;  %6939 = vmatpush1.bf16.msra.mxu1 %v8747_v28  ;;  %v8807_v15 = vld [vmem:[#allocation17 + $0x3f0] ss:$8 sps:$4 sm:$0xff]   ;;  %v8502_v28 = vpack.c.bf16 %v6974_v1, %v6973_v0 }
 0xda9   :  { %6862 = vmatprep.subr.bf16.mxu0 %v8752_v51  ;;  %6940 = vmatprep.subr.bf16.mxu1 %v8755_v62  ;;  %v8536_v51 = vadd.f32 %v10411_v31, %v4829_v61  ;;  %v8504_v62 = vpack.c.bf16 %v6992_v50, %v6991_v14  ;;  %v7434_v61 = vld [vmem:[%s10550_s16] ss:$0 sm:$0xff] }
 0xdac   :  { %6863 = vmatpush1.bf16.msra.mxu0 %v8750_v41  ;;  %6941 = vmatpush1.bf16.msra.mxu1 %v8753_v24  ;;  %v6975_v41 = vld [vmem:[%s10549_s15 + $0x20] sm:$0xff]  ;;  %v6976_v24 = vld [vmem:[%s10549_s15 + $0x28] sm:$0xff] }
 0xdad   :  { %6864 = vmatprep.subr.bf16.mxu0 %v8758_v30  ;;  %6942 = vmatprep.subr.bf16.mxu1 %v8761_v6  ;;  %v6993_v30 = vld [vmem:[%s10549_s15 + $0xb0] sm:$0xff]  ;;  %v6994_v6 = vld [vmem:[%s10549_s15 + $0xb8] sm:$0xff]  ;;  %v8506_v31 = vpack.c.bf16 %v6976_v24, %v6975_v41 }
 0xdb0   :  { %6865 = vmatpush1.bf16.msra.mxu0 %v8756_v13  ;;  %6943 = vmatpush1.bf16.msra.mxu1 %v8759_v16  ;;  %v6025_v13 = vpack.c.bf16 %v8536_v51, %v8536_v51  ;;  %v8508_v16 = vpack.c.bf16 %v6994_v6, %v6993_v30 }
 0xdb1   :  { %6866 = vmatprep.subr.bf16.mxu0 %v8764_v34  ;;  %6944 = vmatprep.subr.bf16.mxu1 %v8767_v35  ;;  %v6977_v34 = vld [vmem:[%s10549_s15 + $0x30] sm:$0xff]  ;;  %v6978_v35 = vld [vmem:[%s10549_s15 + $0x38] sm:$0xff] }
 0xdb4   :  { %6867 = vmatpush1.bf16.msra.mxu0 %v8762_v5  ;;  %6945 = vmatpush1.bf16.msra.mxu1 %v8765_v9  ;;  %v6995_v5 = vld [vmem:[%s10549_s15 + $0xc0] sm:$0xff]  ;;  %v6996_v9 = vld [vmem:[%s10549_s15 + $0xc8] sm:$0xff] }
 0xdb5   :  { %6868 = vmatprep.subr.bf16.mxu0 %v8770_v29  ;;  %6946 = vmatprep.subr.bf16.mxu1 %v8773_v22  ;;  %v8510_v29 = vpack.c.bf16 %v6978_v35, %v6977_v34  ;;  %v8512_v22 = vpack.c.bf16 %v6996_v9, %v6995_v5 }
 0xdb8   :  { %6869 = vmatpush1.bf16.msra.mxu0 %v8768_v11  ;;  %6947 = vmatpush1.bf16.msra.mxu1 %v8771_v40  ;;  %v6979_v11 = vld [vmem:[%s10549_s15 + $0x40] sm:$0xff]  ;;  %v6980_v40 = vld [vmem:[%s10549_s15 + $0x48] sm:$0xff] }
 0xdb9   :  { %6870 = vmatprep.subr.bf16.mxu0 %v8776_v23  ;;  %6948 = vmatprep.subr.bf16.mxu1 %v8779_v32  ;;  %v8514_v23 = vpack.c.bf16 %v6980_v40, %v6979_v11  ;;  %v6997_v32 = vld [vmem:[%s10549_s15 + $0xd0] sm:$0xff] }
 0xdbc   :  { %6871 = vmatpush1.bf16.msra.mxu0 %v8774_v25  ;;  %6949 = vmatpush1.bf16.msra.mxu1 %v8777_v10  ;;  %v6998_v25 = vld [vmem:[%s10549_s15 + $0xd8] sm:$0xff] }
 0xdbd   :  { %6872 = vmatprep.subr.bf16.mxu0 %v8782_v8  ;;  %6950 = vmatprep.subr.bf16.mxu1 %v8785_v17  ;;  %v8516_v10 = vpack.c.bf16 %v6998_v25, %v6997_v32  ;;  %v6981_v8 = vld [vmem:[%s10549_s15 + $0x50] sm:$0xff]  ;;  %v6982_v17 = vld [vmem:[%s10549_s15 + $0x58] sm:$0xff] }
 0xdc0   :  { %6873 = vmatpush1.bf16.msra.mxu0 %v8780_v37  ;;  %6951 = vmatpush1.bf16.msra.mxu1 %v8783_v57  ;;  %v8518_v37 = vpack.c.bf16 %v6982_v17, %v6981_v8  ;;  %v6999_v57 = vld [vmem:[%s10549_s15 + $0xe0] sm:$0xff] }
 0xdc1   :  { %6874 = vmatprep.subr.bf16.mxu0 %v8788_v3  ;;  %6952 = vmatprep.subr.bf16.mxu1 %v8791_v2  ;;  %v7000_v3 = vld [vmem:[%s10549_s15 + $0xe8] sm:$0xff] }
 0xdc2   :  { %v8520_v2 = vpack.c.bf16 %v7000_v3, %v6999_v57 }
 0xdc4   :  { %6875 = vmatpush1.bf16.msra.mxu0 %v8786_v33  ;;  %6953 = vmatpush1.bf16.msra.mxu1 %v8789_v36  ;;  %v6983_v33 = vld [vmem:[%s10549_s15 + $0x60] sm:$0xff]  ;;  %v6984_v36 = vld [vmem:[%s10549_s15 + $0x68] sm:$0xff] }
 0xdc5   :  { %6876 = vmatprep.subr.bf16.mxu0 %v8794_v27  ;;  %6954 = vmatprep.subr.bf16.mxu1 %v8797_v38  ;;  %v8522_v26 = vpack.c.bf16 %v6984_v36, %v6983_v33  ;;  %v7001_v27 = vld [vmem:[%s10549_s15 + $0xf0] sm:$0xff]  ;;  %v7002_v38 = vld [vmem:[%s10549_s15 + $0xf8] sm:$0xff] }
 0xdc8   :  { %6877 = vmatpush1.bf16.msra.mxu0 %v8792_v56  ;;  %6955 = vmatpush1.bf16.msra.mxu1 %v8795_v39  ;;  %v8524_v56 = vpack.c.bf16 %v7002_v38, %v7001_v27  ;;  %v6985_v39 = vld [vmem:[%s10549_s15 + $0x70] sm:$0xff] }
 0xdc9   :  { %6878 = vmatprep.subr.bf16.mxu0 %v8800_v42  ;;  %6956 = vmatprep.subr.bf16.mxu1 %v8803_v19  ;;  %v8526_v42 = vpack.c.bf16 %v6986_v4, %v6985_v39  ;;  %v6155_v19 = vld [vmem:[#allocation19] sm:$0x3] }
 0xdca   :  { %v6164_v52 = vrot.slane %v6155_v19, %v4808_v63 }
 0xdcc   :  { %6879 = vmatpush1.bf16.msra.mxu0 %v8798_v43  ;;  %6957 = vmatpush1.bf16.msra.mxu1 %v8801_v49  ;;  %v6160_v49 = vrot.slane %v6155_v19, %v4804_v21 }
 0xdcd   :  { %6958 = vmatprep.subr.bf16.mxu1 %v8806_v53  ;;  %8497 = vmatprep.subr.bf16.mxu0 %v8496_v54 }
 0xdcf   :  { %6881 = vmatmul.mubr.bf16.vlgmr.msra.gmra.mrb[68].mxu0 %v6021_v60 }
 0xdd0   :  { %6959 = vmatpush1.bf16.msra.mxu1 %v8804_v44  ;;  %8499 = vmatpush3.bf16.msra.mxu0 %v8498_v59 }
 0xdd1   :  { %6960 = vmatprep.subr.bf16.mxu1 %v8809_v46  ;;  %8501 = vmatprep.subr.bf16.mxu0 %v8500_v47 }
 0xdd4   :  { %6961 = vmatpush1.bf16.msra.mxu1 %v8807_v15  ;;  %8503 = vmatpush3.bf16.msra.mxu0 %v8502_v28 }
 0xdd5   :  { %8505 = vmatprep.subr.bf16.mxu0 %v8504_v62 }
 0xdd7   :  { %6963 = vmatmul.mubr.bf16.vlgmr.msra.gmra.mrb[80].mxu1 %v6025_v13 }
 0xdd8   :  { %8507 = vmatpush3.bf16.msra.mxu0 %v8506_v31 }
 0xdd9   :  { %8509 = vmatprep.subr.bf16.mxu0 %v8508_v16 }
 0xddc   :  { %8511 = vmatpush3.bf16.msra.mxu0 %v8510_v29 }
 0xddd   :  { %8513 = vmatprep.subr.bf16.mxu0 %v8512_v22 }
 0xde0   :  { %8515 = vmatpush3.bf16.msra.mxu0 %v8514_v23 }
 0xde1   :  { %8517 = vmatprep.subr.bf16.mxu0 %v8516_v10 }
 0xde4   :  { %8519 = vmatpush3.bf16.msra.mxu0 %v8518_v37 }
 0xde5   :  { %8521 = vmatprep.subr.bf16.mxu0 %v8520_v2 }
 0xde8   :  { %8523 = vmatpush3.bf16.msra.mxu0 %v8522_v26 }
 0xde9   :  { %8525 = vmatprep.subr.bf16.mxu0 %v8524_v56 }
 0xdec   :  { %8527 = vmatpush3.bf16.msra.mxu0 %v8526_v42 }
 0xea2   :  { %v6882_v20 = vpop.f32.mrb[68].mxu0 }
 0xea3   :  { %v6884_v45 = vpop.f32.mrb[69].mxu0  ;;  %v8538_v53 = vadd.f32 %v6882_v20, %v6160_v49 }
 0xea4   :  { %v6886_v43 = vpop.f32.mrb[70].mxu0  ;;  %v8540_v54 = vadd.f32 %v6884_v45, %v6164_v52 }
 0xea5   :  { %v6887_v12 = vpop.f32.mrb[71].mxu0 }
 0xeaa   :  { %v6964_v48 = vpop.f32.mrb[80].mxu1 }
 0xeab   :  { %v8539_v55 = vadd.f32 %v8538_v53, %v6964_v48  ;;  %v6966_v58 = vpop.f32.mrb[81].mxu1 }
 0xeac   :  { %v8541_v7 = vadd.f32 %v8540_v54, %v6966_v58  ;;  %v6968_v44 = vpop.f32.mrb[82].mxu1 }
 0xead   :  { %v6969_v59 = vpop.f32.mrb[83].mxu1 }
 0xeae   :  { %7074 = vmatprep.mubr.f32.mxu0 %v8541_v7 }
 0xeaf   :  { %7075 = vmatmul.mubr.f32.vlgmr.msra.gmra.mrb[58].mxu0 %v8539_v55 }
 0xf82   :  { %v7717_v60 = vpop.f32.mrb[58].mxu0 }
 0xf83   :  { %v7718_v21 = vpop.f32.mrb[59].mxu0 }
 0xf84   :  { %v7719_v18 = vadd.f32 %v7718_v21, %v7717_v60 }
 0xf86   :  { %v7077_v63 = vadd.f32 %v7719_v18, %v7434_v61 }
 0xf88   :  { %7081 = vst.msk [vmem:[#allocation20] sm:$0xff] %vm7080_vm11, %v7077_v63 }
 0xf89   :  { %9191 = shalt.err (!%p9188_p8)
}
 0xf8a   :  { %s9192_s1 = scalar_lea.hbm %s10551_s17, 128 }
 0xf8b   :  { %p9193_p9 = scmp.ne.s32.totalorder %s10551_s17, %s9192_s1  ;;  %p9196_p10 = scmp.lt.u32.totalorder %s9192_s1, %s10551_s17 }
 0xf8d   :  { %p9198_p11 = pnand %p9196_p10, %p9193_p9 }
 0xf8f   :  { %9201 = shalt.err (!%p9198_p11)
}
 0xf90   :  { %7091 = dma.vmem_to_hbm [thread:$0]  %s7089_s22, 128, %s10551_s17, [#allocation4]  }
 0xf91   :  { %9214 = dma.done.wait [#allocation4], 128  }
 0xf92   :  { %9215 = vsyncadd [#allocation4], 4294967168 }
 0xf93   :  { %7095 = vsyncpa [#allocation3], 1 }
 0xf94   :  { %7096 = vsyncpa [#allocation6], 1 }
 0xf95   :  { %7097 = vsyncpa [#allocation9], 1 }
 0xf96   :  { %7098 = vsyncpa [#allocation12], 1 }
 0xf97   :  { %7099 = vsyncpa [#allocation15], 1 }
 0xf98   :  { %7100 = vsyncpa [#allocation18], 1 }
 0xf99   :  { %7101 = vsyncpa [#allocation4], 1 }

</bundles_post_ra>
